<compile_context>
chip_gen: v5e
topology: v5e:2x2
jax: 0.10.0
libtpu: 0.0.40
codegen_flags: <defaults>
</compile_context>

<pallas_src>
import jax
import jax.numpy as jnp
from jax.experimental import pallas as pl
from jax.experimental.pallas import tpu as pltpu

# ---------------- hyperparameters (small, consistent with the module) ----------
NUM_TEAMS, TEAM_DIM = 10, 8
NUM_ARB, ARB_DIM = 6, 4
NUM_COMP, COMP_DIM = 3, 4
NUM_PLAYERS, PLAYER_DIM = 20, 8
PAD_IDX = NUM_PLAYERS               # padding row of player_emb (zeros)
SEQ_IN = 8                          # LSTM input feature size
LSTM_HID = 16
NUM_ODDS = 3
NUM_OUT = 3
FC_HID = 32
B, T, P = 16, 8, 5                  # batch (>=8 per perf review), seq len, players
COMBINED = (2 * (2 * LSTM_HID) + 2 * TEAM_DIM + ARB_DIM + COMP_DIM
            + 2 * PLAYER_DIM + NUM_ODDS)          # 107

H = LSTM_HID
S = 4 * H                           # 64 lanes: 4 fused streams (locF,locB,visF,visB)
G = 4 * S                           # 256 lanes: gate-major layout [i|f|g|o] x 4 streams

CTX_W = 2 * (2 * LSTM_HID)          # 64: [ctx_lo | ctx_vo]
STAT_USED = COMBINED - CTX_W        # 43 real static features
SFEAT_W = 64                        # static-feature buffer width (43 + 1.0 lane + pad)
FEAT_PAD = CTX_W + SFEAT_W          # 128-lane FC input slab

# row offsets inside the packed LSTM/attention weight slab (all multiples of 8)
_WIH1, _WHH1, _B1 = 0, 16, 80
_WIH2, _WHH2, _B2 = 88, 152, 216
_ATTW = 224
LSTM_W_ROWS = 232
# row offsets inside the packed FC weight slab
_FW1, _FW2, _FB2, _FW3, _FB3 = 0, 128, 160, 168, 184
FC_W_ROWS = 192


# ---------------- fused Pallas kernel -------------------------------------------
def _fused_forward_kernel(seq_ref, sfeat_ref, lw_ref, fcw_ref, out_ref):
    Tn, Bt, _ = seq_ref.shape

    # static lane masks: every 2H-lane pair is [fwd stream (H) | bwd stream (H)]
    fwd_g = (jax.lax.broadcasted_iota(jnp.int32, (1, G), 1) % (2 * H)) < H    # (1,256)
    fwd_s = (jax.lax.broadcasted_iota(jnp.int32, (1, S), 1) % (2 * H)) < H    # (1,64)
    team_l = jax.lax.broadcasted_iota(jnp.int32, (1, 1, S), 2) < (S // 2)     # loc lanes

    lw = lw_ref[...]
    wih1 = lw[_WIH1:_WIH1 + 2 * SEQ_IN]              # (16, 256)
    whh1 = lw[_WHH1:_WHH1 + S]                       # (64, 256)
    b1 = lw[_B1:_B1 + 1]                             # (1, 256)
    wih2 = lw[_WIH2:_WIH2 + S]                       # (64, 256)
    whh2 = lw[_WHH2:_WHH2 + S]                       # (64, 256)
    b2 = lw[_B2:_B2 + 1]                             # (1, 256)
    attw = lw[_ATTW:_ATTW + 1, :S]                   # (1, 64) = [w_loc | w_vis]

    def lstm4(x_tm, wih, whh, b):
        """4 fused LSTM streams (locF, locB, visF, visB), time-major input.
        x_tm: (T, Bt, Din). Returns time-aligned hidden states (T, Bt, 64)."""
        Din = x_tm.shape[-1]
        # input->gate contribution for all timesteps + bias: ONE matmul, off the chain
        a = jnp.dot(x_tm.reshape(Tn * Bt, Din), wih,
                    preferred_element_type=jnp.float32) + b
        a = a.reshape(Tn, Bt, G)                     # time-major: a[t] is contiguous
        # bwd streams consume the time-reversed input; select hoisted out of the loop
        a_sel = [jnp.where(fwd_g, a[t], a[Tn - 1 - t]) for t in range(Tn)]
        h = jnp.zeros((Bt, S), jnp.float32)
        c = jnp.zeros((Bt, S), jnp.float32)
        hs = []
        for t in range(Tn):                          # static unroll (T = 8)
            gates = a_sel[t] + jnp.dot(h, whh, preferred_element_type=jnp.float32)
            sg = jax.nn.sigmoid(gates)               # one full-width EUP push (i,f,o)
            th = jnp.tanh(gates)                     # one full-width EUP push (g)
            c = sg[:, S:2 * S] * c + sg[:, :S] * th[:, 2 * S:3 * S]   # f*c + i*g
            h = sg[:, 3 * S:] * jnp.tanh(c)                            # o*tanh(c)
            hs.append(h)
        # time-align: bwd stream output produced at step t belongs to time Tn-1-t
        rows = [jnp.where(fwd_s, hs[t], hs[Tn - 1 - t]) for t in range(Tn)]
        return jnp.stack(rows, axis=0)               # (T, Bt, 64)

    y1 = lstm4(seq_ref[...], wih1, whh1, b1)         # (T, Bt, 64)
    y2 = lstm4(y1, wih2, whh2, b2)                   # (T, Bt, 64)

    # attention: Linear(2H,1) as VPU mul + lane reduce; softmax over time.
    # (the Linear bias is constant over time so it cancels exactly in the softmax)
    p = y2 * attw                                    # (T, Bt, 64)
    s_loc = jnp.sum(p[:, :, :S // 2], axis=2, keepdims=True)     # (T, Bt, 1)
    s_vis = jnp.sum(p[:, :, S // 2:], axis=2, keepdims=True)

    def softmax_time(s):
        m = jnp.max(s, axis=0, keepdims=True)
        e = jnp.exp(s - m)
        return e * pl.reciprocal(jnp.sum(e, axis=0, keepdims=True), approx=True)

    a_cat = jnp.where(team_l, softmax_time(s_loc), softmax_time(s_vis))
    ctx = jnp.sum(y2 * a_cat, axis=0)                # (Bt, 64) = [ctx_lo | ctx_vo]

    # MLP: FC1 bias is folded into the padded weight slab via the 1.0 lane in sfeat
    fw = fcw_ref[...]
    feat = jnp.concatenate([ctx, sfeat_ref[...]], axis=1)        # (Bt, 128)
    h1 = jnp.maximum(jnp.dot(feat, fw[_FW1:_FW1 + FEAT_PAD],
                             preferred_element_type=jnp.float32), 0.0)
    h2 = jnp.maximum(jnp.dot(h1, fw[_FW2:_FW2 + FC_HID, :FC_HID // 2],
                             preferred_element_type=jnp.float32)
                     + fw[_FB2:_FB2 + 1, :FC_HID // 2], 0.0)
    out_ref[...] = (jnp.dot(h2, fw[_FW3:_FW3 + FC_HID // 2, :NUM_OUT],
                            preferred_element_type=jnp.float32)
                    + fw[_FB3:_FB3 + 1, :NUM_OUT])


def fused_forward(seq_tm, sfeat, lstm_w, fc_w, *, batch_blocks=2):
    """batch_blocks=2 shards the batch over the two TensorCores on v7x via the
    "parallel" grid axis; on single-TC chips (v5e/v6e) the blocks run back-to-back."""
    Tn, Bq, Fin = seq_tm.shape
    assert Bq % batch_blocks == 0, (Bq, batch_blocks)
    Bt = Bq // batch_blocks
    assert Bt % 8 == 0 or Bt == Bq, "batch tile must fill sublanes (multiple of 8)"
    return pl.pallas_call(
        _fused_forward_kernel,
        out_shape=jax.ShapeDtypeStruct((Bq, NUM_OUT), jnp.float32),
        grid=(batch_blocks,),
        in_specs=[
            pl.BlockSpec((Tn, Bt, Fin), lambda i: (0, i, 0)),
            pl.BlockSpec((Bt, SFEAT_W), lambda i: (i, 0)),
            pl.BlockSpec(lstm_w.shape, lambda i: (0, 0)),    # weights: resident
            pl.BlockSpec(fc_w.shape, lambda i: (0, 0)),
        ],
        out_specs=pl.BlockSpec((Bt, NUM_OUT), lambda i: (i, 0)),
        compiler_params=pltpu.CompilerParams(dimension_semantics=("parallel",)),
    )(seq_tm, sfeat, lstm_w, fc_w)


# ---------------- parameters ----------------------------------------------------
def init_params(key):
    keys = iter(jax.random.split(key, 40))

    def nrm(shape, scale=0.1):
        return (scale * jax.random.normal(next(keys), shape)).astype(jnp.float32)

    params = {
        "team_emb": nrm((NUM_TEAMS, TEAM_DIM)),
        "arb_emb": nrm((NUM_ARB, ARB_DIM)),
        "comp_emb": nrm((NUM_COMP, COMP_DIM)),
        "player_emb": nrm((NUM_PLAYERS + 1, PLAYER_DIM)).at[PAD_IDX].set(0.0),
    }

    def lstm_stack():
        layers = []
        d_in = SEQ_IN
        for _ in range(2):                                     # 2 layers
            layer = {}
            for dname in ("fwd", "bwd"):                       # bidirectional
                # single bias == b_ih + b_hh (synthetic init)
                layer[dname] = (nrm((d_in, 4 * LSTM_HID)),
                                nrm((LSTM_HID, 4 * LSTM_HID)),
                                nrm((1, 4 * LSTM_HID)))
            layers.append(layer)
            d_in = 2 * LSTM_HID
        return layers

    params["lstm_loc"] = lstm_stack()
    params["lstm_vis"] = lstm_stack()
    params["att_loc"] = (nrm((2 * LSTM_HID, 1)), nrm((1, 1)))
    params["att_vis"] = (nrm((2 * LSTM_HID, 1)), nrm((1, 1)))
    params["fc"] = (nrm((COMBINED, FC_HID)), nrm((1, FC_HID)),
                    nrm((FC_HID, FC_HID // 2)), nrm((1, FC_HID // 2)),
                    nrm((FC_HID // 2, NUM_OUT)), nrm((1, NUM_OUT)))
    return params


def _pack_lstm_layer(streams, din):
    """Pack 4 (wih, whh, b) streams (locF, locB, visF, visB) into block weights.
    Column layout: col = gate*S + stream*H + k  (gate-major, PyTorch order i,f,g,o).
    wih block rows: [loc input (din) | vis input (din)];
    whh block rows: h_cat layout [h_locF | h_locB | h_visF | h_visB]."""
    wih_blk = jnp.zeros((2 * din, G), jnp.float32)
    whh_blk = jnp.zeros((S, G), jnp.float32)
    b_cat = jnp.zeros((1, G), jnp.float32)
    for s, (wih, whh, b) in enumerate(streams):
        rows = slice(0, din) if s < 2 else slice(din, 2 * din)
        for gidx in range(4):
            col = slice(gidx * S + s * H, gidx * S + (s + 1) * H)
            src = slice(gidx * H, (gidx + 1) * H)
            wih_blk = wih_blk.at[rows, col].set(wih[:, src])
            whh_blk = whh_blk.at[s * H:(s + 1) * H, col].set(whh[:, src])
            b_cat = b_cat.at[:, col].set(b[:, src])
    return wih_blk, whh_blk, b_cat


def pack_params(params):
    """One-time parameter transform: two consolidated weight slabs for the kernel."""
    packed = {k: params[k] for k in ("team_emb", "arb_emb", "comp_emb", "player_emb")}

    blocks = []
    for l in range(2):
        din = SEQ_IN if l == 0 else 2 * LSTM_HID
        streams = [params["lstm_loc"][l]["fwd"], params["lstm_loc"][l]["bwd"],
                   params["lstm_vis"][l]["fwd"], params["lstm_vis"][l]["bwd"]]
        blocks.append(_pack_lstm_layer(streams, din))
    (wih1, whh1, b1), (wih2, whh2, b2) = blocks

    lw = jnp.zeros((LSTM_W_ROWS, G), jnp.float32)
    lw = lw.at[_WIH1:_WIH1 + 2 * SEQ_IN].set(wih1)
    lw = lw.at[_WHH1:_WHH1 + S].set(whh1)
    lw = lw.at[_B1:_B1 + 1].set(b1)
    lw = lw.at[_WIH2:_WIH2 + S].set(wih2)
    lw = lw.at[_WHH2:_WHH2 + S].set(whh2)
    lw = lw.at[_B2:_B2 + 1].set(b2)
    attw = jnp.concatenate([params["att_loc"][0][:, 0], params["att_vis"][0][:, 0]])
    lw = lw.at[_ATTW, :S].set(attw)
    packed["lstm_w"] = lw

    w1, b1f, w2, b2f, w3, b3f = params["fc"]
    fcw = jnp.zeros((FC_W_ROWS, FC_HID), jnp.float32)
    fcw = fcw.at[_FW1:_FW1 + COMBINED].set(w1)       # rows 0..106
    fcw = fcw.at[_FW1 + COMBINED].set(b1f[0])        # row 107: bias, hit by 1.0 lane
    fcw = fcw.at[_FW2:_FW2 + FC_HID, :FC_HID // 2].set(w2)
    fcw = fcw.at[_FB2, :FC_HID // 2].set(b2f[0])
    fcw = fcw.at[_FW3:_FW3 + FC_HID // 2, :NUM_OUT].set(w3)
    fcw = fcw.at[_FB3, :NUM_OUT].set(b3f[0])
    packed["fc_w"] = fcw
    return packed


# ---------------- forward (single fused Pallas call) -----------------------------
def forward(packed, loc_seq, vis_seq, loc_i, vis_i, arb_i, comp_i, lp, vp, odds,
            *, batch_blocks=2):
    # data-dependent embedding gathers + masked player means stay in plain JAX
    # (XLA fuses the mean into the gather; removes 8 tiny kernel operands).
    te_loc = packed["team_emb"][loc_i]
    te_vis = packed["team_emb"][vis_i]
    arb_e = packed["arb_emb"][arb_i]
    comp_e = packed["comp_emb"][comp_i]
    ple = packed["player_emb"][lp]                             # (B, P, D)
    vpe = packed["player_emb"][vp]
    lmask = (lp != PAD_IDX)[..., None].astype(jnp.float32)     # (B, P, 1)
    vmask = (vp != PAD_IDX)[..., None].astype(jnp.float32)
    agg_lp = (ple * lmask).sum(1) / jnp.maximum(lmask.sum(1), 1.0)
    agg_vp = (vpe * vmask).sum(1) / jnp.maximum(vmask.sum(1), 1.0)

    Bq = loc_seq.shape[0]
    ones = jnp.ones((Bq, 1), jnp.float32)                      # FC1-bias fold lane
    zpad = jnp.zeros((Bq, SFEAT_W - STAT_USED - 1), jnp.float32)
    sfeat = jnp.concatenate([te_loc, te_vis, arb_e, comp_e,
                             agg_lp, agg_vp, odds, ones, zpad], axis=1)   # (B, 64)

    # time-major [loc | vis] sequence slab: a[t] becomes a contiguous sublane slice
    seq_tm = jnp.transpose(jnp.concatenate([loc_seq, vis_seq], axis=-1), (1, 0, 2))

    # TODO(synk): nn.Dropout is identity in eval mode; not modeled in the kernel.
    return fused_forward(seq_tm, sfeat, packed["lstm_w"], packed["fc_w"],
                         batch_blocks=batch_blocks)


# ---------------- pure-JAX reference (unpacked params) ---------------------------
def _ref_lstm_layer(x_tm, wih, whh, b):
    Hh = whh.shape[0]

    def step(carry, x_t):
        h, c = carry
        gates = x_t @ wih + h @ whh + b[0]
        i = jax.nn.sigmoid(gates[:, :Hh])
        f = jax.nn.sigmoid(gates[:, Hh:2 * Hh])
        g = jnp.tanh(gates[:, 2 * Hh:3 * Hh])
        o = jax.nn.sigmoid(gates[:, 3 * Hh:])
        c = f * c + i * g
        h = o * jnp.tanh(c)
        return (h, c), h

    Bq = x_tm.shape[1]
    init = (jnp.zeros((Bq, Hh), jnp.float32), jnp.zeros((Bq, Hh), jnp.float32))
    _, ys = jax.lax.scan(step, init, x_tm)
    return ys


def _ref_forward(params, loc_seq, vis_seq, loc_i, vis_i, arb_i, comp_i, lp, vp, odds):
    def bidir(x, layers):
        h = jnp.transpose(x, (1, 0, 2))
        for layer in layers:
            fwd = _ref_lstm_layer(h, *layer["fwd"])
            bwd = _ref_lstm_layer(h[::-1], *layer["bwd"])[::-1]
            h = jnp.concatenate([fwd, bwd], axis=-1)
        return jnp.transpose(h, (1, 0, 2))

    def attn(lo, w, b):
        s = jnp.einsum("btd,dk->btk", lo, w) + b
        a = jax.nn.softmax(s, axis=1)
        return jnp.sum(lo * a, axis=1)

    te_loc = params["team_emb"][loc_i]
    te_vis = params["team_emb"][vis_i]
    arb_e = params["arb_emb"][arb_i]
    comp_e = params["comp_emb"][comp_i]
    lo = bidir(loc_seq, params["lstm_loc"])
    vo = bidir(vis_seq, params["lstm_vis"])
    ctx_lo = attn(lo, *params["att_loc"])
    ctx_vo = attn(vo, *params["att_vis"])
    ple = params["player_emb"][lp]
    vpe = params["player_emb"][vp]
    mlp_m = (lp != PAD_IDX)[..., None].astype(jnp.float32)
    mvp_m = (vp != PAD_IDX)[..., None].astype(jnp.float32)
    agg_lp = (ple * mlp_m).sum(1) / jnp.maximum(mlp_m.sum(1), 1.0)
    agg_vp = (vpe * mvp_m).sum(1) / jnp.maximum(mvp_m.sum(1), 1.0)
    feat = jnp.concatenate([ctx_lo, ctx_vo, te_loc, te_vis, arb_e, comp_e,
                            agg_lp, agg_vp, odds], axis=1)
    w1, b1, w2, b2, w3, b3 = params["fc"]
    h1 = jax.nn.relu(feat @ w1 + b1)
    h2 = jax.nn.relu(h1 @ w2 + b2)
    return h2 @ w3 + b3


# ---------------- main ------------------------------------------------------------
if __name__ == "__main__":
    key = jax.random.PRNGKey(0)
    kp, k1, k2, k3, k4, k5, k6, k7, k8, k9 = jax.random.split(key, 10)
    params = init_params(kp)
    packed = pack_params(params)                 # one-time weight packing

    loc_seq = jax.random.normal(k1, (B, T, SEQ_IN), jnp.float32)
    vis_seq = jax.random.normal(k2, (B, T, SEQ_IN), jnp.float32)
    loc_i = jax.random.randint(k3, (B,), 0, NUM_TEAMS)
    vis_i = jax.random.randint(k4, (B,), 0, NUM_TEAMS)
    arb_i = jax.random.randint(k5, (B,), 0, NUM_ARB)
    comp_i = jax.random.randint(k6, (B,), 0, NUM_COMP)
    lp = jax.random.randint(k7, (B, P), 0, NUM_PLAYERS)
    vp = jax.random.randint(k8, (B, P), 0, NUM_PLAYERS)
    lp = lp.at[0, -2:].set(PAD_IDX)              # some padded players
    vp = vp.at[1, -1:].set(PAD_IDX)
    odds = jax.random.uniform(k9, (B, NUM_ODDS), jnp.float32, 0.1, 0.9)

    fwd = jax.jit(forward)
    out = jax.block_until_ready(
        fwd(packed, loc_seq, vis_seq, loc_i, vis_i, arb_i, comp_i, lp, vp, odds))
    assert out.shape == (B, NUM_OUT), out.shape

    ref = _ref_forward(params, loc_seq, vis_seq, loc_i, vis_i, arb_i, comp_i,
                       lp, vp, odds)
    assert jnp.allclose(out, ref, atol=2e-3, rtol=2e-3), (out, ref)
    print("KERNEL_OK")
</pallas_src>

<mosaic_0001>
module attributes {stable_mosaic.version = 11 : i64} {
  func.func @_fused_forward_kernel(%arg0: i32, %arg1: memref<8x8x16xf32, #tpu.memory_space<vmem>>, %arg2: memref<8x64xf32, #tpu.memory_space<vmem>>, %arg3: memref<232x256xf32, #tpu.memory_space<vmem>>, %arg4: memref<192x32xf32, #tpu.memory_space<vmem>>, %arg5: memref<8x3xf32, #tpu.memory_space<vmem>>) attributes {dimension_semantics = [#tpu.dimension_semantics<parallel>], iteration_bounds = array<i64: 2>, scalar_prefetch = 0 : i64, scratch_operands = 0 : i64, tpu.core_type = #tpu.core_type<tc>, window_params = [{transform_indices = @transform_0, window_bounds = array<i64: 8, 8, 16>}, {transform_indices = @transform_1, window_bounds = array<i64: 8, 64>}, {pipeline_mode = #tpu.pipeline_mode<synchronous>, transform_indices = @transform_2, window_bounds = array<i64: 232, 256>}, {pipeline_mode = #tpu.pipeline_mode<synchronous>, transform_indices = @transform_3, window_bounds = array<i64: 192, 32>}, {transform_indices = @transform_4, window_bounds = array<i64: 8, 3>}]} {
    %0 = tpu.iota {dimensions = array<i32: 1>} : vector<1x256xi32>
    %c32_i32 = arith.constant 32 : i32
    %c0_i32 = arith.constant 0 : i32
    %1 = arith.cmpi eq, %c32_i32, %c0_i32 : i32
    %c1_i32 = arith.constant 1 : i32
    %2 = arith.select %1, %c1_i32, %c32_i32 : i32
    %3 = vector.broadcast %2 : i32 to vector<1x256xi32>
    %4 = arith.remsi %0, %3 : vector<1x256xi32>
    %c0_i32_0 = arith.constant 0 : i32
    %5 = vector.broadcast %c0_i32_0 : i32 to vector<1x256xi32>
    %6 = arith.cmpi ne, %4, %5 : vector<1x256xi32>
    %c0_i32_1 = arith.constant 0 : i32
    %7 = vector.broadcast %c0_i32_1 : i32 to vector<1x256xi32>
    %8 = arith.cmpi slt, %4, %7 : vector<1x256xi32>
    %c0_i32_2 = arith.constant 0 : i32
    %9 = arith.cmpi slt, %2, %c0_i32_2 : i32
    %10 = vector.broadcast %9 : i1 to vector<1x256xi1>
    %11 = vector.broadcast %10 : vector<1x256xi1> to vector<1x256xi1>
    %12 = arith.xori %8, %11 : vector<1x256xi1>
    %13 = arith.andi %12, %6 : vector<1x256xi1>
    %14 = vector.broadcast %2 : i32 to vector<1x256xi32>
    %15 = arith.addi %4, %14 : vector<1x256xi32>
    %16 = arith.select %13, %15, %4 : vector<1x256xi1>, vector<1x256xi32>
    %c16_i32 = arith.constant 16 : i32
    %17 = vector.broadcast %c16_i32 : i32 to vector<1x256xi32>
    %18 = arith.cmpi slt, %16, %17 : vector<1x256xi32>
    %19 = tpu.iota {dimensions = array<i32: 1>} : vector<1x64xi32>
    %c32_i32_3 = arith.constant 32 : i32
    %c0_i32_4 = arith.constant 0 : i32
    %20 = arith.cmpi eq, %c32_i32_3, %c0_i32_4 : i32
    %c1_i32_5 = arith.constant 1 : i32
    %21 = arith.select %20, %c1_i32_5, %c32_i32_3 : i32
    %22 = vector.broadcast %21 : i32 to vector<1x64xi32>
    %23 = arith.remsi %19, %22 : vector<1x64xi32>
    %c0_i32_6 = arith.constant 0 : i32
    %24 = vector.broadcast %c0_i32_6 : i32 to vector<1x64xi32>
    %25 = arith.cmpi ne, %23, %24 : vector<1x64xi32>
    %c0_i32_7 = arith.constant 0 : i32
    %26 = vector.broadcast %c0_i32_7 : i32 to vector<1x64xi32>
    %27 = arith.cmpi slt, %23, %26 : vector<1x64xi32>
    %c0_i32_8 = arith.constant 0 : i32
    %28 = arith.cmpi slt, %21, %c0_i32_8 : i32
    %29 = vector.broadcast %28 : i1 to vector<1x64xi1>
    %30 = vector.broadcast %29 : vector<1x64xi1> to vector<1x64xi1>
    %31 = arith.xori %27, %30 : vector<1x64xi1>
    %32 = arith.andi %31, %25 : vector<1x64xi1>
    %33 = vector.broadcast %21 : i32 to vector<1x64xi32>
    %34 = arith.addi %23, %33 : vector<1x64xi32>
    %35 = arith.select %32, %34, %23 : vector<1x64xi1>, vector<1x64xi32>
    %c16_i32_9 = arith.constant 16 : i32
    %36 = vector.broadcast %c16_i32_9 : i32 to vector<1x64xi32>
    %37 = arith.cmpi slt, %35, %36 : vector<1x64xi32>
    %38 = tpu.iota {dimensions = array<i32: 2>} : vector<1x1x64xi32>
    %c32_i32_10 = arith.constant 32 : i32
    %39 = vector.broadcast %c32_i32_10 : i32 to vector<1x1x64xi32>
    %40 = arith.cmpi slt, %38, %39 : vector<1x1x64xi32>
    %c0 = arith.constant 0 : index
    %c0_11 = arith.constant 0 : index
    %41 = vector.load %arg3[%c0, %c0_11] : memref<232x256xf32, #tpu.memory_space<vmem>>, vector<232x256xf32>
    %42 = vector.extract_strided_slice %41 {offsets = [0, 0], sizes = [16, 256], strides = [1, 1]} : vector<232x256xf32> to vector<16x256xf32>
    %43 = vector.extract_strided_slice %41 {offsets = [16, 0], sizes = [64, 256], strides = [1, 1]} : vector<232x256xf32> to vector<64x256xf32>
    %44 = vector.extract_strided_slice %41 {offsets = [80, 0], sizes = [1, 256], strides = [1, 1]} : vector<232x256xf32> to vector<1x256xf32>
    %45 = vector.extract_strided_slice %41 {offsets = [88, 0], sizes = [64, 256], strides = [1, 1]} : vector<232x256xf32> to vector<64x256xf32>
    %46 = vector.extract_strided_slice %41 {offsets = [152, 0], sizes = [64, 256], strides = [1, 1]} : vector<232x256xf32> to vector<64x256xf32>
    %47 = vector.extract_strided_slice %41 {offsets = [216, 0], sizes = [1, 256], strides = [1, 1]} : vector<232x256xf32> to vector<1x256xf32>
    %48 = vector.extract_strided_slice %41 {offsets = [224, 0], sizes = [1, 64], strides = [1, 1]} : vector<232x256xf32> to vector<1x64xf32>
    %c0_12 = arith.constant 0 : index
    %c0_13 = arith.constant 0 : index
    %c0_14 = arith.constant 0 : index
    %49 = vector.load %arg1[%c0_12, %c0_13, %c0_14] : memref<8x8x16xf32, #tpu.memory_space<vmem>>, vector<8x8x16xf32>
    %50 = vector.shape_cast %49 : vector<8x8x16xf32> to vector<64x16xf32>
    %cst = arith.constant dense<0.000000e+00> : vector<64x256xf32>
    %51 = tpu.matmul %50, %42, %cst {dimension_numbers = #tpu.dot_dimension_numbers<[1], [0], [0], [1], [0, 0, 1, 1], [], []>} : vector<64x16xf32>, vector<16x256xf32>, vector<64x256xf32> -> vector<64x256xf32>
    %52 = vector.broadcast %44 : vector<1x256xf32> to vector<64x256xf32>
    %53 = arith.addf %51, %52 : vector<64x256xf32>
    %54 = vector.shape_cast %53 : vector<64x256xf32> to vector<8x8x256xf32>
    %55 = vector.extract_strided_slice %54 {offsets = [0, 0, 0], sizes = [1, 8, 256], strides = [1, 1, 1]} : vector<8x8x256xf32> to vector<1x8x256xf32>
    %56 = vector.shape_cast %55 : vector<1x8x256xf32> to vector<8x256xf32>
    %57 = vector.extract_strided_slice %54 {offsets = [7, 0, 0], sizes = [1, 8, 256], strides = [1, 1, 1]} : vector<8x8x256xf32> to vector<1x8x256xf32>
    %58 = vector.shape_cast %57 : vector<1x8x256xf32> to vector<8x256xf32>
    %59 = vector.shape_cast %18 : vector<1x256xi1> to vector<1x256xi1>
    %60 = vector.broadcast %59 : vector<1x256xi1> to vector<8x256xi1>
    %61 = arith.select %60, %56, %58 : vector<8x256xi1>, vector<8x256xf32>
    %62 = vector.extract_strided_slice %54 {offsets = [1, 0, 0], sizes = [1, 8, 256], strides = [1, 1, 1]} : vector<8x8x256xf32> to vector<1x8x256xf32>
    %63 = vector.shape_cast %62 : vector<1x8x256xf32> to vector<8x256xf32>
    %64 = vector.extract_strided_slice %54 {offsets = [6, 0, 0], sizes = [1, 8, 256], strides = [1, 1, 1]} : vector<8x8x256xf32> to vector<1x8x256xf32>
    %65 = vector.shape_cast %64 : vector<1x8x256xf32> to vector<8x256xf32>
    %66 = vector.shape_cast %18 : vector<1x256xi1> to vector<1x256xi1>
    %67 = vector.broadcast %66 : vector<1x256xi1> to vector<8x256xi1>
    %68 = arith.select %67, %63, %65 : vector<8x256xi1>, vector<8x256xf32>
    %69 = vector.extract_strided_slice %54 {offsets = [2, 0, 0], sizes = [1, 8, 256], strides = [1, 1, 1]} : vector<8x8x256xf32> to vector<1x8x256xf32>
    %70 = vector.shape_cast %69 : vector<1x8x256xf32> to vector<8x256xf32>
    %71 = vector.extract_strided_slice %54 {offsets = [5, 0, 0], sizes = [1, 8, 256], strides = [1, 1, 1]} : vector<8x8x256xf32> to vector<1x8x256xf32>
    %72 = vector.shape_cast %71 : vector<1x8x256xf32> to vector<8x256xf32>
    %73 = vector.shape_cast %18 : vector<1x256xi1> to vector<1x256xi1>
    %74 = vector.broadcast %73 : vector<1x256xi1> to vector<8x256xi1>
    %75 = arith.select %74, %70, %72 : vector<8x256xi1>, vector<8x256xf32>
    %76 = vector.extract_strided_slice %54 {offsets = [3, 0, 0], sizes = [1, 8, 256], strides = [1, 1, 1]} : vector<8x8x256xf32> to vector<1x8x256xf32>
    %77 = vector.shape_cast %76 : vector<1x8x256xf32> to vector<8x256xf32>
    %78 = vector.extract_strided_slice %54 {offsets = [4, 0, 0], sizes = [1, 8, 256], strides = [1, 1, 1]} : vector<8x8x256xf32> to vector<1x8x256xf32>
    %79 = vector.shape_cast %78 : vector<1x8x256xf32> to vector<8x256xf32>
    %80 = vector.shape_cast %18 : vector<1x256xi1> to vector<1x256xi1>
    %81 = vector.broadcast %80 : vector<1x256xi1> to vector<8x256xi1>
    %82 = arith.select %81, %77, %79 : vector<8x256xi1>, vector<8x256xf32>
    %83 = vector.extract_strided_slice %54 {offsets = [4, 0, 0], sizes = [1, 8, 256], strides = [1, 1, 1]} : vector<8x8x256xf32> to vector<1x8x256xf32>
    %84 = vector.shape_cast %83 : vector<1x8x256xf32> to vector<8x256xf32>
    %85 = vector.extract_strided_slice %54 {offsets = [3, 0, 0], sizes = [1, 8, 256], strides = [1, 1, 1]} : vector<8x8x256xf32> to vector<1x8x256xf32>
    %86 = vector.shape_cast %85 : vector<1x8x256xf32> to vector<8x256xf32>
    %87 = vector.shape_cast %18 : vector<1x256xi1> to vector<1x256xi1>
    %88 = vector.broadcast %87 : vector<1x256xi1> to vector<8x256xi1>
    %89 = arith.select %88, %84, %86 : vector<8x256xi1>, vector<8x256xf32>
    %90 = vector.extract_strided_slice %54 {offsets = [5, 0, 0], sizes = [1, 8, 256], strides = [1, 1, 1]} : vector<8x8x256xf32> to vector<1x8x256xf32>
    %91 = vector.shape_cast %90 : vector<1x8x256xf32> to vector<8x256xf32>
    %92 = vector.extract_strided_slice %54 {offsets = [2, 0, 0], sizes = [1, 8, 256], strides = [1, 1, 1]} : vector<8x8x256xf32> to vector<1x8x256xf32>
    %93 = vector.shape_cast %92 : vector<1x8x256xf32> to vector<8x256xf32>
    %94 = vector.shape_cast %18 : vector<1x256xi1> to vector<1x256xi1>
    %95 = vector.broadcast %94 : vector<1x256xi1> to vector<8x256xi1>
    %96 = arith.select %95, %91, %93 : vector<8x256xi1>, vector<8x256xf32>
    %97 = vector.extract_strided_slice %54 {offsets = [6, 0, 0], sizes = [1, 8, 256], strides = [1, 1, 1]} : vector<8x8x256xf32> to vector<1x8x256xf32>
    %98 = vector.shape_cast %97 : vector<1x8x256xf32> to vector<8x256xf32>
    %99 = vector.extract_strided_slice %54 {offsets = [1, 0, 0], sizes = [1, 8, 256], strides = [1, 1, 1]} : vector<8x8x256xf32> to vector<1x8x256xf32>
    %100 = vector.shape_cast %99 : vector<1x8x256xf32> to vector<8x256xf32>
    %101 = vector.shape_cast %18 : vector<1x256xi1> to vector<1x256xi1>
    %102 = vector.broadcast %101 : vector<1x256xi1> to vector<8x256xi1>
    %103 = arith.select %102, %98, %100 : vector<8x256xi1>, vector<8x256xf32>
    %104 = vector.extract_strided_slice %54 {offsets = [7, 0, 0], sizes = [1, 8, 256], strides = [1, 1, 1]} : vector<8x8x256xf32> to vector<1x8x256xf32>
    %105 = vector.shape_cast %104 : vector<1x8x256xf32> to vector<8x256xf32>
    %106 = vector.extract_strided_slice %54 {offsets = [0, 0, 0], sizes = [1, 8, 256], strides = [1, 1, 1]} : vector<8x8x256xf32> to vector<1x8x256xf32>
    %107 = vector.shape_cast %106 : vector<1x8x256xf32> to vector<8x256xf32>
    %108 = vector.shape_cast %18 : vector<1x256xi1> to vector<1x256xi1>
    %109 = vector.broadcast %108 : vector<1x256xi1> to vector<8x256xi1>
    %110 = arith.select %109, %105, %107 : vector<8x256xi1>, vector<8x256xf32>
    %cst_15 = arith.constant 0.000000e+00 : f32
    %111 = vector.broadcast %cst_15 : f32 to vector<8x64xf32>
    %cst_16 = arith.constant 0.000000e+00 : f32
    %112 = vector.broadcast %cst_16 : f32 to vector<8x64xf32>
    %cst_17 = arith.constant dense<0.000000e+00> : vector<8x256xf32>
    %113 = tpu.matmul %111, %43, %cst_17 {dimension_numbers = #tpu.dot_dimension_numbers<[1], [0], [0], [1], [0, 0, 1, 1], [], []>} : vector<8x64xf32>, vector<64x256xf32>, vector<8x256xf32> -> vector<8x256xf32>
    %114 = arith.addf %61, %113 : vector<8x256xf32>
    %115 = arith.negf %114 : vector<8x256xf32>
    %116 = math.exp %115 : vector<8x256xf32>
    %cst_18 = arith.constant 1.000000e+00 : f32
    %117 = vector.broadcast %cst_18 : f32 to vector<8x256xf32>
    %118 = arith.addf %117, %116 : vector<8x256xf32>
    %119 = arith.divf %117, %118 : vector<8x256xf32>
    %120 = math.tanh %114 : vector<8x256xf32>
    %121 = vector.extract_strided_slice %119 {offsets = [0, 64], sizes = [8, 64], strides = [1, 1]} : vector<8x256xf32> to vector<8x64xf32>
    %122 = arith.mulf %121, %112 : vector<8x64xf32>
    %123 = vector.extract_strided_slice %119 {offsets = [0, 0], sizes = [8, 64], strides = [1, 1]} : vector<8x256xf32> to vector<8x64xf32>
    %124 = vector.extract_strided_slice %120 {offsets = [0, 128], sizes = [8, 64], strides = [1, 1]} : vector<8x256xf32> to vector<8x64xf32>
    %125 = arith.mulf %123, %124 : vector<8x64xf32>
    %126 = arith.addf %122, %125 : vector<8x64xf32>
    %127 = vector.extract_strided_slice %119 {offsets = [0, 192], sizes = [8, 64], strides = [1, 1]} : vector<8x256xf32> to vector<8x64xf32>
    %128 = math.tanh %126 : vector<8x64xf32>
    %129 = arith.mulf %127, %128 : vector<8x64xf32>
    %cst_19 = arith.constant dense<0.000000e+00> : vector<8x256xf32>
    %130 = tpu.matmul %129, %43, %cst_19 {dimension_numbers = #tpu.dot_dimension_numbers<[1], [0], [0], [1], [0, 0, 1, 1], [], []>} : vector<8x64xf32>, vector<64x256xf32>, vector<8x256xf32> -> vector<8x256xf32>
    %131 = arith.addf %68, %130 : vector<8x256xf32>
    %132 = arith.negf %131 : vector<8x256xf32>
    %133 = math.exp %132 : vector<8x256xf32>
    %cst_20 = arith.constant 1.000000e+00 : f32
    %134 = vector.broadcast %cst_20 : f32 to vector<8x256xf32>
    %135 = arith.addf %134, %133 : vector<8x256xf32>
    %136 = arith.divf %134, %135 : vector<8x256xf32>
    %137 = math.tanh %131 : vector<8x256xf32>
    %138 = vector.extract_strided_slice %136 {offsets = [0, 64], sizes = [8, 64], strides = [1, 1]} : vector<8x256xf32> to vector<8x64xf32>
    %139 = arith.mulf %138, %126 : vector<8x64xf32>
    %140 = vector.extract_strided_slice %136 {offsets = [0, 0], sizes = [8, 64], strides = [1, 1]} : vector<8x256xf32> to vector<8x64xf32>
    %141 = vector.extract_strided_slice %137 {offsets = [0, 128], sizes = [8, 64], strides = [1, 1]} : vector<8x256xf32> to vector<8x64xf32>
    %142 = arith.mulf %140, %141 : vector<8x64xf32>
    %143 = arith.addf %139, %142 : vector<8x64xf32>
    %144 = vector.extract_strided_slice %136 {offsets = [0, 192], sizes = [8, 64], strides = [1, 1]} : vector<8x256xf32> to vector<8x64xf32>
    %145 = math.tanh %143 : vector<8x64xf32>
    %146 = arith.mulf %144, %145 : vector<8x64xf32>
    %cst_21 = arith.constant dense<0.000000e+00> : vector<8x256xf32>
    %147 = tpu.matmul %146, %43, %cst_21 {dimension_numbers = #tpu.dot_dimension_numbers<[1], [0], [0], [1], [0, 0, 1, 1], [], []>} : vector<8x64xf32>, vector<64x256xf32>, vector<8x256xf32> -> vector<8x256xf32>
    %148 = arith.addf %75, %147 : vector<8x256xf32>
    %149 = arith.negf %148 : vector<8x256xf32>
    %150 = math.exp %149 : vector<8x256xf32>
    %cst_22 = arith.constant 1.000000e+00 : f32
    %151 = vector.broadcast %cst_22 : f32 to vector<8x256xf32>
    %152 = arith.addf %151, %150 : vector<8x256xf32>
    %153 = arith.divf %151, %152 : vector<8x256xf32>
    %154 = math.tanh %148 : vector<8x256xf32>
    %155 = vector.extract_strided_slice %153 {offsets = [0, 64], sizes = [8, 64], strides = [1, 1]} : vector<8x256xf32> to vector<8x64xf32>
    %156 = arith.mulf %155, %143 : vector<8x64xf32>
    %157 = vector.extract_strided_slice %153 {offsets = [0, 0], sizes = [8, 64], strides = [1, 1]} : vector<8x256xf32> to vector<8x64xf32>
    %158 = vector.extract_strided_slice %154 {offsets = [0, 128], sizes = [8, 64], strides = [1, 1]} : vector<8x256xf32> to vector<8x64xf32>
    %159 = arith.mulf %157, %158 : vector<8x64xf32>
    %160 = arith.addf %156, %159 : vector<8x64xf32>
    %161 = vector.extract_strided_slice %153 {offsets = [0, 192], sizes = [8, 64], strides = [1, 1]} : vector<8x256xf32> to vector<8x64xf32>
    %162 = math.tanh %160 : vector<8x64xf32>
    %163 = arith.mulf %161, %162 : vector<8x64xf32>
    %cst_23 = arith.constant dense<0.000000e+00> : vector<8x256xf32>
    %164 = tpu.matmul %163, %43, %cst_23 {dimension_numbers = #tpu.dot_dimension_numbers<[1], [0], [0], [1], [0, 0, 1, 1], [], []>} : vector<8x64xf32>, vector<64x256xf32>, vector<8x256xf32> -> vector<8x256xf32>
    %165 = arith.addf %82, %164 : vector<8x256xf32>
    %166 = arith.negf %165 : vector<8x256xf32>
    %167 = math.exp %166 : vector<8x256xf32>
    %cst_24 = arith.constant 1.000000e+00 : f32
    %168 = vector.broadcast %cst_24 : f32 to vector<8x256xf32>
    %169 = arith.addf %168, %167 : vector<8x256xf32>
    %170 = arith.divf %168, %169 : vector<8x256xf32>
    %171 = math.tanh %165 : vector<8x256xf32>
    %172 = vector.extract_strided_slice %170 {offsets = [0, 64], sizes = [8, 64], strides = [1, 1]} : vector<8x256xf32> to vector<8x64xf32>
    %173 = arith.mulf %172, %160 : vector<8x64xf32>
    %174 = vector.extract_strided_slice %170 {offsets = [0, 0], sizes = [8, 64], strides = [1, 1]} : vector<8x256xf32> to vector<8x64xf32>
    %175 = vector.extract_strided_slice %171 {offsets = [0, 128], sizes = [8, 64], strides = [1, 1]} : vector<8x256xf32> to vector<8x64xf32>
    %176 = arith.mulf %174, %175 : vector<8x64xf32>
    %177 = arith.addf %173, %176 : vector<8x64xf32>
    %178 = vector.extract_strided_slice %170 {offsets = [0, 192], sizes = [8, 64], strides = [1, 1]} : vector<8x256xf32> to vector<8x64xf32>
    %179 = math.tanh %177 : vector<8x64xf32>
    %180 = arith.mulf %178, %179 : vector<8x64xf32>
    %cst_25 = arith.constant dense<0.000000e+00> : vector<8x256xf32>
    %181 = tpu.matmul %180, %43, %cst_25 {dimension_numbers = #tpu.dot_dimension_numbers<[1], [0], [0], [1], [0, 0, 1, 1], [], []>} : vector<8x64xf32>, vector<64x256xf32>, vector<8x256xf32> -> vector<8x256xf32>
    %182 = arith.addf %89, %181 : vector<8x256xf32>
    %183 = arith.negf %182 : vector<8x256xf32>
    %184 = math.exp %183 : vector<8x256xf32>
    %cst_26 = arith.constant 1.000000e+00 : f32
    %185 = vector.broadcast %cst_26 : f32 to vector<8x256xf32>
    %186 = arith.addf %185, %184 : vector<8x256xf32>
    %187 = arith.divf %185, %186 : vector<8x256xf32>
    %188 = math.tanh %182 : vector<8x256xf32>
    %189 = vector.extract_strided_slice %187 {offsets = [0, 64], sizes = [8, 64], strides = [1, 1]} : vector<8x256xf32> to vector<8x64xf32>
    %190 = arith.mulf %189, %177 : vector<8x64xf32>
    %191 = vector.extract_strided_slice %187 {offsets = [0, 0], sizes = [8, 64], strides = [1, 1]} : vector<8x256xf32> to vector<8x64xf32>
    %192 = vector.extract_strided_slice %188 {offsets = [0, 128], sizes = [8, 64], strides = [1, 1]} : vector<8x256xf32> to vector<8x64xf32>
    %193 = arith.mulf %191, %192 : vector<8x64xf32>
    %194 = arith.addf %190, %193 : vector<8x64xf32>
    %195 = vector.extract_strided_slice %187 {offsets = [0, 192], sizes = [8, 64], strides = [1, 1]} : vector<8x256xf32> to vector<8x64xf32>
    %196 = math.tanh %194 : vector<8x64xf32>
    %197 = arith.mulf %195, %196 : vector<8x64xf32>
    %cst_27 = arith.constant dense<0.000000e+00> : vector<8x256xf32>
    %198 = tpu.matmul %197, %43, %cst_27 {dimension_numbers = #tpu.dot_dimension_numbers<[1], [0], [0], [1], [0, 0, 1, 1], [], []>} : vector<8x64xf32>, vector<64x256xf32>, vector<8x256xf32> -> vector<8x256xf32>
    %199 = arith.addf %96, %198 : vector<8x256xf32>
    %200 = arith.negf %199 : vector<8x256xf32>
    %201 = math.exp %200 : vector<8x256xf32>
    %cst_28 = arith.constant 1.000000e+00 : f32
    %202 = vector.broadcast %cst_28 : f32 to vector<8x256xf32>
    %203 = arith.addf %202, %201 : vector<8x256xf32>
    %204 = arith.divf %202, %203 : vector<8x256xf32>
    %205 = math.tanh %199 : vector<8x256xf32>
    %206 = vector.extract_strided_slice %204 {offsets = [0, 64], sizes = [8, 64], strides = [1, 1]} : vector<8x256xf32> to vector<8x64xf32>
    %207 = arith.mulf %206, %194 : vector<8x64xf32>
    %208 = vector.extract_strided_slice %204 {offsets = [0, 0], sizes = [8, 64], strides = [1, 1]} : vector<8x256xf32> to vector<8x64xf32>
    %209 = vector.extract_strided_slice %205 {offsets = [0, 128], sizes = [8, 64], strides = [1, 1]} : vector<8x256xf32> to vector<8x64xf32>
    %210 = arith.mulf %208, %209 : vector<8x64xf32>
    %211 = arith.addf %207, %210 : vector<8x64xf32>
    %212 = vector.extract_strided_slice %204 {offsets = [0, 192], sizes = [8, 64], strides = [1, 1]} : vector<8x256xf32> to vector<8x64xf32>
    %213 = math.tanh %211 : vector<8x64xf32>
    %214 = arith.mulf %212, %213 : vector<8x64xf32>
    %cst_29 = arith.constant dense<0.000000e+00> : vector<8x256xf32>
    %215 = tpu.matmul %214, %43, %cst_29 {dimension_numbers = #tpu.dot_dimension_numbers<[1], [0], [0], [1], [0, 0, 1, 1], [], []>} : vector<8x64xf32>, vector<64x256xf32>, vector<8x256xf32> -> vector<8x256xf32>
    %216 = arith.addf %103, %215 : vector<8x256xf32>
    %217 = arith.negf %216 : vector<8x256xf32>
    %218 = math.exp %217 : vector<8x256xf32>
    %cst_30 = arith.constant 1.000000e+00 : f32
    %219 = vector.broadcast %cst_30 : f32 to vector<8x256xf32>
    %220 = arith.addf %219, %218 : vector<8x256xf32>
    %221 = arith.divf %219, %220 : vector<8x256xf32>
    %222 = math.tanh %216 : vector<8x256xf32>
    %223 = vector.extract_strided_slice %221 {offsets = [0, 64], sizes = [8, 64], strides = [1, 1]} : vector<8x256xf32> to vector<8x64xf32>
    %224 = arith.mulf %223, %211 : vector<8x64xf32>
    %225 = vector.extract_strided_slice %221 {offsets = [0, 0], sizes = [8, 64], strides = [1, 1]} : vector<8x256xf32> to vector<8x64xf32>
    %226 = vector.extract_strided_slice %222 {offsets = [0, 128], sizes = [8, 64], strides = [1, 1]} : vector<8x256xf32> to vector<8x64xf32>
    %227 = arith.mulf %225, %226 : vector<8x64xf32>
    %228 = arith.addf %224, %227 : vector<8x64xf32>
    %229 = vector.extract_strided_slice %221 {offsets = [0, 192], sizes = [8, 64], strides = [1, 1]} : vector<8x256xf32> to vector<8x64xf32>
    %230 = math.tanh %228 : vector<8x64xf32>
    %231 = arith.mulf %229, %230 : vector<8x64xf32>
    %cst_31 = arith.constant dense<0.000000e+00> : vector<8x256xf32>
    %232 = tpu.matmul %231, %43, %cst_31 {dimension_numbers = #tpu.dot_dimension_numbers<[1], [0], [0], [1], [0, 0, 1, 1], [], []>} : vector<8x64xf32>, vector<64x256xf32>, vector<8x256xf32> -> vector<8x256xf32>
    %233 = arith.addf %110, %232 : vector<8x256xf32>
    %234 = arith.negf %233 : vector<8x256xf32>
    %235 = math.exp %234 : vector<8x256xf32>
    %cst_32 = arith.constant 1.000000e+00 : f32
    %236 = vector.broadcast %cst_32 : f32 to vector<8x256xf32>
    %237 = arith.addf %236, %235 : vector<8x256xf32>
    %238 = arith.divf %236, %237 : vector<8x256xf32>
    %239 = math.tanh %233 : vector<8x256xf32>
    %240 = vector.extract_strided_slice %238 {offsets = [0, 64], sizes = [8, 64], strides = [1, 1]} : vector<8x256xf32> to vector<8x64xf32>
    %241 = arith.mulf %240, %228 : vector<8x64xf32>
    %242 = vector.extract_strided_slice %238 {offsets = [0, 0], sizes = [8, 64], strides = [1, 1]} : vector<8x256xf32> to vector<8x64xf32>
    %243 = vector.extract_strided_slice %239 {offsets = [0, 128], sizes = [8, 64], strides = [1, 1]} : vector<8x256xf32> to vector<8x64xf32>
    %244 = arith.mulf %242, %243 : vector<8x64xf32>
    %245 = arith.addf %241, %244 : vector<8x64xf32>
    %246 = vector.extract_strided_slice %238 {offsets = [0, 192], sizes = [8, 64], strides = [1, 1]} : vector<8x256xf32> to vector<8x64xf32>
    %247 = math.tanh %245 : vector<8x64xf32>
    %248 = arith.mulf %246, %247 : vector<8x64xf32>
    %249 = vector.shape_cast %37 : vector<1x64xi1> to vector<1x64xi1>
    %250 = vector.broadcast %249 : vector<1x64xi1> to vector<8x64xi1>
    %251 = arith.select %250, %129, %248 : vector<8x64xi1>, vector<8x64xf32>
    %252 = vector.shape_cast %37 : vector<1x64xi1> to vector<1x64xi1>
    %253 = vector.broadcast %252 : vector<1x64xi1> to vector<8x64xi1>
    %254 = arith.select %253, %146, %231 : vector<8x64xi1>, vector<8x64xf32>
    %255 = vector.shape_cast %37 : vector<1x64xi1> to vector<1x64xi1>
    %256 = vector.broadcast %255 : vector<1x64xi1> to vector<8x64xi1>
    %257 = arith.select %256, %163, %214 : vector<8x64xi1>, vector<8x64xf32>
    %258 = vector.shape_cast %37 : vector<1x64xi1> to vector<1x64xi1>
    %259 = vector.broadcast %258 : vector<1x64xi1> to vector<8x64xi1>
    %260 = arith.select %259, %180, %197 : vector<8x64xi1>, vector<8x64xf32>
    %261 = vector.shape_cast %37 : vector<1x64xi1> to vector<1x64xi1>
    %262 = vector.broadcast %261 : vector<1x64xi1> to vector<8x64xi1>
    %263 = arith.select %262, %197, %180 : vector<8x64xi1>, vector<8x64xf32>
    %264 = vector.shape_cast %37 : vector<1x64xi1> to vector<1x64xi1>
    %265 = vector.broadcast %264 : vector<1x64xi1> to vector<8x64xi1>
    %266 = arith.select %265, %214, %163 : vector<8x64xi1>, vector<8x64xf32>
    %267 = vector.shape_cast %37 : vector<1x64xi1> to vector<1x64xi1>
    %268 = vector.broadcast %267 : vector<1x64xi1> to vector<8x64xi1>
    %269 = arith.select %268, %231, %146 : vector<8x64xi1>, vector<8x64xf32>
    %270 = vector.shape_cast %37 : vector<1x64xi1> to vector<1x64xi1>
    %271 = vector.broadcast %270 : vector<1x64xi1> to vector<8x64xi1>
    %272 = arith.select %271, %248, %129 : vector<8x64xi1>, vector<8x64xf32>
    %273 = vector.shape_cast %251 : vector<8x64xf32> to vector<1x8x64xf32>
    %274 = vector.shape_cast %254 : vector<8x64xf32> to vector<1x8x64xf32>
    %275 = vector.shape_cast %257 : vector<8x64xf32> to vector<1x8x64xf32>
    %276 = vector.shape_cast %260 : vector<8x64xf32> to vector<1x8x64xf32>
    %277 = vector.shape_cast %263 : vector<8x64xf32> to vector<1x8x64xf32>
    %278 = vector.shape_cast %266 : vector<8x64xf32> to vector<1x8x64xf32>
    %279 = vector.shape_cast %269 : vector<8x64xf32> to vector<1x8x64xf32>
    %280 = vector.shape_cast %272 : vector<8x64xf32> to vector<1x8x64xf32>
    %281 = tpu.concatenate %273, %274, %275, %276, %277, %278, %279, %280 in 0 : vector<1x8x64xf32>, vector<1x8x64xf32>, vector<1x8x64xf32>, vector<1x8x64xf32>, vector<1x8x64xf32>, vector<1x8x64xf32>, vector<1x8x64xf32>, vector<1x8x64xf32> -> vector<8x8x64xf32>
    %282 = vector.shape_cast %281 : vector<8x8x64xf32> to vector<64x64xf32>
    %cst_33 = arith.constant dense<0.000000e+00> : vector<64x256xf32>
    %283 = tpu.matmul %282, %45, %cst_33 {dimension_numbers = #tpu.dot_dimension_numbers<[1], [0], [0], [1], [0, 0, 1, 1], [], []>} : vector<64x64xf32>, vector<64x256xf32>, vector<64x256xf32> -> vector<64x256xf32>
    %284 = vector.broadcast %47 : vector<1x256xf32> to vector<64x256xf32>
    %285 = arith.addf %283, %284 : vector<64x256xf32>
    %286 = vector.shape_cast %285 : vector<64x256xf32> to vector<8x8x256xf32>
    %287 = vector.extract_strided_slice %286 {offsets = [0, 0, 0], sizes = [1, 8, 256], strides = [1, 1, 1]} : vector<8x8x256xf32> to vector<1x8x256xf32>
    %288 = vector.shape_cast %287 : vector<1x8x256xf32> to vector<8x256xf32>
    %289 = vector.extract_strided_slice %286 {offsets = [7, 0, 0], sizes = [1, 8, 256], strides = [1, 1, 1]} : vector<8x8x256xf32> to vector<1x8x256xf32>
    %290 = vector.shape_cast %289 : vector<1x8x256xf32> to vector<8x256xf32>
    %291 = vector.shape_cast %18 : vector<1x256xi1> to vector<1x256xi1>
    %292 = vector.broadcast %291 : vector<1x256xi1> to vector<8x256xi1>
    %293 = arith.select %292, %288, %290 : vector<8x256xi1>, vector<8x256xf32>
    %294 = vector.extract_strided_slice %286 {offsets = [1, 0, 0], sizes = [1, 8, 256], strides = [1, 1, 1]} : vector<8x8x256xf32> to vector<1x8x256xf32>
    %295 = vector.shape_cast %294 : vector<1x8x256xf32> to vector<8x256xf32>
    %296 = vector.extract_strided_slice %286 {offsets = [6, 0, 0], sizes = [1, 8, 256], strides = [1, 1, 1]} : vector<8x8x256xf32> to vector<1x8x256xf32>
    %297 = vector.shape_cast %296 : vector<1x8x256xf32> to vector<8x256xf32>
    %298 = vector.shape_cast %18 : vector<1x256xi1> to vector<1x256xi1>
    %299 = vector.broadcast %298 : vector<1x256xi1> to vector<8x256xi1>
    %300 = arith.select %299, %295, %297 : vector<8x256xi1>, vector<8x256xf32>
    %301 = vector.extract_strided_slice %286 {offsets = [2, 0, 0], sizes = [1, 8, 256], strides = [1, 1, 1]} : vector<8x8x256xf32> to vector<1x8x256xf32>
    %302 = vector.shape_cast %301 : vector<1x8x256xf32> to vector<8x256xf32>
    %303 = vector.extract_strided_slice %286 {offsets = [5, 0, 0], sizes = [1, 8, 256], strides = [1, 1, 1]} : vector<8x8x256xf32> to vector<1x8x256xf32>
    %304 = vector.shape_cast %303 : vector<1x8x256xf32> to vector<8x256xf32>
    %305 = vector.shape_cast %18 : vector<1x256xi1> to vector<1x256xi1>
    %306 = vector.broadcast %305 : vector<1x256xi1> to vector<8x256xi1>
    %307 = arith.select %306, %302, %304 : vector<8x256xi1>, vector<8x256xf32>
    %308 = vector.extract_strided_slice %286 {offsets = [3, 0, 0], sizes = [1, 8, 256], strides = [1, 1, 1]} : vector<8x8x256xf32> to vector<1x8x256xf32>
    %309 = vector.shape_cast %308 : vector<1x8x256xf32> to vector<8x256xf32>
    %310 = vector.extract_strided_slice %286 {offsets = [4, 0, 0], sizes = [1, 8, 256], strides = [1, 1, 1]} : vector<8x8x256xf32> to vector<1x8x256xf32>
    %311 = vector.shape_cast %310 : vector<1x8x256xf32> to vector<8x256xf32>
    %312 = vector.shape_cast %18 : vector<1x256xi1> to vector<1x256xi1>
    %313 = vector.broadcast %312 : vector<1x256xi1> to vector<8x256xi1>
    %314 = arith.select %313, %309, %311 : vector<8x256xi1>, vector<8x256xf32>
    %315 = vector.extract_strided_slice %286 {offsets = [4, 0, 0], sizes = [1, 8, 256], strides = [1, 1, 1]} : vector<8x8x256xf32> to vector<1x8x256xf32>
    %316 = vector.shape_cast %315 : vector<1x8x256xf32> to vector<8x256xf32>
    %317 = vector.extract_strided_slice %286 {offsets = [3, 0, 0], sizes = [1, 8, 256], strides = [1, 1, 1]} : vector<8x8x256xf32> to vector<1x8x256xf32>
    %318 = vector.shape_cast %317 : vector<1x8x256xf32> to vector<8x256xf32>
    %319 = vector.shape_cast %18 : vector<1x256xi1> to vector<1x256xi1>
    %320 = vector.broadcast %319 : vector<1x256xi1> to vector<8x256xi1>
    %321 = arith.select %320, %316, %318 : vector<8x256xi1>, vector<8x256xf32>
    %322 = vector.extract_strided_slice %286 {offsets = [5, 0, 0], sizes = [1, 8, 256], strides = [1, 1, 1]} : vector<8x8x256xf32> to vector<1x8x256xf32>
    %323 = vector.shape_cast %322 : vector<1x8x256xf32> to vector<8x256xf32>
    %324 = vector.extract_strided_slice %286 {offsets = [2, 0, 0], sizes = [1, 8, 256], strides = [1, 1, 1]} : vector<8x8x256xf32> to vector<1x8x256xf32>
    %325 = vector.shape_cast %324 : vector<1x8x256xf32> to vector<8x256xf32>
    %326 = vector.shape_cast %18 : vector<1x256xi1> to vector<1x256xi1>
    %327 = vector.broadcast %326 : vector<1x256xi1> to vector<8x256xi1>
    %328 = arith.select %327, %323, %325 : vector<8x256xi1>, vector<8x256xf32>
    %329 = vector.extract_strided_slice %286 {offsets = [6, 0, 0], sizes = [1, 8, 256], strides = [1, 1, 1]} : vector<8x8x256xf32> to vector<1x8x256xf32>
    %330 = vector.shape_cast %329 : vector<1x8x256xf32> to vector<8x256xf32>
    %331 = vector.extract_strided_slice %286 {offsets = [1, 0, 0], sizes = [1, 8, 256], strides = [1, 1, 1]} : vector<8x8x256xf32> to vector<1x8x256xf32>
    %332 = vector.shape_cast %331 : vector<1x8x256xf32> to vector<8x256xf32>
    %333 = vector.shape_cast %18 : vector<1x256xi1> to vector<1x256xi1>
    %334 = vector.broadcast %333 : vector<1x256xi1> to vector<8x256xi1>
    %335 = arith.select %334, %330, %332 : vector<8x256xi1>, vector<8x256xf32>
    %336 = vector.extract_strided_slice %286 {offsets = [7, 0, 0], sizes = [1, 8, 256], strides = [1, 1, 1]} : vector<8x8x256xf32> to vector<1x8x256xf32>
    %337 = vector.shape_cast %336 : vector<1x8x256xf32> to vector<8x256xf32>
    %338 = vector.extract_strided_slice %286 {offsets = [0, 0, 0], sizes = [1, 8, 256], strides = [1, 1, 1]} : vector<8x8x256xf32> to vector<1x8x256xf32>
    %339 = vector.shape_cast %338 : vector<1x8x256xf32> to vector<8x256xf32>
    %340 = vector.shape_cast %18 : vector<1x256xi1> to vector<1x256xi1>
    %341 = vector.broadcast %340 : vector<1x256xi1> to vector<8x256xi1>
    %342 = arith.select %341, %337, %339 : vector<8x256xi1>, vector<8x256xf32>
    %cst_34 = arith.constant 0.000000e+00 : f32
    %343 = vector.broadcast %cst_34 : f32 to vector<8x64xf32>
    %cst_35 = arith.constant 0.000000e+00 : f32
    %344 = vector.broadcast %cst_35 : f32 to vector<8x64xf32>
    %cst_36 = arith.constant dense<0.000000e+00> : vector<8x256xf32>
    %345 = tpu.matmul %343, %46, %cst_36 {dimension_numbers = #tpu.dot_dimension_numbers<[1], [0], [0], [1], [0, 0, 1, 1], [], []>} : vector<8x64xf32>, vector<64x256xf32>, vector<8x256xf32> -> vector<8x256xf32>
    %346 = arith.addf %293, %345 : vector<8x256xf32>
    %347 = arith.negf %346 : vector<8x256xf32>
    %348 = math.exp %347 : vector<8x256xf32>
    %cst_37 = arith.constant 1.000000e+00 : f32
    %349 = vector.broadcast %cst_37 : f32 to vector<8x256xf32>
    %350 = arith.addf %349, %348 : vector<8x256xf32>
    %351 = arith.divf %349, %350 : vector<8x256xf32>
    %352 = math.tanh %346 : vector<8x256xf32>
    %353 = vector.extract_strided_slice %351 {offsets = [0, 64], sizes = [8, 64], strides = [1, 1]} : vector<8x256xf32> to vector<8x64xf32>
    %354 = arith.mulf %353, %344 : vector<8x64xf32>
    %355 = vector.extract_strided_slice %351 {offsets = [0, 0], sizes = [8, 64], strides = [1, 1]} : vector<8x256xf32> to vector<8x64xf32>
    %356 = vector.extract_strided_slice %352 {offsets = [0, 128], sizes = [8, 64], strides = [1, 1]} : vector<8x256xf32> to vector<8x64xf32>
    %357 = arith.mulf %355, %356 : vector<8x64xf32>
    %358 = arith.addf %354, %357 : vector<8x64xf32>
    %359 = vector.extract_strided_slice %351 {offsets = [0, 192], sizes = [8, 64], strides = [1, 1]} : vector<8x256xf32> to vector<8x64xf32>
    %360 = math.tanh %358 : vector<8x64xf32>
    %361 = arith.mulf %359, %360 : vector<8x64xf32>
    %cst_38 = arith.constant dense<0.000000e+00> : vector<8x256xf32>
    %362 = tpu.matmul %361, %46, %cst_38 {dimension_numbers = #tpu.dot_dimension_numbers<[1], [0], [0], [1], [0, 0, 1, 1], [], []>} : vector<8x64xf32>, vector<64x256xf32>, vector<8x256xf32> -> vector<8x256xf32>
    %363 = arith.addf %300, %362 : vector<8x256xf32>
    %364 = arith.negf %363 : vector<8x256xf32>
    %365 = math.exp %364 : vector<8x256xf32>
    %cst_39 = arith.constant 1.000000e+00 : f32
    %366 = vector.broadcast %cst_39 : f32 to vector<8x256xf32>
    %367 = arith.addf %366, %365 : vector<8x256xf32>
    %368 = arith.divf %366, %367 : vector<8x256xf32>
    %369 = math.tanh %363 : vector<8x256xf32>
    %370 = vector.extract_strided_slice %368 {offsets = [0, 64], sizes = [8, 64], strides = [1, 1]} : vector<8x256xf32> to vector<8x64xf32>
    %371 = arith.mulf %370, %358 : vector<8x64xf32>
    %372 = vector.extract_strided_slice %368 {offsets = [0, 0], sizes = [8, 64], strides = [1, 1]} : vector<8x256xf32> to vector<8x64xf32>
    %373 = vector.extract_strided_slice %369 {offsets = [0, 128], sizes = [8, 64], strides = [1, 1]} : vector<8x256xf32> to vector<8x64xf32>
    %374 = arith.mulf %372, %373 : vector<8x64xf32>
    %375 = arith.addf %371, %374 : vector<8x64xf32>
    %376 = vector.extract_strided_slice %368 {offsets = [0, 192], sizes = [8, 64], strides = [1, 1]} : vector<8x256xf32> to vector<8x64xf32>
    %377 = math.tanh %375 : vector<8x64xf32>
    %378 = arith.mulf %376, %377 : vector<8x64xf32>
    %cst_40 = arith.constant dense<0.000000e+00> : vector<8x256xf32>
    %379 = tpu.matmul %378, %46, %cst_40 {dimension_numbers = #tpu.dot_dimension_numbers<[1], [0], [0], [1], [0, 0, 1, 1], [], []>} : vector<8x64xf32>, vector<64x256xf32>, vector<8x256xf32> -> vector<8x256xf32>
    %380 = arith.addf %307, %379 : vector<8x256xf32>
    %381 = arith.negf %380 : vector<8x256xf32>
    %382 = math.exp %381 : vector<8x256xf32>
    %cst_41 = arith.constant 1.000000e+00 : f32
    %383 = vector.broadcast %cst_41 : f32 to vector<8x256xf32>
    %384 = arith.addf %383, %382 : vector<8x256xf32>
    %385 = arith.divf %383, %384 : vector<8x256xf32>
    %386 = math.tanh %380 : vector<8x256xf32>
    %387 = vector.extract_strided_slice %385 {offsets = [0, 64], sizes = [8, 64], strides = [1, 1]} : vector<8x256xf32> to vector<8x64xf32>
    %388 = arith.mulf %387, %375 : vector<8x64xf32>
    %389 = vector.extract_strided_slice %385 {offsets = [0, 0], sizes = [8, 64], strides = [1, 1]} : vector<8x256xf32> to vector<8x64xf32>
    %390 = vector.extract_strided_slice %386 {offsets = [0, 128], sizes = [8, 64], strides = [1, 1]} : vector<8x256xf32> to vector<8x64xf32>
    %391 = arith.mulf %389, %390 : vector<8x64xf32>
    %392 = arith.addf %388, %391 : vector<8x64xf32>
    %393 = vector.extract_strided_slice %385 {offsets = [0, 192], sizes = [8, 64], strides = [1, 1]} : vector<8x256xf32> to vector<8x64xf32>
    %394 = math.tanh %392 : vector<8x64xf32>
    %395 = arith.mulf %393, %394 : vector<8x64xf32>
    %cst_42 = arith.constant dense<0.000000e+00> : vector<8x256xf32>
    %396 = tpu.matmul %395, %46, %cst_42 {dimension_numbers = #tpu.dot_dimension_numbers<[1], [0], [0], [1], [0, 0, 1, 1], [], []>} : vector<8x64xf32>, vector<64x256xf32>, vector<8x256xf32> -> vector<8x256xf32>
    %397 = arith.addf %314, %396 : vector<8x256xf32>
    %398 = arith.negf %397 : vector<8x256xf32>
    %399 = math.exp %398 : vector<8x256xf32>
    %cst_43 = arith.constant 1.000000e+00 : f32
    %400 = vector.broadcast %cst_43 : f32 to vector<8x256xf32>
    %401 = arith.addf %400, %399 : vector<8x256xf32>
    %402 = arith.divf %400, %401 : vector<8x256xf32>
    %403 = math.tanh %397 : vector<8x256xf32>
    %404 = vector.extract_strided_slice %402 {offsets = [0, 64], sizes = [8, 64], strides = [1, 1]} : vector<8x256xf32> to vector<8x64xf32>
    %405 = arith.mulf %404, %392 : vector<8x64xf32>
    %406 = vector.extract_strided_slice %402 {offsets = [0, 0], sizes = [8, 64], strides = [1, 1]} : vector<8x256xf32> to vector<8x64xf32>
    %407 = vector.extract_strided_slice %403 {offsets = [0, 128], sizes = [8, 64], strides = [1, 1]} : vector<8x256xf32> to vector<8x64xf32>
    %408 = arith.mulf %406, %407 : vector<8x64xf32>
    %409 = arith.addf %405, %408 : vector<8x64xf32>
    %410 = vector.extract_strided_slice %402 {offsets = [0, 192], sizes = [8, 64], strides = [1, 1]} : vector<8x256xf32> to vector<8x64xf32>
    %411 = math.tanh %409 : vector<8x64xf32>
    %412 = arith.mulf %410, %411 : vector<8x64xf32>
    %cst_44 = arith.constant dense<0.000000e+00> : vector<8x256xf32>
    %413 = tpu.matmul %412, %46, %cst_44 {dimension_numbers = #tpu.dot_dimension_numbers<[1], [0], [0], [1], [0, 0, 1, 1], [], []>} : vector<8x64xf32>, vector<64x256xf32>, vector<8x256xf32> -> vector<8x256xf32>
    %414 = arith.addf %321, %413 : vector<8x256xf32>
    %415 = arith.negf %414 : vector<8x256xf32>
    %416 = math.exp %415 : vector<8x256xf32>
    %cst_45 = arith.constant 1.000000e+00 : f32
    %417 = vector.broadcast %cst_45 : f32 to vector<8x256xf32>
    %418 = arith.addf %417, %416 : vector<8x256xf32>
    %419 = arith.divf %417, %418 : vector<8x256xf32>
    %420 = math.tanh %414 : vector<8x256xf32>
    %421 = vector.extract_strided_slice %419 {offsets = [0, 64], sizes = [8, 64], strides = [1, 1]} : vector<8x256xf32> to vector<8x64xf32>
    %422 = arith.mulf %421, %409 : vector<8x64xf32>
    %423 = vector.extract_strided_slice %419 {offsets = [0, 0], sizes = [8, 64], strides = [1, 1]} : vector<8x256xf32> to vector<8x64xf32>
    %424 = vector.extract_strided_slice %420 {offsets = [0, 128], sizes = [8, 64], strides = [1, 1]} : vector<8x256xf32> to vector<8x64xf32>
    %425 = arith.mulf %423, %424 : vector<8x64xf32>
    %426 = arith.addf %422, %425 : vector<8x64xf32>
    %427 = vector.extract_strided_slice %419 {offsets = [0, 192], sizes = [8, 64], strides = [1, 1]} : vector<8x256xf32> to vector<8x64xf32>
    %428 = math.tanh %426 : vector<8x64xf32>
    %429 = arith.mulf %427, %428 : vector<8x64xf32>
    %cst_46 = arith.constant dense<0.000000e+00> : vector<8x256xf32>
    %430 = tpu.matmul %429, %46, %cst_46 {dimension_numbers = #tpu.dot_dimension_numbers<[1], [0], [0], [1], [0, 0, 1, 1], [], []>} : vector<8x64xf32>, vector<64x256xf32>, vector<8x256xf32> -> vector<8x256xf32>
    %431 = arith.addf %328, %430 : vector<8x256xf32>
    %432 = arith.negf %431 : vector<8x256xf32>
    %433 = math.exp %432 : vector<8x256xf32>
    %cst_47 = arith.constant 1.000000e+00 : f32
    %434 = vector.broadcast %cst_47 : f32 to vector<8x256xf32>
    %435 = arith.addf %434, %433 : vector<8x256xf32>
    %436 = arith.divf %434, %435 : vector<8x256xf32>
    %437 = math.tanh %431 : vector<8x256xf32>
    %438 = vector.extract_strided_slice %436 {offsets = [0, 64], sizes = [8, 64], strides = [1, 1]} : vector<8x256xf32> to vector<8x64xf32>
    %439 = arith.mulf %438, %426 : vector<8x64xf32>
    %440 = vector.extract_strided_slice %436 {offsets = [0, 0], sizes = [8, 64], strides = [1, 1]} : vector<8x256xf32> to vector<8x64xf32>
    %441 = vector.extract_strided_slice %437 {offsets = [0, 128], sizes = [8, 64], strides = [1, 1]} : vector<8x256xf32> to vector<8x64xf32>
    %442 = arith.mulf %440, %441 : vector<8x64xf32>
    %443 = arith.addf %439, %442 : vector<8x64xf32>
    %444 = vector.extract_strided_slice %436 {offsets = [0, 192], sizes = [8, 64], strides = [1, 1]} : vector<8x256xf32> to vector<8x64xf32>
    %445 = math.tanh %443 : vector<8x64xf32>
    %446 = arith.mulf %444, %445 : vector<8x64xf32>
    %cst_48 = arith.constant dense<0.000000e+00> : vector<8x256xf32>
    %447 = tpu.matmul %446, %46, %cst_48 {dimension_numbers = #tpu.dot_dimension_numbers<[1], [0], [0], [1], [0, 0, 1, 1], [], []>} : vector<8x64xf32>, vector<64x256xf32>, vector<8x256xf32> -> vector<8x256xf32>
    %448 = arith.addf %335, %447 : vector<8x256xf32>
    %449 = arith.negf %448 : vector<8x256xf32>
    %450 = math.exp %449 : vector<8x256xf32>
    %cst_49 = arith.constant 1.000000e+00 : f32
    %451 = vector.broadcast %cst_49 : f32 to vector<8x256xf32>
    %452 = arith.addf %451, %450 : vector<8x256xf32>
    %453 = arith.divf %451, %452 : vector<8x256xf32>
    %454 = math.tanh %448 : vector<8x256xf32>
    %455 = vector.extract_strided_slice %453 {offsets = [0, 64], sizes = [8, 64], strides = [1, 1]} : vector<8x256xf32> to vector<8x64xf32>
    %456 = arith.mulf %455, %443 : vector<8x64xf32>
    %457 = vector.extract_strided_slice %453 {offsets = [0, 0], sizes = [8, 64], strides = [1, 1]} : vector<8x256xf32> to vector<8x64xf32>
    %458 = vector.extract_strided_slice %454 {offsets = [0, 128], sizes = [8, 64], strides = [1, 1]} : vector<8x256xf32> to vector<8x64xf32>
    %459 = arith.mulf %457, %458 : vector<8x64xf32>
    %460 = arith.addf %456, %459 : vector<8x64xf32>
    %461 = vector.extract_strided_slice %453 {offsets = [0, 192], sizes = [8, 64], strides = [1, 1]} : vector<8x256xf32> to vector<8x64xf32>
    %462 = math.tanh %460 : vector<8x64xf32>
    %463 = arith.mulf %461, %462 : vector<8x64xf32>
    %cst_50 = arith.constant dense<0.000000e+00> : vector<8x256xf32>
    %464 = tpu.matmul %463, %46, %cst_50 {dimension_numbers = #tpu.dot_dimension_numbers<[1], [0], [0], [1], [0, 0, 1, 1], [], []>} : vector<8x64xf32>, vector<64x256xf32>, vector<8x256xf32> -> vector<8x256xf32>
    %465 = arith.addf %342, %464 : vector<8x256xf32>
    %466 = arith.negf %465 : vector<8x256xf32>
    %467 = math.exp %466 : vector<8x256xf32>
    %cst_51 = arith.constant 1.000000e+00 : f32
    %468 = vector.broadcast %cst_51 : f32 to vector<8x256xf32>
    %469 = arith.addf %468, %467 : vector<8x256xf32>
    %470 = arith.divf %468, %469 : vector<8x256xf32>
    %471 = math.tanh %465 : vector<8x256xf32>
    %472 = vector.extract_strided_slice %470 {offsets = [0, 64], sizes = [8, 64], strides = [1, 1]} : vector<8x256xf32> to vector<8x64xf32>
    %473 = arith.mulf %472, %460 : vector<8x64xf32>
    %474 = vector.extract_strided_slice %470 {offsets = [0, 0], sizes = [8, 64], strides = [1, 1]} : vector<8x256xf32> to vector<8x64xf32>
    %475 = vector.extract_strided_slice %471 {offsets = [0, 128], sizes = [8, 64], strides = [1, 1]} : vector<8x256xf32> to vector<8x64xf32>
    %476 = arith.mulf %474, %475 : vector<8x64xf32>
    %477 = arith.addf %473, %476 : vector<8x64xf32>
    %478 = vector.extract_strided_slice %470 {offsets = [0, 192], sizes = [8, 64], strides = [1, 1]} : vector<8x256xf32> to vector<8x64xf32>
    %479 = math.tanh %477 : vector<8x64xf32>
    %480 = arith.mulf %478, %479 : vector<8x64xf32>
    %481 = vector.shape_cast %37 : vector<1x64xi1> to vector<1x64xi1>
    %482 = vector.broadcast %481 : vector<1x64xi1> to vector<8x64xi1>
    %483 = arith.select %482, %361, %480 : vector<8x64xi1>, vector<8x64xf32>
    %484 = vector.shape_cast %37 : vector<1x64xi1> to vector<1x64xi1>
    %485 = vector.broadcast %484 : vector<1x64xi1> to vector<8x64xi1>
    %486 = arith.select %485, %378, %463 : vector<8x64xi1>, vector<8x64xf32>
    %487 = vector.shape_cast %37 : vector<1x64xi1> to vector<1x64xi1>
    %488 = vector.broadcast %487 : vector<1x64xi1> to vector<8x64xi1>
    %489 = arith.select %488, %395, %446 : vector<8x64xi1>, vector<8x64xf32>
    %490 = vector.shape_cast %37 : vector<1x64xi1> to vector<1x64xi1>
    %491 = vector.broadcast %490 : vector<1x64xi1> to vector<8x64xi1>
    %492 = arith.select %491, %412, %429 : vector<8x64xi1>, vector<8x64xf32>
    %493 = vector.shape_cast %37 : vector<1x64xi1> to vector<1x64xi1>
    %494 = vector.broadcast %493 : vector<1x64xi1> to vector<8x64xi1>
    %495 = arith.select %494, %429, %412 : vector<8x64xi1>, vector<8x64xf32>
    %496 = vector.shape_cast %37 : vector<1x64xi1> to vector<1x64xi1>
    %497 = vector.broadcast %496 : vector<1x64xi1> to vector<8x64xi1>
    %498 = arith.select %497, %446, %395 : vector<8x64xi1>, vector<8x64xf32>
    %499 = vector.shape_cast %37 : vector<1x64xi1> to vector<1x64xi1>
    %500 = vector.broadcast %499 : vector<1x64xi1> to vector<8x64xi1>
    %501 = arith.select %500, %463, %378 : vector<8x64xi1>, vector<8x64xf32>
    %502 = vector.shape_cast %37 : vector<1x64xi1> to vector<1x64xi1>
    %503 = vector.broadcast %502 : vector<1x64xi1> to vector<8x64xi1>
    %504 = arith.select %503, %480, %361 : vector<8x64xi1>, vector<8x64xf32>
    %505 = vector.shape_cast %483 : vector<8x64xf32> to vector<1x8x64xf32>
    %506 = vector.shape_cast %486 : vector<8x64xf32> to vector<1x8x64xf32>
    %507 = vector.shape_cast %489 : vector<8x64xf32> to vector<1x8x64xf32>
    %508 = vector.shape_cast %492 : vector<8x64xf32> to vector<1x8x64xf32>
    %509 = vector.shape_cast %495 : vector<8x64xf32> to vector<1x8x64xf32>
    %510 = vector.shape_cast %498 : vector<8x64xf32> to vector<1x8x64xf32>
    %511 = vector.shape_cast %501 : vector<8x64xf32> to vector<1x8x64xf32>
    %512 = vector.shape_cast %504 : vector<8x64xf32> to vector<1x8x64xf32>
    %513 = tpu.concatenate %505, %506, %507, %508, %509, %510, %511, %512 in 0 : vector<1x8x64xf32>, vector<1x8x64xf32>, vector<1x8x64xf32>, vector<1x8x64xf32>, vector<1x8x64xf32>, vector<1x8x64xf32>, vector<1x8x64xf32>, vector<1x8x64xf32> -> vector<8x8x64xf32>
    %514 = vector.shape_cast %48 : vector<1x64xf32> to vector<1x1x64xf32>
    %515 = vector.broadcast %514 : vector<1x1x64xf32> to vector<8x8x64xf32>
    %516 = arith.mulf %513, %515 : vector<8x8x64xf32>
    %517 = vector.extract_strided_slice %516 {offsets = [0, 0, 0], sizes = [8, 8, 32], strides = [1, 1, 1]} : vector<8x8x64xf32> to vector<8x8x32xf32>
    %cst_52 = arith.constant dense<0.000000e+00> : vector<8x8xf32>
    %518 = vector.multi_reduction <add>, %517, %cst_52 [2] : vector<8x8x32xf32> to vector<8x8xf32>
    %519 = vector.shape_cast %518 : vector<8x8xf32> to vector<8x8x1xf32>
    %520 = vector.extract_strided_slice %516 {offsets = [0, 0, 32], sizes = [8, 8, 32], strides = [1, 1, 1]} : vector<8x8x64xf32> to vector<8x8x32xf32>
    %cst_53 = arith.constant dense<0.000000e+00> : vector<8x8xf32>
    %521 = vector.multi_reduction <add>, %520, %cst_53 [2] : vector<8x8x32xf32> to vector<8x8xf32>
    %522 = vector.shape_cast %521 : vector<8x8xf32> to vector<8x8x1xf32>
    %cst_54 = arith.constant dense<0xFF800000> : vector<8x1xf32>
    %523 = vector.multi_reduction <maximumf>, %519, %cst_54 [0] : vector<8x8x1xf32> to vector<8x1xf32>
    %524 = vector.shape_cast %523 : vector<8x1xf32> to vector<1x8x1xf32>
    %525 = vector.broadcast %524 : vector<1x8x1xf32> to vector<8x8x1xf32>
    %526 = arith.subf %519, %525 : vector<8x8x1xf32>
    %527 = math.exp %526 : vector<8x8x1xf32>
    %cst_55 = arith.constant dense<0.000000e+00> : vector<8x1xf32>
    %528 = vector.multi_reduction <add>, %527, %cst_55 [0] : vector<8x8x1xf32> to vector<8x1xf32>
    %529 = vector.shape_cast %528 : vector<8x1xf32> to vector<1x8x1xf32>
    %530 = tpu.reciprocal %529 {approx = true} : vector<1x8x1xf32> -> vector<1x8x1xf32>
    %531 = vector.broadcast %530 : vector<1x8x1xf32> to vector<8x8x1xf32>
    %532 = arith.mulf %527, %531 : vector<8x8x1xf32>
    %cst_56 = arith.constant dense<0xFF800000> : vector<8x1xf32>
    %533 = vector.multi_reduction <maximumf>, %522, %cst_56 [0] : vector<8x8x1xf32> to vector<8x1xf32>
    %534 = vector.shape_cast %533 : vector<8x1xf32> to vector<1x8x1xf32>
    %535 = vector.broadcast %534 : vector<1x8x1xf32> to vector<8x8x1xf32>
    %536 = arith.subf %522, %535 : vector<8x8x1xf32>
    %537 = math.exp %536 : vector<8x8x1xf32>
    %cst_57 = arith.constant dense<0.000000e+00> : vector<8x1xf32>
    %538 = vector.multi_reduction <add>, %537, %cst_57 [0] : vector<8x8x1xf32> to vector<8x1xf32>
    %539 = vector.shape_cast %538 : vector<8x1xf32> to vector<1x8x1xf32>
    %540 = tpu.reciprocal %539 {approx = true} : vector<1x8x1xf32> -> vector<1x8x1xf32>
    %541 = vector.broadcast %540 : vector<1x8x1xf32> to vector<8x8x1xf32>
    %542 = arith.mulf %537, %541 : vector<8x8x1xf32>
    %543 = vector.shape_cast %40 : vector<1x1x64xi1> to vector<1x1x64xi1>
    %544 = vector.broadcast %543 : vector<1x1x64xi1> to vector<8x8x64xi1>
    %545 = vector.shape_cast %532 : vector<8x8x1xf32> to vector<8x8x1xf32>
    %546 = vector.broadcast %545 : vector<8x8x1xf32> to vector<8x8x64xf32>
    %547 = vector.shape_cast %542 : vector<8x8x1xf32> to vector<8x8x1xf32>
    %548 = vector.broadcast %547 : vector<8x8x1xf32> to vector<8x8x64xf32>
    %549 = arith.select %544, %546, %548 : vector<8x8x64xi1>, vector<8x8x64xf32>
    %550 = arith.mulf %513, %549 : vector<8x8x64xf32>
    %cst_58 = arith.constant dense<0.000000e+00> : vector<8x64xf32>
    %551 = vector.multi_reduction <add>, %550, %cst_58 [0] : vector<8x8x64xf32> to vector<8x64xf32>
    %c0_59 = arith.constant 0 : index
    %c0_60 = arith.constant 0 : index
    %552 = vector.load %arg4[%c0_59, %c0_60] : memref<192x32xf32, #tpu.memory_space<vmem>>, vector<192x32xf32>
    %c0_61 = arith.constant 0 : index
    %c0_62 = arith.constant 0 : index
    %553 = vector.load %arg2[%c0_61, %c0_62] : memref<8x64xf32, #tpu.memory_space<vmem>>, vector<8x64xf32>
    %554 = tpu.concatenate %551, %553 in 1 : vector<8x64xf32>, vector<8x64xf32> -> vector<8x128xf32>
    %555 = vector.extract_strided_slice %552 {offsets = [0, 0], sizes = [128, 32], strides = [1, 1]} : vector<192x32xf32> to vector<128x32xf32>
    %cst_63 = arith.constant dense<0.000000e+00> : vector<8x32xf32>
    %556 = tpu.matmul %554, %555, %cst_63 {dimension_numbers = #tpu.dot_dimension_numbers<[1], [0], [0], [1], [0, 0, 1, 1], [], []>} : vector<8x128xf32>, vector<128x32xf32>, vector<8x32xf32> -> vector<8x32xf32>
    %cst_64 = arith.constant 0.000000e+00 : f32
    %557 = vector.broadcast %cst_64 : f32 to vector<8x32xf32>
    %558 = arith.maximumf %556, %557 : vector<8x32xf32>
    %559 = vector.extract_strided_slice %552 {offsets = [128, 0], sizes = [32, 16], strides = [1, 1]} : vector<192x32xf32> to vector<32x16xf32>
    %cst_65 = arith.constant dense<0.000000e+00> : vector<8x16xf32>
    %560 = tpu.matmul %558, %559, %cst_65 {dimension_numbers = #tpu.dot_dimension_numbers<[1], [0], [0], [1], [0, 0, 1, 1], [], []>} : vector<8x32xf32>, vector<32x16xf32>, vector<8x16xf32> -> vector<8x16xf32>
    %561 = vector.extract_strided_slice %552 {offsets = [160, 0], sizes = [1, 16], strides = [1, 1]} : vector<192x32xf32> to vector<1x16xf32>
    %562 = vector.broadcast %561 : vector<1x16xf32> to vector<8x16xf32>
    %563 = arith.addf %560, %562 : vector<8x16xf32>
    %cst_66 = arith.constant 0.000000e+00 : f32
    %564 = vector.broadcast %cst_66 : f32 to vector<8x16xf32>
    %565 = arith.maximumf %563, %564 : vector<8x16xf32>
    %566 = vector.extract_strided_slice %552 {offsets = [168, 0], sizes = [16, 3], strides = [1, 1]} : vector<192x32xf32> to vector<16x3xf32>
    %cst_67 = arith.constant dense<0.000000e+00> : vector<8x3xf32>
    %567 = tpu.matmul %565, %566, %cst_67 {dimension_numbers = #tpu.dot_dimension_numbers<[1], [0], [0], [1], [0, 0, 1, 1], [], []>} : vector<8x16xf32>, vector<16x3xf32>, vector<8x3xf32> -> vector<8x3xf32>
    %568 = vector.extract_strided_slice %552 {offsets = [184, 0], sizes = [1, 3], strides = [1, 1]} : vector<192x32xf32> to vector<1x3xf32>
    %569 = vector.broadcast %568 : vector<1x3xf32> to vector<8x3xf32>
    %570 = arith.addf %567, %569 : vector<8x3xf32>
    %c0_68 = arith.constant 0 : index
    %c0_69 = arith.constant 0 : index
    %571 = vector.load %arg5[%c0_68, %c0_69] : memref<8x3xf32, #tpu.memory_space<vmem>>, vector<8x3xf32>
    tpu.vector_store %arg5[%c0_68, %c0_69], %570 {strides = array<i32>} : memref<8x3xf32, #tpu.memory_space<vmem>>, vector<8x3xf32>,
    return
  }
  func.func @transform_0(%arg0: i32) -> (i32, i32, i32) {
    %c0_i32 = arith.constant 0 : i32
    %c0_i32_0 = arith.constant 0 : i32
    %c0_i32_1 = arith.constant 0 : i32
    return %c0_i32, %arg0, %c0_i32_0 : i32, i32, i32
  }
  func.func @transform_1(%arg0: i32) -> (i32, i32) {
    %c0_i32 = arith.constant 0 : i32
    %c0_i32_0 = arith.constant 0 : i32
    return %arg0, %c0_i32 : i32, i32
  }
  func.func @transform_2(%arg0: i32) -> (i32, i32) {
    %c0_i32 = arith.constant 0 : i32
    %c0_i32_0 = arith.constant 0 : i32
    %c0_i32_1 = arith.constant 0 : i32
    return %c0_i32, %c0_i32_0 : i32, i32
  }
  func.func @transform_3(%arg0: i32) -> (i32, i32) {
    %c0_i32 = arith.constant 0 : i32
    %c0_i32_0 = arith.constant 0 : i32
    %c0_i32_1 = arith.constant 0 : i32
    return %c0_i32, %c0_i32_0 : i32, i32
  }
  func.func @transform_4(%arg0: i32) -> (i32, i32) {
    %c0_i32 = arith.constant 0 : i32
    %c0_i32_0 = arith.constant 0 : i32
    return %arg0, %c0_i32 : i32, i32
  }
}

</mosaic_0001>

<bundles_post_ra>
// kernel: forward.1
= control target key start
LH: loop header
LB: loop body
LE: loop exit
PB: predicated region body
PF: predicated region fallthrough
CT: control target
= control target key end

     0   :  { %s2981_s15 = smov 0   ;;  %s2983_s16 = smov 0   ;;  %s4376_s0 = inlined_call_operand.vmem [shape: f32[8,16,16], index: 0, kind: input, shape index: {}]   ;;  %s4377_s1 = inlined_call_operand.vmem [shape: f32[16,64], index: 1, kind: input, shape index: {}]   ;;  %s4378_s2 = inlined_call_operand.vmem [shape: f32[232,256], index: 2, kind: input, shape index: {}]   ;;  %s4379_s3 = inlined_call_operand.vmem [shape: f32[192,32], index: 3, kind: input, shape index: {}]   ;;  %s4380_s4 = inlined_call_operand.vmem [shape: f32[16,3], index: 4, kind: output, shape index: {}]  }
   0x1   :  { %s2985_s17 = smov 0  }
   0x2 LB: > { %s2566_s18 = sadd.s32 4294967295, %s2951_s17   ;;  %s2998_s19 = sadd.s32 1, %s2951_s17   ;;  %s2951_s17 = sphi %s2985_s17, %s4397_s17   ;;  %s2947_s16 = sphi %s2983_s16, %s4396_s16   ;;  %s2943_s15 = sphi %s2981_s15, %s4395_s15  }
   0x3   : > { %s18_s20 = ssub.s32 %s2951_s17, %s2998_s19  ;;  %s21_s21 = sadd.s32 1, %s2947_s16 }
   0x4   : > { %p19_p0 = scmp.eq.s32.totalorder %s18_s20, 0  ;;  %p28_p1 = scmp.ne.s32.totalorder %s2947_s16, %s2943_s15 }
   0x5   : > { %p29_p2 = scmp.eq.s32.totalorder %s2951_s17, 0  ;;  %p2569_p4 = scmp.ge.s32.totalorder %s2951_s17, 2 }
   0x6   : > { %s3007_s22 = scalar_select %p19_p0, %s2947_s16, %s21_s21  }
   0x7   : > { %p30_p3 = por %p29_p2, %p28_p1  ;;  %154 = sbr.rel (%p2569_p4) target bundleno = 24 (0x18), region = 24 }
   0xc   : > { %157 = sbr.rel (!%p30_p3) target bundleno = 24 (0x18), region = 28  ;;  %s159_s23 = sand.u32 (%p30_p3), 1, %s2947_s16  }
   0xd   : > { %s2571_s24 = sshll.u32 (%p30_p3), %s2951_s17, 3  ;;  %s2570_s25 = sshll.u32 (%p30_p3), %s159_s23, 6 }
   0xe   : > { %s163_s28 = scalar_lea.vmem (%p30_p3), %s4376_s0, %s2571_s24  ;;  %s161_s29 = scalar_lea.vmem (%p30_p3), [#allocation2], %s2570_s25 }
   0xf   : > { %v206_v0 = vld [vmem:[%s163_s28] sm:$0xff] (%p30_p3)  ;;  %v208_v1 = vld [vmem:[%s163_s28 + $0x10] sm:$0xff] (%p30_p3) }
  0x10   : > { %v210_v2 = vld [vmem:[%s163_s28 + $0x20] sm:$0xff] (%p30_p3)  ;;  %207 = vst [vmem:[%s161_s29] sm:$0xff] (%p30_p3), %v206_v0  ;;  %v212_v3 = vld [vmem:[%s163_s28 + $0x30] sm:$0xff] (%p30_p3) }
  0x11   : > { %209 = vst [vmem:[%s161_s29 + $0x8] sm:$0xff] %v208_v1  ;;  %v214_v4 = vld [vmem:[%s163_s28 + $0x40] sm:$0xff]  ;;  %v216_v5 = vld [vmem:[%s163_s28 + $0x50] sm:$0xff] }
  0x12   : > { %211 = vst [vmem:[%s161_s29 + $0x10] sm:$0xff] %v210_v2  ;;  %v218_v6 = vld [vmem:[%s163_s28 + $0x60] sm:$0xff]  ;;  %v220_v7 = vld [vmem:[%s163_s28 + $0x70] sm:$0xff] }
  0x13   : > { %213 = vst [vmem:[%s161_s29 + $0x18] sm:$0xff] %v212_v3 }
  0x14   : > { %215 = vst [vmem:[%s161_s29 + $0x20] sm:$0xff] %v214_v4 }
  0x15   : > { %217 = vst [vmem:[%s161_s29 + $0x28] sm:$0xff] %v216_v5 }
  0x16   : > { %219 = vst [vmem:[%s161_s29 + $0x30] sm:$0xff] %v218_v6 }
  0x17   : > { %221 = vst [vmem:[%s161_s29 + $0x38] sm:$0xff] %v220_v7 }
  0x18 PF: > { %p2572_p5 = scmp.ge.s32.totalorder %s2951_s17, 1  ;;  %p233_p6 = scmp.lt.s32.totalorder %s2951_s17, 3 }
  0x1a   : > { %p234_p7 = pnand %p2572_p5, %p233_p6 }
  0x1b   : > { %s240_s10 = sand.u32 (!%p234_p7), 1, %s2943_s15   ;;  %s2954_s9 = smov (!%p234_p7), 64  }
  0x1c   : > { %237 = sbr.rel (%p234_p7) target bundleno = 7021 (0x1b6d), region = 70  ;;  %s2573_s13 = sshll.u32 (!%p234_p7), %s240_s10, 6 }
  0x1d   : > { %s3035_s21 = scalar_lea.vmem (!%p234_p7), [#allocation2], %s2573_s13  ;;  %s2955_s26 = smov (!%p234_p7), 96  }
  0x1e   : > { %p268_p8 = scmp.lt.s32.totalorder (!%p234_p7), %s2566_s18, 1 }
  0x21   : > { %v308_v8 = vld [vmem:[%s4378_s2 + $0x10] sm:$0xff]  ;;  %v309_v9 = vld [vmem:[%s4378_s2 + $0x18] sm:$0xff]  ;;  %v306_v10 = vld [vmem:[%s4378_s2] sm:$0xff]  ;;  %vm373_vm0 = vcmask 130048   ;;  %v4381_v31 = vmov 0.0   ;;  %v276_v38 = vlaneseq  ;;  %vm500_vm11 = vcmask 523264  }
  0x22   : > { %2672 = vmatpush.msra.mxu2 %v308_v8  ;;  %453 = vmatpush.msra.mxu1 %v309_v9  ;;  %v307_v11 = vld [vmem:[%s4378_s2 + $0x8] sm:$0xff]  ;;  %v3033_v12 = vld [vmem:[%s4378_s2 + $0x90] sm:$0xff]  ;;  %v363_v14 = vld [vmem:[%s3035_s21] sm:$0xff]  ;;  %s4399_s18 = smov (!%p268_p8, %s2566_s18), 1 }
  0x23   : > { %412 = vmatpush.msra.mxu0 %v308_v8  ;;  %v3038_v13 = vld [vmem:[%s3035_s21 + $0x30] sm:$0xff]  ;;  %v3047_v15 = vld [vmem:[%s4378_s2 + $0x80] sm:$0xff]  ;;  %v3059_v17 = vld [vmem:[%s4378_s2 + $0x98] sm:$0xff]  ;;  %v3232_v42 = vand.u32 127, %v276_v38  ;;  %s2574_s27 = sshll.u32 %s4399_s18, 3 }
  0x24   : > { %2673 = vmatpush.msra.mxu2 %v306_v10  ;;  %454 = vmatpush.msra.mxu1 %v307_v11  ;;  %v3053_v16 = vld [vmem:[%s4378_s2 + $0x70] sm:$0xff]  ;;  %v3066_v18 = vld [vmem:[%s4378_s2 + $0x60] sm:$0xff]  ;;  %v3072_v19 = vld [vmem:[%s3035_s21 + $0x38] sm:$0xff]  ;;  %s271_s30 = scalar_lea.vmem %s4377_s1, %s2574_s27  ;;  %s275_s11 = scalar_lea.vmem %s4380_s4, %s2574_s27 }
  0x25   : > { %2582 = vmatmul.msk.f32.vlgmr.msra.gmra.mxu2 %vm373_vm0, %v3038_v13  ;;  %2584 = vmatmul.msk.f32.vlgmr.msra.gmra.mxu1 %vm373_vm0, %v363_v14  ;;  %v364_v20 = vld [vmem:[%s3035_s21 + $0x8] sm:$0xff]  ;;  %v3078_v21 = vld [vmem:[%s4378_s2 + $0x50] sm:$0xff]  ;;  %v3093_v23 = vld [vmem:[%s4378_s2 + $0x40] sm:$0xff]  ;;  %v283_v47 = vand.u32 31, %v3232_v42  ;;  %v278_v0 = vadd.s32 128, %v3232_v42 }
  0x26   : > { %512 = vmatpush.msrb.mxu2 %v3033_v12  ;;  %413 = vmatpush.msra.mxu0 %v306_v10  ;;  %v3085_v22 = vld [vmem:[%s4378_s2 + $0x88] sm:$0xff]  ;;  %v3098_v24 = vld [vmem:[%s4378_s2 + $0x78] sm:$0xff]  ;;  %v3105_v25 = vld [vmem:[%s4378_s2 + $0x30] sm:$0xff] }
  0x27   : > { %2576 = vmatmul.msk.f32.vlgmr.msra.gmra.mxu0 %vm373_vm0, %v363_v14  ;;  %532 = vmatpush.msra.mxu3 %v3059_v17  ;;  %v3111_v26 = vld [vmem:[%s4378_s2 + $0x68] sm:$0xff]  ;;  %v3119_v27 = vld [vmem:[%s4378_s2 + $0x20] sm:$0xff]  ;;  %v3124_v28 = vld [vmem:[%s4378_s2 + $0x58] sm:$0xff]  ;;  %vm3245_vm1 = vcmp.lt.s32.totalorder %v283_v47, 16  ;;  %v290_v3 = vand.u32 31, %v278_v0 }
  0x28   : > { %513 = vmatpush.msrb.mxu2 %v3047_v15  ;;  %892 = vmatpush.msrb.mxu0 %v3033_v12  ;;  %v365_v29 = vld [vmem:[%s3035_s21 + $0x10] sm:$0xff]  ;;  %v3138_v30 = vld [vmem:[%s4378_s2 + $0x48] sm:$0xff]  ;;  %v3145_v32 = vld [vmem:[%s4378_s2 + $0x38] sm:$0xff] }
  0x29   : > { %912 = vmatpush.msrb.mxu1 %v3059_v17  ;;  %533 = vmatpush.msra.mxu3 %v3085_v22  ;;  %v3152_v33 = vld [vmem:[%s4378_s2 + $0x28] sm:$0xff]  ;;  %v366_v34 = vld [vmem:[%s3035_s21 + $0x18] sm:$0xff]  ;;  %v367_v35 = vld [vmem:[%s3035_s21 + $0x20] sm:$0xff]  ;;  %vm3272_vm2 = vcmp.lt.s32.totalorder %v290_v3, 16 }
  0x2a   : > { %514 = vmatpush.msrb.mxu2 %v3053_v16  ;;  %893 = vmatpush.msrb.mxu0 %v3047_v15  ;;  %v368_v36 = vld [vmem:[%s3035_s21 + $0x28] sm:$0xff]  ;;  %v326_v41 = vld [vmem:[%s4378_s2 + $0xa0] sm:$0xff] }
  0x2b   : > { %913 = vmatpush.msrb.mxu1 %v3085_v22  ;;  %534 = vmatpush.msra.mxu3 %v3098_v24  ;;  %v327_v40 = vld [vmem:[%s4378_s2 + $0xa8] sm:$0xff]  ;;  %v3234_v45 = vperm.slane %v326_v41, 0 }
  0x2c   : > { %515 = vmatpush.msrb.mxu2 %v3066_v18  ;;  %894 = vmatpush.msrb.mxu0 %v3053_v16  ;;  %v372_v44 = vperm.slane %v327_v40, 0 }
  0x2d   : > { %2583 = vmatmul.msk.f32.gmra.mxu2 %vm373_vm0, %v3072_v19  ;;  %2585 = vmatmul.msk.f32.gmra.mxu1 %vm373_vm0, %v364_v20 }
  0x2e   : > { %516 = vmatpush.msrb.mxu2 %v3078_v21  ;;  %914 = vmatpush.msrb.mxu1 %v3098_v24 }
  0x2f   : > { %2577 = vmatmul.msk.f32.gmra.mxu0 %vm373_vm0, %v364_v20  ;;  %535 = vmatpush.msra.mxu3 %v3111_v26 }
  0x30   : > { %517 = vmatpush.msrb.mxu2 %v3093_v23  ;;  %895 = vmatpush.msrb.mxu0 %v3066_v18 }
  0x31   : > { %915 = vmatpush.msrb.mxu1 %v3111_v26  ;;  %536 = vmatpush.msra.mxu3 %v3124_v28 }
  0x32   : > { %518 = vmatpush.msrb.mxu2 %v3105_v25  ;;  %896 = vmatpush.msrb.mxu0 %v3078_v21 }
  0x33   : > { %537 = vmatpush.msra.mxu3 %v3138_v30  ;;  %916 = vmatpush.msrb.mxu1 %v3124_v28 }
  0x34   : > { %519 = vmatpush.msrb.mxu2 %v3119_v27  ;;  %897 = vmatpush.msrb.mxu0 %v3093_v23 }
  0x35   : > { %2586 = vmatmul.msk.f32.gmra.mxu1 %vm373_vm0, %v365_v29  ;;  %520 = vmatmul.f32.vlgmr.msrb.gmra.mxu2 %v4381_v31 }
  0x36   : > { %607 = vmatpush.msra.mxu2 %v3033_v12  ;;  %538 = vmatpush.msra.mxu3 %v3145_v32 }
  0x37   : > { %2578 = vmatmul.msk.f32.gmra.mxu0 %vm373_vm0, %v365_v29  ;;  %917 = vmatpush.msrb.mxu1 %v3138_v30 }
  0x38   : > { %608 = vmatpush.msra.mxu2 %v3047_v15  ;;  %539 = vmatpush.msra.mxu3 %v3152_v33 }
  0x39   : > { %540 = vmatmul.f32.vlgmr.msra.gmra.mxu3 %v4381_v31  ;;  %898 = vmatpush.msrb.mxu0 %v3105_v25 }
  0x3a   : > { %609 = vmatpush.msra.mxu2 %v3053_v16  ;;  %627 = vmatpush.msrb.mxu3 %v3059_v17 }
  0x3b   : > { %918 = vmatpush.msrb.mxu1 %v3145_v32  ;;  %899 = vmatpush.msrb.mxu0 %v3119_v27 }
  0x3c   : > { %610 = vmatpush.msra.mxu2 %v3066_v18  ;;  %628 = vmatpush.msrb.mxu3 %v3085_v22 }
  0x3d   : > { %2587 = vmatmul.msk.f32.gmra.mxu1 %vm373_vm0, %v366_v34  ;;  %1082 = vmatpush.msra.mxu0 %v3033_v12 }
  0x3e   : > { %611 = vmatpush.msra.mxu2 %v3078_v21  ;;  %629 = vmatpush.msrb.mxu3 %v3098_v24 }
  0x3f   : > { %2579 = vmatmul.msk.f32.gmra.mxu0 %vm373_vm0, %v366_v34  ;;  %919 = vmatpush.msrb.mxu1 %v3152_v33 }
  0x40   : > { %612 = vmatpush.msra.mxu2 %v3093_v23  ;;  %630 = vmatpush.msrb.mxu3 %v3111_v26 }
  0x41   : > { %1102 = vmatpush.msra.mxu1 %v3059_v17  ;;  %1083 = vmatpush.msra.mxu0 %v3047_v15 }
  0x42   : > { %613 = vmatpush.msra.mxu2 %v3105_v25  ;;  %631 = vmatpush.msrb.mxu3 %v3124_v28 }
  0x43   : > { %1103 = vmatpush.msra.mxu1 %v3085_v22  ;;  %1084 = vmatpush.msra.mxu0 %v3053_v16 }
  0x44   : > { %614 = vmatpush.msra.mxu2 %v3119_v27  ;;  %632 = vmatpush.msrb.mxu3 %v3138_v30 }
  0x45   : > { %2588 = vmatmul.msk.f32.gmra.mxu1 %vm373_vm0, %v367_v35  ;;  %1085 = vmatpush.msra.mxu0 %v3066_v18 }
  0x46   : > { %702 = vmatpush.msrb.mxu2 %v3033_v12  ;;  %633 = vmatpush.msrb.mxu3 %v3145_v32 }
  0x47   : > { %2580 = vmatmul.msk.f32.gmra.mxu0 %vm373_vm0, %v367_v35  ;;  %1104 = vmatpush.msra.mxu1 %v3098_v24 }
  0x48   : > { %703 = vmatpush.msrb.mxu2 %v3047_v15  ;;  %634 = vmatpush.msrb.mxu3 %v3152_v33 }
  0x49   : > { %1105 = vmatpush.msra.mxu1 %v3111_v26  ;;  %1086 = vmatpush.msra.mxu0 %v3078_v21 }
  0x4a   : > { %704 = vmatpush.msrb.mxu2 %v3053_v16  ;;  %722 = vmatpush.msra.mxu3 %v3059_v17 }
  0x4b   : > { %1106 = vmatpush.msra.mxu1 %v3124_v28  ;;  %1087 = vmatpush.msra.mxu0 %v3093_v23 }
  0x4c   : > { %705 = vmatpush.msrb.mxu2 %v3066_v18  ;;  %723 = vmatpush.msra.mxu3 %v3085_v22 }
  0x4d   : > { %2589 = vmatmul.msk.f32.gmra.mxu1 %vm373_vm0, %v368_v36  ;;  %1088 = vmatpush.msra.mxu0 %v3105_v25 }
  0x4e   : > { %706 = vmatpush.msrb.mxu2 %v3078_v21  ;;  %724 = vmatpush.msra.mxu3 %v3098_v24 }
  0x4f   : > { %2581 = vmatmul.msk.f32.gmra.mxu0 %vm373_vm0, %v368_v36  ;;  %1107 = vmatpush.msra.mxu1 %v3138_v30 }
  0x50   : > { %707 = vmatpush.msrb.mxu2 %v3093_v23  ;;  %725 = vmatpush.msra.mxu3 %v3111_v26 }
  0x51   : > { %1108 = vmatpush.msra.mxu1 %v3145_v32  ;;  %1089 = vmatpush.msra.mxu0 %v3119_v27 }
  0x52   : > { %708 = vmatpush.msrb.mxu2 %v3105_v25  ;;  %726 = vmatpush.msra.mxu3 %v3124_v28 }
  0x53   : > { %1109 = vmatpush.msra.mxu1 %v3152_v33 }
  0x54   : > { %709 = vmatpush.msrb.mxu2 %v3119_v27  ;;  %727 = vmatpush.msra.mxu3 %v3138_v30 }
  0x55   : > { %2590 = vmatmul.msk.f32.gmra.mxu1 %vm373_vm0, %v3038_v13 }
  0x56   : > { %728 = vmatpush.msra.mxu3 %v3145_v32 }
  0x58   : > { %729 = vmatpush.msra.mxu3 %v3152_v33 }
  0x5d   : > { %2591 = vmatmul.msk.f32.gmra.mxu1 %vm373_vm0, %v3072_v19 }
  0xa2   : > { %v456_v37 = vpop.f32.mrf.mxu1 }
  0xa3   : > { %v3306_v41 = vadd.f32 %v456_v37, %v372_v44 }
  0xa4   : > { %v415_v39 = vpop.f32.mrf.mxu0 }
  0xa5   : > { %v3254_v55 = vadd.f32 %v415_v39, %v3234_v45 }
  0xa8   : > { %v433_v43 = vpop.f32.mrf.mxu2 }
  0xa9   : > { %v3238_v48 = vadd.f32 %v433_v43, %v3234_v45 }
  0xaa   : > { %v459_v46 = vpop.f32.mrf.mxu1 }
  0xab   : > { %v3240_v49 = vadd.f32 %v459_v46, %v372_v44 }
  0xac   : > { %v418_v50 = vpop.f32.mrf.mxu0 }
  0xad   : > { %v3243_v51 = vadd.f32 %v418_v50, %v3234_v45 }
  0xaf   : > { %v496_v53 = vsel %vm3245_vm1, %v3238_v48, %v3243_v51 }
  0xb0   : > { %v436_v54 = vpop.f32.mrf.mxu2 }
  0xb1   : > { %v3257_v56 = vadd.f32 %v436_v54, %v3234_v45 }
  0xb2   : > { %v462_v57 = vpop.f32.mrf.mxu1 }
  0xb3   : > { %v3259_v58 = vadd.f32 %v462_v57, %v372_v44  ;;  %v484_v60 = vsel %vm3245_vm1, %v3254_v55, %v3257_v56 }
  0xb8   : > { %v521_v61 = vpop.f32.mrf.mxu2 }
  0xb9   : > { %v544_v62 = vadd.f32 %v521_v61, %v484_v60 }
  0xba   : > { %v465_v63 = vpop.f32.mrf.mxu1 }
  0xbb   : > { %v2592_v1 = vmul.f32 -1.442695, %v544_v62  ;;  %v3270_v2 = vadd.f32 %v465_v63, %v372_v44 }
  0xbc   : > { %v541_v46 = vpop.f32.mrf.mxu3 }
  0xbd   : > { %2701 = vpow2.f32 %v2592_v1 }
  0xc2   : > { %v468_v4 = vpop.f32.mrf.mxu1 }
  0xc3   : > { %v2702_v6 = vpop.eup %2701  ;;  %v3276_v7 = vadd.f32 %v468_v4, %v372_v44 }
  0xc4   : > { %v552_v10 = vadd.f32 1.0, %v2702_v6 }
  0xc5   : > { %v491_v8 = vsel %vm3272_vm2, %v3270_v2, %v3276_v7  ;;  %v493_v9 = vsel %vm3272_vm2, %v3276_v7, %v3270_v2 }
  0xc6   : > { %2703 = vrcp.f32 %v552_v10  ;;  %v565_v60 = vand.u32 2147483648, %v552_v10  ;;  %vm559_vm3 = vweird.f32 %v552_v10  ;;  %v563_v37 = vand.u32 2147483647, %v552_v10 }
  0xc8   : > { %vm564_vm6 = vcmp.eq.f32.partialorder %v563_v37, 8.507059e+37 }
  0xca   : > { %v471_v11 = vpop.f32.mrf.mxu1 }
  0xcb   : > { %v3286_v13 = vadd.f32 %v471_v11, %v372_v44 }
  0xcc   : > { %v2704_v20 = vpop.eup %2703 }
  0xcd   : > { %v489_v14 = vsel %vm3272_vm2, %v3259_v58, %v3286_v13  ;;  %v495_v19 = vsel %vm3272_vm2, %v3286_v13, %v3259_v58  ;;  %v555_v35 = vmul.f32 %v2704_v20, %v552_v10  ;;  %vm560_vm4 = vweird.f32 %v2704_v20 }
  0xce   : > { %vm561_vm5 = vmor %vm559_vm3, %vm560_vm4 }
  0xcf   : > { %v556_v39 = vsub.f32 1.0, %v555_v35 }
  0xd1   : > { %v557_v47 = vmul.f32 %v2704_v20, %v556_v39 }
  0xd2   : > { %v474_v29 = vpop.f32.mrf.mxu1 }
  0xd3   : > { %v3296_v34 = vadd.f32 %v474_v29, %v372_v44  ;;  %v558_v61 = vadd.f32 %v2704_v20, %v557_v47 }
  0xd5   : > { %v487_v36 = vsel %vm3272_vm2, %v3240_v49, %v3296_v34  ;;  %v497_v38 = vsel %vm3272_vm2, %v3296_v34, %v3240_v49  ;;  %v562_v62 = vsel %vm561_vm5, %v2704_v20, %v558_v61 }
  0xda   : > { %v477_v40 = vpop.f32.mrf.mxu1 }
  0xdb   : > { %v3308_v43 = vadd.f32 %v477_v40, %v372_v44  ;;  %v566_v44 = vor.u32 1.1754944e-38, %v565_v60 }
  0xdd   : > { %v485_v50 = vsel %vm3272_vm2, %v3306_v41, %v3308_v43  ;;  %v567_v0 = vsel %vm564_vm6, %v566_v44, %v562_v62 }
  0xde   : > { %v545_v57 = vadd.f32 %v541_v46, %v485_v50  ;;  %v585_v10 = vmul.f32 0.0, %v567_v0 }
  0xe0   : > { %2705 = vtanh.f32 %v545_v57  ;;  %v2593_v3 = vmul.f32 -1.442695, %v545_v57 }
  0xe2   : > { %2707 = vpow2.f32 %v2593_v3 }
  0xe6   : > { %v2706_v63 = vpop.eup %2705 }
  0xe7   : > { %v586_v1 = vmul.f32 %v2706_v63, %v567_v0  ;;  %v486_v63 = vsel %vm3245_vm1, %v3243_v51, %v3238_v48 }
  0xe8   : > { %v2708_v4 = vpop.eup %2707 }
  0xe9   : > { %588 = vrot.lane.b32.xlu0 %v586_v1, %s2954_s9  ;;  %v553_v6 = vadd.f32 1.0, %v2708_v4 }
  0xeb   : > { %2709 = vrcp.f32 %v553_v6  ;;  %v580_v47 = vand.u32 2147483648, %v553_v6  ;;  %vm574_vm8 = vweird.f32 %v553_v6  ;;  %v578_v50 = vand.u32 2147483647, %v553_v6 }
  0xed   : > { %v581_v60 = vor.u32 1.1754944e-38, %v580_v47  ;;  %vm579_vm10 = vcmp.eq.f32.partialorder %v578_v50, 8.507059e+37 }
  0xf1   : > { %v2710_v11 = vpop.eup %2709 }
  0xf2   : > { %v570_v29 = vmul.f32 %v2710_v11, %v553_v6  ;;  %vm575_vm7 = vweird.f32 %v2710_v11 }
  0xf3   : > { %vm576_vm9 = vmor %vm574_vm8, %vm575_vm7 }
  0xf4   : > { %v571_v35 = vsub.f32 1.0, %v570_v29 }
  0xf6   : > { %v572_v39 = vmul.f32 %v2710_v11, %v571_v35 }
  0xf8   : > { %v573_v20 = vadd.f32 %v2710_v11, %v572_v39 }
  0xfa   : > { %v577_v57 = vsel %vm576_vm9, %v2710_v11, %v573_v20 }
  0xfb   : > { %v582_v37 = vsel %vm579_vm10, %v581_v60, %v577_v57 }
 0x15b   : > { %v589_v40 = vpop.permute.xlu0 %588 }
 0x15c   : > { %v3319_v46 = vadd.f32 %v589_v40, %v585_v10 }
 0x15e   : > { %2711 = vtanh.f32 %v3319_v46 }
 0x164   : > { %v2712_v61 = vpop.eup %2711 }
 0x165   : > { %v593_v44 = vmul.f32 %v2712_v61, %v582_v37 }
 0x167   : > { %595 = vrot.lane.b32.xlu0 %v593_v44, %s2954_s9 }
 0x1d9   : > { %v3323_v62 = vpop.permute.xlu0 %595 }
 0x1da   : > { %2594 = vmatmul.msk.f32.vlgmr.msra.gmra.mxu2 %vm500_vm11, %v3323_v62  ;;  %2595 = vmatmul.msk.f32.vlgmr.msrb.gmra.mxu3 %vm500_vm11, %v3323_v62 }
 0x1db   : > { %797 = vmatpush.msra.mxu2 %v3033_v12  ;;  %817 = vmatpush.msrb.mxu3 %v3059_v17 }
 0x1dd   : > { %798 = vmatpush.msra.mxu2 %v3047_v15  ;;  %818 = vmatpush.msrb.mxu3 %v3085_v22 }
 0x1df   : > { %799 = vmatpush.msra.mxu2 %v3053_v16  ;;  %819 = vmatpush.msrb.mxu3 %v3098_v24 }
 0x1e1   : > { %800 = vmatpush.msra.mxu2 %v3066_v18  ;;  %820 = vmatpush.msrb.mxu3 %v3111_v26 }
 0x1e3   : > { %801 = vmatpush.msra.mxu2 %v3078_v21  ;;  %821 = vmatpush.msrb.mxu3 %v3124_v28 }
 0x1e5   : > { %802 = vmatpush.msra.mxu2 %v3093_v23  ;;  %822 = vmatpush.msrb.mxu3 %v3138_v30 }
 0x1e7   : > { %803 = vmatpush.msra.mxu2 %v3105_v25  ;;  %823 = vmatpush.msrb.mxu3 %v3145_v32 }
 0x1e9   : > { %804 = vmatpush.msra.mxu2 %v3119_v27  ;;  %824 = vmatpush.msrb.mxu3 %v3152_v33 }
 0x25d   : > { %v616_v0 = vpop.f32.mrf.mxu2  ;;  %v636_v11 = vpop.f32.mrf.mxu3 }
 0x25e   : > { %v639_v1 = vadd.f32 %v616_v0, %v486_v63  ;;  %v640_v35 = vadd.f32 %v636_v11, %v487_v36 }
 0x260   : > { %v2596_v3 = vmul.f32 -1.442695, %v639_v1  ;;  %v2597_v63 = vmul.f32 -1.442695, %v640_v35 }
 0x262   : > { %2713 = vpow2.f32 %v2596_v3 }
 0x268   : > { %v2714_v4 = vpop.eup %2713 }
 0x269   : > { %v647_v6 = vadd.f32 1.0, %v2714_v4 }
 0x26b   : > { %2715 = vrcp.f32 %v647_v6  ;;  %v660_v40 = vand.u32 2147483648, %v647_v6  ;;  %v658_v47 = vand.u32 2147483647, %v647_v6  ;;  %vm654_vm13 = vweird.f32 %v647_v6 }
 0x26c   : > { %2717 = vtanh.f32 %v640_v35 }
 0x26d   : > { %v661_v57 = vor.u32 1.1754944e-38, %v660_v40  ;;  %vm659_vm15 = vcmp.eq.f32.partialorder %v658_v47, 8.507059e+37  ;;  %2719 = vpow2.f32 %v2597_v63 }
 0x271   : > { %v2716_v29 = vpop.eup %2715 }
 0x272   : > { %v650_v39 = vmul.f32 %v2716_v29, %v647_v6  ;;  %vm655_vm12 = vweird.f32 %v2716_v29  ;;  %v2718_v61 = vpop.eup %2717 }
 0x273   : > { %vm656_vm14 = vmor %vm654_vm13, %vm655_vm12  ;;  %v2720_v36 = vpop.eup %2719 }
 0x274   : > { %v651_v10 = vsub.f32 1.0, %v650_v39  ;;  %v648_v0 = vadd.f32 1.0, %v2720_v36 }
 0x276   : > { %v652_v20 = vmul.f32 %v2716_v29, %v651_v10  ;;  %2721 = vrcp.f32 %v648_v0  ;;  %v675_v40 = vand.u32 2147483648, %v648_v0  ;;  %vm669_vm4 = vweird.f32 %v648_v0 }
 0x277   : > { %v673_v35 = vand.u32 2147483647, %v648_v0 }
 0x278   : > { %v653_v50 = vadd.f32 %v2716_v29, %v652_v20  ;;  %v676_v47 = vor.u32 1.1754944e-38, %v675_v40 }
 0x279   : > { %vm674_vm6 = vcmp.eq.f32.partialorder %v673_v35, 8.507059e+37 }
 0x27a   : > { %v657_v60 = vsel %vm656_vm14, %v2716_v29, %v653_v50 }
 0x27b   : > { %v662_v37 = vsel %vm659_vm15, %v661_v57, %v657_v60 }
 0x27c   : > { %v681_v44 = vmul.f32 %v2718_v61, %v662_v37  ;;  %v2722_v1 = vpop.eup %2721  ;;  %v680_v6 = vmul.f32 %v662_v37, %v3319_v46  ;;  %v421_v61 = vpop.f32.mrf.mxu0 }
 0x27d   : > { %v665_v3 = vmul.f32 %v2722_v1, %v648_v0  ;;  %vm670_vm3 = vweird.f32 %v2722_v1 }
 0x27e   : > { %683 = vrot.lane.b32.xlu1 %v681_v44, %s2954_s9  ;;  %vm671_vm5 = vmor %vm669_vm4, %vm670_vm3 }
 0x27f   : > { %v666_v4 = vsub.f32 1.0, %v665_v3 }
 0x281   : > { %v667_v11 = vmul.f32 %v2722_v1, %v666_v4  ;;  %v3397_v4 = vadd.f32 %v421_v61, %v3234_v45 }
 0x283   : > { %v668_v29 = vadd.f32 %v2722_v1, %v667_v11 }
 0x284   : > { %v424_v37 = vpop.f32.mrf.mxu0 }
 0x285   : > { %v672_v20 = vsel %vm671_vm5, %v2722_v1, %v668_v29  ;;  %v3383_v63 = vadd.f32 %v424_v37, %v3234_v45 }
 0x286   : > { %v677_v57 = vsel %vm674_vm6, %v676_v47, %v672_v20 }
 0x28c   : > { %v427_v44 = vpop.f32.mrf.mxu0 }
 0x28d   : > { %v3386_v36 = vadd.f32 %v427_v44, %v3234_v45 }
 0x28f   : > { %v490_v0 = vsel %vm3245_vm1, %v3383_v63, %v3386_v36  ;;  %v492_v1 = vsel %vm3245_vm1, %v3386_v36, %v3383_v63 }
 0x294   : > { %v430_v3 = vpop.f32.mrf.mxu0 }
 0x295   : > { %v3400_v11 = vadd.f32 %v430_v3, %v3234_v45 }
 0x2f0   : > { %v684_v39 = vpop.permute.xlu1 %683 }
 0x2f1   : > { %v3356_v10 = vadd.f32 %v684_v39, %v680_v6  ;;  %v488_v6 = vsel %vm3245_vm1, %v3397_v4, %v3400_v11 }
 0x2f3   : > { %2723 = vtanh.f32 %v3356_v10 }
 0x2f9   : > { %v2724_v50 = vpop.eup %2723 }
 0x2fa   : > { %v688_v60 = vmul.f32 %v2724_v50, %v677_v57 }
 0x2fc   : > { %690 = vrot.lane.b32.xlu1 %v688_v60, %s2954_s9 }
 0x36e   : > { %v3360_v46 = vpop.permute.xlu1 %690 }
 0x36f   : > { %2598 = vmatmul.msk.f32.vlgmr.msrb.gmra.mxu2 %vm500_vm11, %v3360_v46  ;;  %2599 = vmatmul.msk.f32.vlgmr.msra.gmra.mxu3 %vm500_vm11, %v3360_v46 }
 0x370   : > { %987 = vmatpush.msrb.mxu2 %v3033_v12  ;;  %1007 = vmatpush.msra.mxu3 %v3059_v17 }
 0x372   : > { %988 = vmatpush.msrb.mxu2 %v3047_v15  ;;  %1008 = vmatpush.msra.mxu3 %v3085_v22 }
 0x374   : > { %989 = vmatpush.msrb.mxu2 %v3053_v16  ;;  %1009 = vmatpush.msra.mxu3 %v3098_v24 }
 0x376   : > { %990 = vmatpush.msrb.mxu2 %v3066_v18  ;;  %1010 = vmatpush.msra.mxu3 %v3111_v26 }
 0x378   : > { %991 = vmatpush.msrb.mxu2 %v3078_v21  ;;  %1011 = vmatpush.msra.mxu3 %v3124_v28 }
 0x37a   : > { %992 = vmatpush.msrb.mxu2 %v3093_v23  ;;  %1012 = vmatpush.msra.mxu3 %v3138_v30 }
 0x37c   : > { %993 = vmatpush.msrb.mxu2 %v3105_v25  ;;  %1013 = vmatpush.msra.mxu3 %v3145_v32 }
 0x37e   : > { %994 = vmatpush.msrb.mxu2 %v3119_v27  ;;  %1014 = vmatpush.msra.mxu3 %v3152_v33 }
 0x3f2   : > { %v711_v39 = vpop.f32.mrf.mxu2  ;;  %v731_v47 = vpop.f32.mrf.mxu3 }
 0x3f3   : > { %v734_v29 = vadd.f32 %v711_v39, %v488_v6  ;;  %v735_v45 = vadd.f32 %v731_v47, %v489_v14 }
 0x3f5   : > { %v2600_v40 = vmul.f32 -1.442695, %v734_v29  ;;  %v2601_v31 = vmul.f32 -1.442695, %v735_v45 }
 0x3f7   : > { %2725 = vpow2.f32 %v2600_v40 }
 0x3fd   : > { %v2726_v35 = vpop.eup %2725 }
 0x3fe   : > { %v742_v20 = vadd.f32 1.0, %v2726_v35 }
 0x400   : > { %2727 = vrcp.f32 %v742_v20  ;;  %v755_v61 = vand.u32 2147483648, %v742_v20  ;;  %v753_v44 = vand.u32 2147483647, %v742_v20  ;;  %vm749_vm8 = vweird.f32 %v742_v20 }
 0x401   : > { %2729 = vtanh.f32 %v735_v45 }
 0x402   : > { %v756_v6 = vor.u32 1.1754944e-38, %v755_v61  ;;  %vm754_vm10 = vcmp.eq.f32.partialorder %v753_v44, 8.507059e+37  ;;  %2731 = vpow2.f32 %v2601_v31 }
 0x406   : > { %v2728_v50 = vpop.eup %2727 }
 0x407   : > { %v745_v57 = vmul.f32 %v2728_v50, %v742_v20  ;;  %vm750_vm7 = vweird.f32 %v2728_v50  ;;  %v2730_v29 = vpop.eup %2729 }
 0x408   : > { %vm751_vm9 = vmor %vm749_vm8, %vm750_vm7  ;;  %v2732_v14 = vpop.eup %2731 }
 0x409   : > { %v746_v60 = vsub.f32 1.0, %v745_v57  ;;  %v743_v47 = vadd.f32 1.0, %v2732_v14 }
 0x40b   : > { %v747_v37 = vmul.f32 %v2728_v50, %v746_v60  ;;  %2733 = vrcp.f32 %v743_v47  ;;  %v770_v44 = vand.u32 2147483648, %v743_v47  ;;  %vm764_vm13 = vweird.f32 %v743_v47 }
 0x40c   : > { %v768_v45 = vand.u32 2147483647, %v743_v47 }
 0x40d   : > { %v748_v3 = vadd.f32 %v2728_v50, %v747_v37 }
 0x40e   : > { %vm769_vm15 = vcmp.eq.f32.partialorder %v768_v45, 8.507059e+37 }
 0x40f   : > { %v752_v39 = vsel %vm751_vm9, %v2728_v50, %v748_v3  ;;  %v771_v3 = vor.u32 1.1754944e-38, %v770_v44 }
 0x410   : > { %v757_v40 = vsel %vm754_vm10, %v756_v6, %v752_v39 }
 0x411   : > { %v776_v35 = vmul.f32 %v2730_v29, %v757_v40  ;;  %v2734_v57 = vpop.eup %2733  ;;  %v775_v20 = vmul.f32 %v757_v40, %v3356_v10 }
 0x412   : > { %v760_v60 = vmul.f32 %v2734_v57, %v743_v47  ;;  %vm765_vm12 = vweird.f32 %v2734_v57 }
 0x413   : > { %778 = vrot.lane.b32.xlu2 %v776_v35, %s2954_s9  ;;  %vm766_vm14 = vmor %vm764_vm13, %vm765_vm12 }
 0x414   : > { %v761_v54 = vsub.f32 1.0, %v760_v60 }
 0x416   : > { %v762_v59 = vmul.f32 %v2734_v57, %v761_v54 }
 0x418   : > { %v763_v50 = vadd.f32 %v2734_v57, %v762_v59 }
 0x41a   : > { %v767_v31 = vsel %vm766_vm14, %v2734_v57, %v763_v50 }
 0x41b   : > { %v772_v39 = vsel %vm769_vm15, %v771_v3, %v767_v31 }
 0x46d   : > { %v779_v37 = vpop.permute.xlu2 %778 }
 0x46e   : > { %v3413_v61 = vadd.f32 %v779_v37, %v775_v20 }
 0x470   : > { %2735 = vtanh.f32 %v3413_v61 }
 0x476   : > { %v2736_v6 = vpop.eup %2735 }
 0x477   : > { %v783_v29 = vmul.f32 %v2736_v6, %v772_v39 }
 0x479   : > { %785 = vrot.lane.b32.xlu2 %v783_v29, %s2954_s9 }
 0x4d3   : > { %v3417_v54 = vpop.permute.xlu2 %785 }
 0x4d4   : > { %2602 = vmatmul.msk.f32.vlgmr.msra.gmra.mxu2 %vm500_vm11, %v3417_v54  ;;  %2603 = vmatmul.msk.f32.vlgmr.msrb.gmra.mxu3 %vm500_vm11, %v3417_v54 }
 0x4d5   : > { %1177 = vmatpush.msra.mxu2 %v3033_v12  ;;  %1197 = vmatpush.msrb.mxu3 %v3059_v17 }
 0x4d7   : > { %1178 = vmatpush.msra.mxu2 %v3047_v15  ;;  %1198 = vmatpush.msrb.mxu3 %v3085_v22 }
 0x4d9   : > { %1179 = vmatpush.msra.mxu2 %v3053_v16  ;;  %1199 = vmatpush.msrb.mxu3 %v3098_v24 }
 0x4db   : > { %1180 = vmatpush.msra.mxu2 %v3066_v18  ;;  %1200 = vmatpush.msrb.mxu3 %v3111_v26 }
 0x4dd   : > { %1181 = vmatpush.msra.mxu2 %v3078_v21  ;;  %1201 = vmatpush.msrb.mxu3 %v3124_v28 }
 0x4df   : > { %1182 = vmatpush.msra.mxu2 %v3093_v23  ;;  %1202 = vmatpush.msrb.mxu3 %v3138_v30 }
 0x4e1   : > { %1183 = vmatpush.msra.mxu2 %v3105_v25  ;;  %1203 = vmatpush.msrb.mxu3 %v3145_v32 }
 0x4e3   : > { %1184 = vmatpush.msra.mxu2 %v3119_v27  ;;  %1204 = vmatpush.msrb.mxu3 %v3152_v33 }
 0x557   : > { %v806_v12 = vpop.f32.mrf.mxu2  ;;  %v826_v21 = vpop.f32.mrf.mxu3 }
 0x558   : > { %v829_v15 = vadd.f32 %v806_v12, %v490_v0  ;;  %v830_v23 = vadd.f32 %v826_v21, %v491_v8 }
 0x55a   : > { %v2604_v16 = vmul.f32 -1.442695, %v829_v15  ;;  %v2605_v40 = vmul.f32 -1.442695, %v830_v23 }
 0x55c   : > { %2737 = vpow2.f32 %v2604_v16 }
 0x562   : > { %v2738_v17 = vpop.eup %2737 }
 0x563   : > { %v837_v18 = vadd.f32 1.0, %v2738_v17 }
 0x565   : > { %2739 = vrcp.f32 %v837_v18  ;;  %v850_v26 = vand.u32 2147483648, %v837_v18  ;;  %v848_v28 = vand.u32 2147483647, %v837_v18  ;;  %vm844_vm4 = vweird.f32 %v837_v18 }
 0x566   : > { %2741 = vtanh.f32 %v830_v23 }
 0x567   : > { %v851_v32 = vor.u32 1.1754944e-38, %v850_v26  ;;  %vm849_vm6 = vcmp.eq.f32.partialorder %v848_v28, 8.507059e+37  ;;  %2743 = vpow2.f32 %v2605_v40 }
 0x56b   : > { %v2740_v22 = vpop.eup %2739 }
 0x56c   : > { %v840_v24 = vmul.f32 %v2740_v22, %v837_v18  ;;  %vm845_vm3 = vweird.f32 %v2740_v22  ;;  %v2742_v59 = vpop.eup %2741 }
 0x56d   : > { %vm846_vm5 = vmor %vm844_vm4, %vm845_vm3  ;;  %v2744_v8 = vpop.eup %2743 }
 0x56e   : > { %v841_v25 = vsub.f32 1.0, %v840_v24  ;;  %v838_v35 = vadd.f32 1.0, %v2744_v8 }
 0x570   : > { %v842_v27 = vmul.f32 %v2740_v22, %v841_v25  ;;  %2745 = vrcp.f32 %v838_v35  ;;  %v865_v45 = vand.u32 2147483648, %v838_v35  ;;  %vm859_vm8 = vweird.f32 %v838_v35 }
 0x571   : > { %v863_v31 = vand.u32 2147483647, %v838_v35 }
 0x572   : > { %v843_v30 = vadd.f32 %v2740_v22, %v842_v27  ;;  %v866_v6 = vor.u32 1.1754944e-38, %v865_v45 }
 0x573   : > { %vm864_vm10 = vcmp.eq.f32.partialorder %v863_v31, 8.507059e+37 }
 0x574   : > { %v847_v33 = vsel %vm846_vm5, %v2740_v22, %v843_v30 }
 0x575   : > { %v852_v10 = vsel %vm849_vm6, %v851_v32, %v847_v33 }
 0x576   : > { %v871_v0 = vmul.f32 %v2742_v59, %v852_v10  ;;  %v2746_v14 = vpop.eup %2745  ;;  %v870_v20 = vmul.f32 %v852_v10, %v3413_v61 }
 0x577   : > { %v855_v47 = vmul.f32 %v2746_v14, %v838_v35  ;;  %vm860_vm7 = vweird.f32 %v2746_v14 }
 0x578   : > { %873 = vrot.lane.b32.xlu0 %v871_v0, %s2954_s9  ;;  %vm861_vm9 = vmor %vm859_vm8, %vm860_vm7 }
 0x579   : > { %v856_v57 = vsub.f32 1.0, %v855_v47 }
 0x57b   : > { %v857_v60 = vmul.f32 %v2746_v14, %v856_v57 }
 0x57d   : > { %v858_v44 = vadd.f32 %v2746_v14, %v857_v60 }
 0x57f   : > { %v862_v3 = vsel %vm861_vm9, %v2746_v14, %v858_v44 }
 0x580   : > { %v867_v29 = vsel %vm864_vm10, %v866_v6, %v862_v3 }
 0x5ea   : > { %v874_v37 = vpop.permute.xlu0 %873 }
 0x5eb   : > { %v876_v50 = vadd.f32 %v874_v37, %v870_v20 }
 0x5ed   : > { %2747 = vtanh.f32 %v876_v50 }
 0x5f3   : > { %v2748_v39 = vpop.eup %2747 }
 0x5f4   : > { %v878_v12 = vmul.f32 %v2748_v39, %v867_v29 }
 0x5f6   : > { %880 = vrot.lane.b32.xlu1 %v878_v12, %s2954_s9 }
 0x668   : > { %v3452_v15 = vpop.permute.xlu1 %880 }
 0x669   : > { %2606 = vmatmul.msk.f32.vlgmr.msrb.gmra.mxu0 %vm500_vm11, %v3452_v15  ;;  %2607 = vmatmul.msk.f32.vlgmr.msrb.gmra.mxu1 %vm500_vm11, %v3452_v15 }
 0x6e6   : > { %v901_v61 = vpop.f32.mrf.mxu0  ;;  %v921_v22 = vpop.f32.mrf.mxu1 }
 0x6e7   : > { %v924_v16 = vadd.f32 %v901_v61, %v492_v1  ;;  %v925_v24 = vadd.f32 %v921_v22, %v493_v9 }
 0x6e9   : > { %v2608_v17 = vmul.f32 -1.442695, %v924_v16  ;;  %v2609_v2 = vmul.f32 -1.442695, %v925_v24 }
 0x6eb   : > { %2749 = vpow2.f32 %v2608_v17 }
 0x6f1   : > { %v2750_v18 = vpop.eup %2749 }
 0x6f2   : > { %v932_v21 = vadd.f32 1.0, %v2750_v18 }
 0x6f4   : > { %2751 = vrcp.f32 %v932_v21  ;;  %v945_v27 = vand.u32 2147483648, %v932_v21  ;;  %v943_v63 = vand.u32 2147483647, %v932_v21  ;;  %vm939_vm13 = vweird.f32 %v932_v21 }
 0x6f5   : > { %2753 = vtanh.f32 %v925_v24 }
 0x6f6   : > { %v946_v1 = vor.u32 1.1754944e-38, %v945_v27  ;;  %vm944_vm15 = vcmp.eq.f32.partialorder %v943_v63, 8.507059e+37  ;;  %2755 = vpow2.f32 %v2609_v2 }
 0x6fa   : > { %v2752_v23 = vpop.eup %2751 }
 0x6fb   : > { %v935_v25 = vmul.f32 %v2752_v23, %v932_v21  ;;  %vm940_vm12 = vweird.f32 %v2752_v23  ;;  %v2754_v32 = vpop.eup %2753 }
 0x6fc   : > { %vm941_vm14 = vmor %vm939_vm13, %vm940_vm12  ;;  %v2756_v7 = vpop.eup %2755 }
 0x6fd   : > { %v936_v26 = vsub.f32 1.0, %v935_v25  ;;  %v933_v9 = vadd.f32 1.0, %v2756_v7 }
 0x6ff   : > { %v937_v28 = vmul.f32 %v2752_v23, %v936_v26  ;;  %2757 = vrcp.f32 %v933_v9  ;;  %v960_v60 = vand.u32 2147483648, %v933_v9  ;;  %vm954_vm4 = vweird.f32 %v933_v9 }
 0x700   : > { %v958_v20 = vand.u32 2147483647, %v933_v9 }
 0x701   : > { %v938_v36 = vadd.f32 %v2752_v23, %v937_v28  ;;  %v961_v44 = vor.u32 1.1754944e-38, %v960_v60 }
 0x702   : > { %vm959_vm6 = vcmp.eq.f32.partialorder %v958_v20, 8.507059e+37 }
 0x703   : > { %v942_v30 = vsel %vm941_vm14, %v2752_v23, %v938_v36 }
 0x704   : > { %v947_v33 = vsel %vm944_vm15, %v946_v1, %v942_v30 }
 0x705   : > { %v966_v59 = vmul.f32 %v2754_v32, %v947_v33  ;;  %v2758_v10 = vpop.eup %2757  ;;  %v965_v35 = vmul.f32 %v947_v33, %v876_v50  ;;  %v494_v50 = vsel %vm3245_vm1, %v3400_v11, %v3397_v4 }
 0x706   : > { %v950_v0 = vmul.f32 %v2758_v10, %v933_v9  ;;  %vm955_vm3 = vweird.f32 %v2758_v10 }
 0x707   : > { %968 = vrot.lane.b32.xlu2 %v966_v59, %s2954_s9  ;;  %vm956_vm5 = vmor %vm954_vm4, %vm955_vm3 }
 0x708   : > { %v951_v40 = vsub.f32 1.0, %v950_v0 }
 0x70a   : > { %v952_v8 = vmul.f32 %v2758_v10, %v951_v40 }
 0x70c   : > { %v953_v57 = vadd.f32 %v2758_v10, %v952_v8 }
 0x70e   : > { %v957_v37 = vsel %vm956_vm5, %v2758_v10, %v953_v57 }
 0x70f   : > { %v962_v31 = vsel %vm959_vm6, %v961_v44, %v957_v37 }
 0x761   : > { %v969_v14 = vpop.permute.xlu2 %968 }
 0x762   : > { %v971_v47 = vadd.f32 %v969_v14, %v965_v35 }
 0x764   : > { %2759 = vtanh.f32 %v971_v47 }
 0x76a   : > { %v2760_v45 = vpop.eup %2759 }
 0x76b   : > { %v973_v3 = vmul.f32 %v2760_v45, %v962_v31 }
 0x76d   : > { %975 = vrot.lane.b32.xlu0 %v973_v3, %s2954_s9 }
 0x7df   : > { %v3470_v6 = vpop.permute.xlu0 %975 }
 0x7e0   : > { %2610 = vmatmul.msk.f32.vlgmr.msrb.gmra.mxu2 %vm500_vm11, %v3470_v6  ;;  %2611 = vmatmul.msk.f32.vlgmr.msra.gmra.mxu3 %vm500_vm11, %v3470_v6 }
 0x863   : > { %v996_v39 = vpop.f32.mrf.mxu2  ;;  %v1016_v17 = vpop.f32.mrf.mxu3 }
 0x864   : > { %v1019_v29 = vadd.f32 %v996_v39, %v494_v50  ;;  %v1020_v21 = vadd.f32 %v1016_v17, %v495_v19 }
 0x866   : > { %v2612_v12 = vmul.f32 -1.442695, %v1019_v29  ;;  %v2613_v58 = vmul.f32 -1.442695, %v1020_v21 }
 0x868   : > { %2761 = vpow2.f32 %v2612_v12 }
 0x86e   : > { %v2762_v61 = vpop.eup %2761 }
 0x86f   : > { %v1027_v16 = vadd.f32 1.0, %v2762_v61 }
 0x871   : > { %2763 = vrcp.f32 %v1027_v16  ;;  %v1040_v24 = vand.u32 2147483648, %v1027_v16  ;;  %v1038_v11 = vand.u32 2147483647, %v1027_v16  ;;  %vm1034_vm8 = vweird.f32 %v1027_v16 }
 0x872   : > { %2765 = vtanh.f32 %v1020_v21 }
 0x873   : > { %v1041_v26 = vor.u32 1.1754944e-38, %v1040_v24  ;;  %vm1039_vm10 = vcmp.eq.f32.partialorder %v1038_v11, 8.507059e+37  ;;  %2767 = vpow2.f32 %v2613_v58 }
 0x877   : > { %v2764_v18 = vpop.eup %2763 }
 0x878   : > { %v1030_v22 = vmul.f32 %v2764_v18, %v1027_v16  ;;  %vm1035_vm7 = vweird.f32 %v2764_v18  ;;  %v2766_v28 = vpop.eup %2765 }
 0x879   : > { %vm1036_vm9 = vmor %vm1034_vm8, %vm1035_vm7  ;;  %v2768_v13 = vpop.eup %2767 }
 0x87a   : > { %v1031_v23 = vsub.f32 1.0, %v1030_v22  ;;  %v1028_v19 = vadd.f32 1.0, %v2768_v13 }
 0x87c   : > { %v1032_v4 = vmul.f32 %v2764_v18, %v1031_v23  ;;  %2769 = vrcp.f32 %v1028_v19  ;;  %v1055_v10 = vand.u32 2147483648, %v1028_v19  ;;  %vm1049_vm13 = vweird.f32 %v1028_v19 }
 0x87d   : > { %v1053_v0 = vand.u32 2147483647, %v1028_v19 }
 0x87e   : > { %v1033_v25 = vadd.f32 %v2764_v18, %v1032_v4  ;;  %v1056_v8 = vor.u32 1.1754944e-38, %v1055_v10 }
 0x87f   : > { %vm1054_vm15 = vcmp.eq.f32.partialorder %v1053_v0, 8.507059e+37 }
 0x880   : > { %v1037_v27 = vsel %vm1036_vm9, %v2764_v18, %v1033_v25 }
 0x881   : > { %v1042_v63 = vsel %vm1039_vm10, %v1041_v26, %v1037_v27 }
 0x882   : > { %v1061_v36 = vmul.f32 %v2766_v28, %v1042_v63  ;;  %v2770_v1 = vpop.eup %2769  ;;  %v1060_v59 = vmul.f32 %v1042_v63, %v971_v47 }
 0x883   : > { %v1045_v30 = vmul.f32 %v2770_v1, %v1028_v19  ;;  %vm1050_vm12 = vweird.f32 %v2770_v1 }
 0x884   : > { %1063 = vrot.lane.b32.xlu1 %v1061_v36, %s2954_s9  ;;  %vm1051_vm14 = vmor %vm1049_vm13, %vm1050_vm12 }
 0x885   : > { %v1046_v32 = vsub.f32 1.0, %v1045_v30 }
 0x887   : > { %v1047_v33 = vmul.f32 %v2770_v1, %v1046_v32 }
 0x889   : > { %v1048_v9 = vadd.f32 %v2770_v1, %v1047_v33  ;;  %v4387_v33 = vsel %vm3245_vm1, %v3257_v56, %v3254_v55 }
 0x88b   : > { %v1052_v40 = vsel %vm1051_vm14, %v2770_v1, %v1048_v9 }
 0x88c   : > { %v1057_v14 = vsel %vm1054_vm15, %v1056_v8, %v1052_v40  ;;  %v4388_v40 = vsel %vm3272_vm2, %v3308_v43, %v3306_v41 }
 0x8f6   : > { %v1064_v2 = vpop.permute.xlu1 %1063 }
 0x8f7   : > { %v1066_v7 = vadd.f32 %v1064_v2, %v1060_v59 }
 0x8f9   : > { %2771 = vtanh.f32 %v1066_v7 }
 0x8ff   : > { %v2772_v35 = vpop.eup %2771 }
 0x900   : > { %v1068_v57 = vmul.f32 %v2772_v35, %v1057_v14 }
 0x902   : > { %1070 = vrot.lane.b32.xlu2 %v1068_v57, %s2954_s9 }
 0x95c   : > { %v3487_v60 = vpop.permute.xlu2 %1070 }
 0x95d   : > { %2614 = vmatmul.msk.f32.vlgmr.msra.gmra.mxu0 %vm500_vm11, %v3487_v60  ;;  %2615 = vmatmul.msk.f32.vlgmr.msra.gmra.mxu1 %vm500_vm11, %v3487_v60 }
 0x9da   : > { %v1091_v47 = vpop.f32.mrf.mxu0  ;;  %v1111_v31 = vpop.f32.mrf.mxu1 }
 0x9db   : > { %v1114_v20 = vadd.f32 %v1091_v47, %v496_v53  ;;  %v1115_v50 = vadd.f32 %v1111_v31, %v497_v38 }
 0x9dd   : > { %v2616_v37 = vmul.f32 -1.442695, %v1114_v20  ;;  %v2617_v49 = vmul.f32 -1.442695, %v1115_v50 }
 0x9df   : > { %2773 = vpow2.f32 %v2616_v37 }
 0x9e5   : > { %v2774_v44 = vpop.eup %2773 }
 0x9e6   : > { %v1122_v45 = vadd.f32 1.0, %v2774_v44 }
 0x9e8   : > { %2775 = vrcp.f32 %v1122_v45  ;;  %v1135_v12 = vand.u32 2147483648, %v1122_v45  ;;  %v1133_v48 = vand.u32 2147483647, %v1122_v45  ;;  %vm1129_vm4 = vweird.f32 %v1122_v45 }
 0x9e9   : > { %2777 = vtanh.f32 %v1115_v50  ;;  %v342_v50 = vld [vmem:[%s4378_s2 + $0x120] sm:$0xff] }
 0x9ea   : > { %v1136_v53 = vor.u32 1.1754944e-38, %v1135_v12  ;;  %vm1134_vm6 = vcmp.eq.f32.partialorder %v1133_v48, 8.507059e+37  ;;  %2779 = vpow2.f32 %v2617_v49  ;;  %1312 = vmatpush.msrb.mxu0 %v342_v50  ;;  %v341_v12 = vld [vmem:[%s4378_s2 + $0x118] sm:$0xff]  ;;  %v339_v48 = vld [vmem:[%s4378_s2 + $0x108] sm:$0xff] }
 0x9eb   : > { %v333_v49 = vld [vmem:[%s4378_s2 + $0xd8] sm:$0xff] }
 0x9ec   : > { %v361_v50 = vld [vmem:[%s4378_s2 + $0x1b8] sm:$0xff] }
 0x9ee   : > { %v2776_v3 = vpop.eup %2775 }
 0x9ef   : > { %v1125_v39 = vmul.f32 %v2776_v3, %v1122_v45  ;;  %vm1130_vm3 = vweird.f32 %v2776_v3  ;;  %v2778_v17 = vpop.eup %2777 }
 0x9f0   : > { %vm1131_vm5 = vmor %vm1129_vm4, %vm1130_vm3  ;;  %v2780_v34 = vpop.eup %2779 }
 0x9f1   : > { %v1126_v29 = vsub.f32 1.0, %v1125_v39  ;;  %v1123_v38 = vadd.f32 1.0, %v2780_v34  ;;  %v343_v39 = vld [vmem:[%s4378_s2 + $0x128] sm:$0xff] }
 0x9f2   : > { %1353 = vmatpush.msrb.mxu1 %v343_v39 }
 0x9f3   : > { %v1127_v61 = vmul.f32 %v2776_v3, %v1126_v29  ;;  %2781 = vrcp.f32 %v1123_v38  ;;  %v1150_v28 = vand.u32 2147483648, %v1123_v38  ;;  %vm1144_vm8 = vweird.f32 %v1123_v38  ;;  %v340_v29 = vld [vmem:[%s4378_s2 + $0x110] sm:$0xff] }
 0x9f4   : > { %v1148_v63 = vand.u32 2147483647, %v1123_v38  ;;  %1313 = vmatpush.msrb.mxu0 %v340_v29  ;;  %1354 = vmatpush.msrb.mxu1 %v341_v12  ;;  %v1279_v29 = vperm.slane %v361_v50, 0 }
 0x9f5   : > { %v1128_v51 = vadd.f32 %v2776_v3, %v1127_v61  ;;  %v1151_v58 = vor.u32 1.1754944e-38, %v1150_v28  ;;  %v338_v61 = vld [vmem:[%s4378_s2 + $0x100] sm:$0xff] }
 0x9f6   : > { %vm1149_vm10 = vcmp.eq.f32.partialorder %v1148_v63, 8.507059e+37  ;;  %1314 = vmatpush.msrb.mxu0 %v338_v61  ;;  %1355 = vmatpush.msrb.mxu1 %v339_v48 }
 0x9f7   : > { %v1132_v16 = vsel %vm1131_vm5, %v2776_v3, %v1128_v51  ;;  %v336_v51 = vld [vmem:[%s4378_s2 + $0xf0] sm:$0xff] }
 0x9f8   : > { %v1137_v18 = vsel %vm1134_vm6, %v1136_v53, %v1132_v16  ;;  %v337_v53 = vld [vmem:[%s4378_s2 + $0xf8] sm:$0xff]  ;;  %v334_v16 = vld [vmem:[%s4378_s2 + $0xe0] sm:$0xff]  ;;  %1315 = vmatpush.msrb.mxu0 %v336_v51 }
 0x9f9   : > { %v1156_v21 = vmul.f32 %v2778_v17, %v1137_v18  ;;  %v2782_v22 = vpop.eup %2781  ;;  %v1155_v11 = vmul.f32 %v1137_v18, %v1066_v7  ;;  %v335_v17 = vld [vmem:[%s4378_s2 + $0xe8] sm:$0xff]  ;;  %1356 = vmatpush.msrb.mxu1 %v337_v53 }
 0x9fa   : > { %v1140_v23 = vmul.f32 %v2782_v22, %v1123_v38  ;;  %vm1145_vm7 = vweird.f32 %v2782_v22  ;;  %1316 = vmatpush.msrb.mxu0 %v334_v16  ;;  %v330_v38 = vld [vmem:[%s4378_s2 + $0xc0] sm:$0xff] }
 0x9fb   : > { %1158 = vrot.lane.b32.xlu0 %v1156_v21, %s2954_s9  ;;  %vm1146_vm9 = vmor %vm1144_vm8, %vm1145_vm7  ;;  %v332_v21 = vld [vmem:[%s4378_s2 + $0xd0] sm:$0xff]  ;;  %1357 = vmatpush.msrb.mxu1 %v335_v17 }
 0x9fc   : > { %v1141_v24 = vsub.f32 1.0, %v1140_v23  ;;  %1317 = vmatpush.msrb.mxu0 %v332_v21 }
 0x9fd   : > { %1358 = vmatpush.msrb.mxu1 %v333_v49 }
 0x9fe   : > { %v1142_v4 = vmul.f32 %v2782_v22, %v1141_v24  ;;  %1318 = vmatpush.msrb.mxu0 %v330_v38 }
 0xa00   : > { %v1143_v27 = vadd.f32 %v2782_v22, %v1142_v4 }
 0xa02   : > { %v1147_v36 = vsel %vm1146_vm9, %v2782_v22, %v1143_v27  ;;  %v331_v22 = vld [vmem:[%s4378_s2 + $0xc8] sm:$0xff] }
 0xa03   : > { %v1152_v19 = vsel %vm1149_vm10, %v1151_v58, %v1147_v36  ;;  %1359 = vmatpush.msrb.mxu1 %v331_v22 }
 0xa6d   : > { %v1159_v25 = vpop.permute.xlu0 %1158 }
 0xa6e   : > { %v3504_v26 = vadd.f32 %v1159_v25, %v1155_v11 }
 0xa70   : > { %2783 = vtanh.f32 %v3504_v26 }
 0xa76   : > { %v2784_v13 = vpop.eup %2783 }
 0xa77   : > { %v1163_v1 = vmul.f32 %v2784_v13, %v1152_v19 }
 0xa79   : > { %1165 = vrot.lane.b32.xlu1 %v1163_v1, %s2954_s9 }
 0xaeb   : > { %v3508_v30 = vpop.permute.xlu1 %1165 }
 0xaec   : > { %2618 = vmatmul.msk.f32.vlgmr.msra.gmra.mxu2 %vm500_vm11, %v3508_v30  ;;  %2619 = vmatmul.msk.f32.vlgmr.msrb.gmra.mxu3 %vm500_vm11, %v3508_v30 }
 0xb6f   : > { %v1186_v32 = vpop.f32.mrf.mxu2  ;;  %v1206_v10 = vpop.f32.mrf.mxu3 }
 0xb70   : > { %v1209_v59 = vadd.f32 %v1186_v32, %v4387_v33  ;;  %v1210_v8 = vadd.f32 %v1206_v10, %v4388_v40  ;;  %v329_v32 = vld [vmem:[%s4378_s2 + $0xb8] sm:$0xff]  ;;  %v3606_v10 = vld [vmem:[%s4378_s2 + $0x190] sm:$0xff]  ;;  %v3616_v40 = vld [vmem:[%s4378_s2 + $0x180] sm:$0xff] }
 0xb71   : > { %1360 = vmatpush.msrb.mxu1 %v329_v32 }
 0xb72   : > { %v2620_v2 = vmul.f32 -1.442695, %v1209_v59  ;;  %v2621_v41 = vmul.f32 -1.442695, %v1210_v8 }
 0xb74   : > { %2785 = vpow2.f32 %v2620_v2  ;;  %v3586_v2 = vld [vmem:[%s4378_s2 + $0x1a0] sm:$0xff] }
 0xb75   : > { %1410 = vmatpush.msrb.mxu2 %v3586_v2 }
 0xb77   : > { %1411 = vmatpush.msrb.mxu2 %v3606_v10 }
 0xb79   : > { %1412 = vmatpush.msrb.mxu2 %v3616_v40 }
 0xb7a   : > { %v2786_v7 = vpop.eup %2785 }
 0xb7b   : > { %v1217_v9 = vadd.f32 1.0, %v2786_v7  ;;  %v3591_v7 = vld [vmem:[%s4378_s2 + $0x1a8] sm:$0xff] }
 0xb7c   : > { %1430 = vmatpush.msra.mxu3 %v3591_v7  ;;  %1810 = vmatpush.msra.mxu1 %v3591_v7 }
 0xb7d   : > { %2787 = vrcp.f32 %v1217_v9  ;;  %v1230_v57 = vand.u32 2147483648, %v1217_v9  ;;  %v1228_v55 = vand.u32 2147483647, %v1217_v9  ;;  %vm1224_vm13 = vweird.f32 %v1217_v9 }
 0xb7e   : > { %2789 = vtanh.f32 %v1210_v8  ;;  %v3623_v8 = vld [vmem:[%s4378_s2 + $0x188] sm:$0xff] }
 0xb7f   : > { %v1231_v20 = vor.u32 1.1754944e-38, %v1230_v57  ;;  %vm1229_vm15 = vcmp.eq.f32.partialorder %v1228_v55, 8.507059e+37  ;;  %2791 = vpow2.f32 %v2621_v41  ;;  %v3642_v57 = vld [vmem:[%s4378_s2 + $0x160] sm:$0xff]  ;;  %v1270_v55 = vsel %vm3245_vm1, %v3417_v54, %v3487_v60 }
 0xb80   : > { %v4389_v41 = vmov 0.0  }
 0xb83   : > { %v2788_v0 = vpop.eup %2787 }
 0xb84   : > { %v1220_v35 = vmul.f32 %v2788_v0, %v1217_v9  ;;  %vm1225_vm12 = vweird.f32 %v2788_v0  ;;  %v2790_v44 = vpop.eup %2789  ;;  %v1267_v9 = vsel %vm3245_vm1, %v3360_v46, %v3508_v30 }
 0xb85   : > { %vm1226_vm14 = vmor %vm1224_vm13, %vm1225_vm12  ;;  %v2792_v43 = vpop.eup %2791 }
 0xb86   : > { %v1221_v14 = vsub.f32 1.0, %v1220_v35  ;;  %v1218_v3 = vadd.f32 1.0, %v2792_v43  ;;  %v3628_v35 = vld [vmem:[%s4378_s2 + $0x170] sm:$0xff]  ;;  %v1273_v43 = vsel %vm3245_vm1, %v3452_v15, %v3470_v6 }
 0xb87   : > { %1413 = vmatpush.msrb.mxu2 %v3628_v35 }
 0xb88   : > { %v1222_v47 = vmul.f32 %v2788_v0, %v1221_v14  ;;  %2793 = vrcp.f32 %v1218_v3  ;;  %v1245_v28 = vand.u32 2147483648, %v1218_v3  ;;  %vm1239_vm4 = vweird.f32 %v1218_v3  ;;  %v3633_v14 = vld [vmem:[%s4378_s2 + $0x178] sm:$0xff] }
 0xb89   : > { %v1243_v63 = vand.u32 2147483647, %v1218_v3  ;;  %1414 = vmatpush.msrb.mxu2 %v3642_v57 }
 0xb8a   : > { %v1223_v56 = vadd.f32 %v2788_v0, %v1222_v47  ;;  %v1246_v58 = vor.u32 1.1754944e-38, %v1245_v28  ;;  %v3647_v47 = vld [vmem:[%s4378_s2 + $0x168] sm:$0xff] }
 0xb8b   : > { %vm1244_vm6 = vcmp.eq.f32.partialorder %v1243_v63, 8.507059e+37 }
 0xb8c   : > { %v1227_v37 = vsel %vm1226_vm14, %v2788_v0, %v1223_v56  ;;  %v3611_v0 = vld [vmem:[%s4378_s2 + $0x198] sm:$0xff]  ;;  %v3666_v56 = vld [vmem:[%s4378_s2 + $0x150] sm:$0xff] }
 0xb8d   : > { %v1232_v45 = vsel %vm1229_vm15, %v1231_v20, %v1227_v37  ;;  %1431 = vmatpush.msra.mxu3 %v3611_v0  ;;  %1811 = vmatpush.msra.mxu1 %v3611_v0  ;;  %v3671_v20 = vld [vmem:[%s4378_s2 + $0x158] sm:$0xff]  ;;  %v3676_v37 = vld [vmem:[%s4378_s2 + $0x140] sm:$0xff] }
 0xb8e   : > { %v1251_v31 = vmul.f32 %v2790_v44, %v1232_v45  ;;  %v2794_v18 = vpop.eup %2793  ;;  %v1250_v4 = vmul.f32 %v1232_v45, %v3504_v26  ;;  %v328_v26 = vld [vmem:[%s4378_s2 + $0xb0] sm:$0xff]  ;;  %1415 = vmatpush.msrb.mxu2 %v3666_v56  ;;  %v3683_v44 = vld [vmem:[%s4378_s2 + $0x148] sm:$0xff] }
 0xb8f   : > { %v1235_v34 = vmul.f32 %v2794_v18, %v1218_v3  ;;  %vm1240_vm3 = vweird.f32 %v2794_v18  ;;  %1319 = vmatpush.msrb.mxu0 %v328_v26  ;;  %1432 = vmatpush.msra.mxu3 %v3623_v8  ;;  %v3688_v45 = vld [vmem:[%s4378_s2 + $0x130] sm:$0xff]  ;;  %v1274_v3 = vsel %vm3245_vm1, %v3470_v6, %v3452_v15  ;;  %v1275_v15 = vsel %vm3245_vm1, %v3487_v60, %v3417_v54 }
 0xb90   : > { %1253 = vrot.lane.b32.xlu2 %v1251_v31, %s2954_s9  ;;  %vm1241_vm5 = vmor %vm1239_vm4, %vm1240_vm3  ;;  %1812 = vmatpush.msra.mxu1 %v3623_v8  ;;  %v3693_v31 = vld [vmem:[%s4378_s2 + $0x138] sm:$0xff]  ;;  %v1276_v54 = vsel %vm3245_vm1, %v3508_v30, %v3360_v46  ;;  %v360_v30 = vld [vmem:[%s4378_s2 + $0x1b0] sm:$0xff] }
 0xb91   : > { %v1236_v23 = vsub.f32 1.0, %v1235_v34  ;;  %1790 = vmatpush.msra.mxu0 %v3586_v2  ;;  %1433 = vmatpush.msra.mxu3 %v3633_v14  ;;  %v1278_v39 = vperm.slane %v360_v30, 0 }
 0xb92   : > { %1813 = vmatpush.msra.mxu1 %v3633_v14  ;;  %1416 = vmatpush.msrb.mxu2 %v3676_v37 }
 0xb93   : > { %v1237_v24 = vmul.f32 %v2794_v18, %v1236_v23  ;;  %1791 = vmatpush.msra.mxu0 %v3606_v10  ;;  %1434 = vmatpush.msra.mxu3 %v3647_v47 }
 0xb94   : > { %1814 = vmatpush.msra.mxu1 %v3647_v47  ;;  %1417 = vmatpush.msrb.mxu2 %v3688_v45 }
 0xb95   : > { %v1238_v27 = vadd.f32 %v2794_v18, %v1237_v24  ;;  %1792 = vmatpush.msra.mxu0 %v3616_v40  ;;  %1435 = vmatpush.msra.mxu3 %v3671_v20 }
 0xb96   : > { %1815 = vmatpush.msra.mxu1 %v3671_v20  ;;  %1418 = vmatmul.f32.vlgmr.msrb.gmra.mxu2 %v4389_v41 }
 0xb97   : > { %v1242_v36 = vsel %vm1241_vm5, %v2794_v18, %v1238_v27  ;;  %1793 = vmatpush.msra.mxu0 %v3628_v35  ;;  %1436 = vmatpush.msra.mxu3 %v3683_v44 }
 0xb98   : > { %v1247_v19 = vsel %vm1244_vm6, %v1246_v58, %v1242_v36  ;;  %1505 = vmatpush.msra.mxu2 %v3586_v2  ;;  %1816 = vmatpush.msra.mxu1 %v3683_v44 }
 0xb99   : > { %1794 = vmatpush.msra.mxu0 %v3642_v57  ;;  %1437 = vmatpush.msra.mxu3 %v3693_v31 }
 0xb9a   : > { %1438 = vmatmul.f32.vlgmr.msra.gmra.mxu3 %v4389_v41  ;;  %1506 = vmatpush.msra.mxu2 %v3606_v10 }
 0xb9b   : > { %1795 = vmatpush.msra.mxu0 %v3666_v56  ;;  %1525 = vmatpush.msrb.mxu3 %v3591_v7 }
 0xb9c   : > { %1507 = vmatpush.msra.mxu2 %v3616_v40  ;;  %1817 = vmatpush.msra.mxu1 %v3693_v31 }
 0xb9d   : > { %1526 = vmatpush.msrb.mxu3 %v3611_v0  ;;  %1796 = vmatpush.msra.mxu0 %v3676_v37 }
 0xb9e   : > { %1508 = vmatpush.msra.mxu2 %v3628_v35 }
 0xb9f   : > { %1527 = vmatpush.msrb.mxu3 %v3623_v8  ;;  %1797 = vmatpush.msra.mxu0 %v3688_v45 }
 0xba0   : > { %1509 = vmatpush.msra.mxu2 %v3642_v57 }
 0xba1   : > { %1528 = vmatpush.msrb.mxu3 %v3633_v14 }
 0xba2   : > { %1510 = vmatpush.msra.mxu2 %v3666_v56 }
 0xba3   : > { %1529 = vmatpush.msrb.mxu3 %v3647_v47 }
 0xba4   : > { %1511 = vmatpush.msra.mxu2 %v3676_v37 }
 0xba5   : > { %1530 = vmatpush.msrb.mxu3 %v3671_v20 }
 0xba6   : > { %1512 = vmatpush.msra.mxu2 %v3688_v45 }
 0xba7   : > { %1531 = vmatpush.msrb.mxu3 %v3683_v44 }
 0xba8   : > { %1600 = vmatpush.msrb.mxu2 %v3586_v2 }
 0xba9   : > { %1532 = vmatpush.msrb.mxu3 %v3693_v31 }
 0xbaa   : > { %1601 = vmatpush.msrb.mxu2 %v3606_v10 }
 0xbab   : > { %1620 = vmatpush.msra.mxu3 %v3591_v7 }
 0xbac   : > { %1602 = vmatpush.msrb.mxu2 %v3616_v40 }
 0xbad   : > { %1621 = vmatpush.msra.mxu3 %v3611_v0 }
 0xbae   : > { %1603 = vmatpush.msrb.mxu2 %v3628_v35 }
 0xbaf   : > { %1622 = vmatpush.msra.mxu3 %v3623_v8 }
 0xbb0   : > { %1604 = vmatpush.msrb.mxu2 %v3642_v57 }
 0xbb1   : > { %1623 = vmatpush.msra.mxu3 %v3633_v14 }
 0xbb2   : > { %1605 = vmatpush.msrb.mxu2 %v3666_v56 }
 0xbb3   : > { %1624 = vmatpush.msra.mxu3 %v3647_v47 }
 0xbb4   : > { %1606 = vmatpush.msrb.mxu2 %v3676_v37 }
 0xbb5   : > { %1625 = vmatpush.msra.mxu3 %v3671_v20 }
 0xbb6   : > { %1607 = vmatpush.msrb.mxu2 %v3688_v45 }
 0xbb7   : > { %1626 = vmatpush.msra.mxu3 %v3683_v44 }
 0xbb9   : > { %1627 = vmatpush.msra.mxu3 %v3693_v31 }
 0xbea   : > { %v1254_v11 = vpop.permute.xlu2 %1253 }
 0xbeb   : > { %v1256_v25 = vadd.f32 %v1254_v11, %v1250_v4 }
 0xbed   : > { %2795 = vtanh.f32 %v1256_v25 }
 0xbf3   : > { %v2796_v13 = vpop.eup %2795 }
 0xbf4   : > { %v1258_v1 = vmul.f32 %v2796_v13, %v1247_v19 }
 0xbf6   : > { %1261 = vrot.lane.b32.xlu0 %v1258_v1, %s2954_s9 }
 0xc68   : > { %v3575_v33 = vpop.permute.xlu0 %1261 }
 0xc69   : > { %v1264_v59 = vsel %vm3245_vm1, %v3323_v62, %v3575_v33  ;;  %v1277_v46 = vsel %vm3245_vm1, %v3575_v33, %v3323_v62 }
 0xc6a   : > { %2622 = vmatmul.msk.f32.vlgmr.msrb.gmra.mxu0 %vm500_vm11, %v1264_v59  ;;  %2630 = vmatmul.msk.f32.vlgmr.msrb.gmra.mxu1 %vm500_vm11, %v1264_v59 }
 0xc6b   : > { %1980 = vmatpush.msrb.mxu0 %v3586_v2  ;;  %2000 = vmatpush.msrb.mxu1 %v3591_v7 }
 0xc6d   : > { %1981 = vmatpush.msrb.mxu0 %v3606_v10  ;;  %2001 = vmatpush.msrb.mxu1 %v3611_v0 }
 0xc6f   : > { %1982 = vmatpush.msrb.mxu0 %v3616_v40  ;;  %2002 = vmatpush.msrb.mxu1 %v3623_v8 }
 0xc71   : > { %1983 = vmatpush.msrb.mxu0 %v3628_v35  ;;  %2003 = vmatpush.msrb.mxu1 %v3633_v14 }
 0xc72   : > { %2623 = vmatmul.msk.f32.gmra.mxu0 %vm500_vm11, %v1267_v9  ;;  %2631 = vmatmul.msk.f32.gmra.mxu1 %vm500_vm11, %v1267_v9 }
 0xc73   : > { %1984 = vmatpush.msrb.mxu0 %v3642_v57  ;;  %2004 = vmatpush.msrb.mxu1 %v3647_v47 }
 0xc75   : > { %1985 = vmatpush.msrb.mxu0 %v3666_v56  ;;  %2005 = vmatpush.msrb.mxu1 %v3671_v20 }
 0xc77   : > { %1986 = vmatpush.msrb.mxu0 %v3676_v37  ;;  %2006 = vmatpush.msrb.mxu1 %v3683_v44 }
 0xc79   : > { %1987 = vmatpush.msrb.mxu0 %v3688_v45  ;;  %2007 = vmatpush.msrb.mxu1 %v3693_v31 }
 0xc7a   : > { %2624 = vmatmul.msk.f32.gmra.mxu0 %vm500_vm11, %v1270_v55  ;;  %2632 = vmatmul.msk.f32.gmra.mxu1 %vm500_vm11, %v1270_v55 }
 0xc82   : > { %2625 = vmatmul.msk.f32.gmra.mxu0 %vm500_vm11, %v1273_v43  ;;  %2633 = vmatmul.msk.f32.gmra.mxu1 %vm500_vm11, %v1273_v43 }
 0xc8a   : > { %2626 = vmatmul.msk.f32.gmra.mxu0 %vm500_vm11, %v1274_v3  ;;  %2634 = vmatmul.msk.f32.gmra.mxu1 %vm500_vm11, %v1274_v3 }
 0xc92   : > { %2627 = vmatmul.msk.f32.gmra.mxu0 %vm500_vm11, %v1275_v15  ;;  %2635 = vmatmul.msk.f32.gmra.mxu1 %vm500_vm11, %v1275_v15 }
 0xc9a   : > { %2628 = vmatmul.msk.f32.gmra.mxu0 %vm500_vm11, %v1276_v54  ;;  %2636 = vmatmul.msk.f32.gmra.mxu1 %vm500_vm11, %v1276_v54 }
 0xca2   : > { %2629 = vmatmul.msk.f32.gmra.mxu0 %vm500_vm11, %v1277_v46  ;;  %2637 = vmatmul.msk.f32.gmra.mxu1 %vm500_vm11, %v1277_v46 }
 0xce7   : > { %v1321_v6 = vpop.f32.mrf.mxu0  ;;  %v1362_v60 = vpop.f32.mrf.mxu1 }
 0xce8   : > { %v3865_v46 = vadd.f32 %v1321_v6, %v1278_v39  ;;  %v3867_v30 = vadd.f32 %v1362_v60, %v1279_v29 }
 0xcef   : > { %v1324_v12 = vpop.f32.mrf.mxu0  ;;  %v1365_v61 = vpop.f32.mrf.mxu1 }
 0xcf0   : > { %v3793_v48 = vadd.f32 %v1324_v12, %v1278_v39  ;;  %v3795_v62 = vadd.f32 %v1365_v61, %v1279_v29  ;;  %v1419_v61 = vpop.f32.mrf.mxu2 }
 0xcf7   : > { %v1327_v51 = vpop.f32.mrf.mxu0  ;;  %v1368_v53 = vpop.f32.mrf.mxu1 }
 0xcf8   : > { %v3797_v16 = vadd.f32 %v1327_v51, %v1278_v39  ;;  %v3799_v17 = vadd.f32 %v1368_v53, %v1279_v29 }
 0xcff   : > { %v1330_v18 = vpop.f32.mrf.mxu0  ;;  %v1371_v21 = vpop.f32.mrf.mxu1 }
 0xd00   : > { %v3801_v49 = vadd.f32 %v1330_v18, %v1278_v39  ;;  %v3803_v34 = vadd.f32 %v1371_v21, %v1279_v29 }
 0xd07   : > { %v1333_v38 = vpop.f32.mrf.mxu0  ;;  %v1374_v22 = vpop.f32.mrf.mxu1 }
 0xd08   : > { %v3805_v23 = vadd.f32 %v1333_v38, %v1278_v39  ;;  %v3807_v24 = vadd.f32 %v1374_v22, %v1279_v29  ;;  %v1439_v38 = vpop.f32.mrf.mxu3 }
 0xd0a   : > { %v1392_v4 = vsel %vm3245_vm1, %v3801_v49, %v3805_v23  ;;  %v1393_v11 = vsel %vm3272_vm2, %v3803_v34, %v3807_v24  ;;  %v1394_v25 = vsel %vm3245_vm1, %v3805_v23, %v3801_v49  ;;  %v1395_v27 = vsel %vm3272_vm2, %v3807_v24, %v3803_v34 }
 0xd0f   : > { %v1336_v28 = vpop.f32.mrf.mxu0  ;;  %v1377_v63 = vpop.f32.mrf.mxu1 }
 0xd10   : > { %v3825_v36 = vadd.f32 %v1336_v28, %v1278_v39  ;;  %v3827_v58 = vadd.f32 %v1377_v63, %v1279_v29 }
 0xd12   : > { %v1390_v13 = vsel %vm3245_vm1, %v3797_v16, %v3825_v36  ;;  %v1391_v19 = vsel %vm3272_vm2, %v3799_v17, %v3827_v58  ;;  %v1396_v1 = vsel %vm3245_vm1, %v3825_v36, %v3797_v16 }
 0xd17   : > { %v1339_v32 = vpop.f32.mrf.mxu0  ;;  %v1380_v33 = vpop.f32.mrf.mxu1 }
 0xd18   : > { %v3845_v59 = vadd.f32 %v1339_v32, %v1278_v39  ;;  %v3847_v9 = vadd.f32 %v1380_v33, %v1279_v29 }
 0xd1a   : > { %v1388_v55 = vsel %vm3245_vm1, %v3793_v48, %v3845_v59  ;;  %v1389_v41 = vsel %vm3272_vm2, %v3795_v62, %v3847_v9 }
 0xd1f   : > { %v1342_v15 = vpop.f32.mrf.mxu0  ;;  %v1383_v54 = vpop.f32.mrf.mxu1 }
 0xd20   : > { %v3869_v50 = vadd.f32 %v1342_v15, %v1278_v39  ;;  %v3871_v12 = vadd.f32 %v1383_v54, %v1279_v29 }
 0xd22   : > { %v1386_v51 = vsel %vm3245_vm1, %v3865_v46, %v3869_v50  ;;  %v1387_v21 = vsel %vm3272_vm2, %v3867_v30, %v3871_v12 }
 0xd23   : > { %v1442_v60 = vadd.f32 %v1419_v61, %v1386_v51  ;;  %v1443_v28 = vadd.f32 %v1439_v38, %v1387_v21 }
 0xd25   : > { %v2638_v39 = vmul.f32 -1.442695, %v1442_v60  ;;  %v2639_v53 = vmul.f32 -1.442695, %v1443_v28 }
 0xd27   : > { %2797 = vpow2.f32 %v2638_v39 }
 0xd2d   : > { %v2798_v29 = vpop.eup %2797 }
 0xd2e   : > { %v1450_v18 = vadd.f32 1.0, %v2798_v29 }
 0xd30   : > { %2799 = vrcp.f32 %v1450_v18  ;;  %v1463_v33 = vand.u32 2147483648, %v1450_v18  ;;  %v1461_v54 = vand.u32 2147483647, %v1450_v18  ;;  %vm1457_vm8 = vweird.f32 %v1450_v18 }
 0xd31   : > { %2801 = vtanh.f32 %v1443_v28 }
 0xd32   : > { %v1464_v51 = vor.u32 1.1754944e-38, %v1463_v33  ;;  %vm1462_vm10 = vcmp.eq.f32.partialorder %v1461_v54, 8.507059e+37  ;;  %2803 = vpow2.f32 %v2639_v53 }
 0xd36   : > { %v2800_v22 = vpop.eup %2799 }
 0xd37   : > { %v1453_v63 = vmul.f32 %v2800_v22, %v1450_v18  ;;  %vm1458_vm7 = vweird.f32 %v2800_v22  ;;  %v2802_v39 = vpop.eup %2801 }
 0xd38   : > { %vm1459_vm9 = vmor %vm1457_vm8, %vm1458_vm7  ;;  %v2804_v21 = vpop.eup %2803 }
 0xd39   : > { %v1454_v32 = vsub.f32 1.0, %v1453_v63  ;;  %v1451_v38 = vadd.f32 1.0, %v2804_v21 }
 0xd3b   : > { %v1455_v15 = vmul.f32 %v2800_v22, %v1454_v32  ;;  %2805 = vrcp.f32 %v1451_v38  ;;  %v1478_v33 = vand.u32 2147483648, %v1451_v38  ;;  %vm1472_vm13 = vweird.f32 %v1451_v38 }
 0xd3d   : > { %v1456_v61 = vadd.f32 %v2800_v22, %v1455_v15  ;;  %v1479_v28 = vor.u32 1.1754944e-38, %v1478_v33 }
 0xd3f   : > { %v1460_v60 = vsel %vm1459_vm9, %v2800_v22, %v1456_v61 }
 0xd40   : > { %v1465_v29 = vsel %vm1462_vm10, %v1464_v51, %v1460_v60 }
 0xd41   : > { %v1484_v6 = vmul.f32 %v2802_v39, %v1465_v29  ;;  %v2806_v63 = vpop.eup %2805  ;;  %v1483_v15 = vmul.f32 0.0, %v1465_v29 }
 0xd42   : > { %v1468_v32 = vmul.f32 %v2806_v63, %v1451_v38  ;;  %vm1473_vm12 = vweird.f32 %v2806_v63 }
 0xd43   : > { %1486 = vrot.lane.b32.xlu1 %v1484_v6, %s2954_s9  ;;  %v1476_v6 = vand.u32 2147483647, %v1451_v38  ;;  %vm1474_vm14 = vmor %vm1472_vm13, %vm1473_vm12 }
 0xd44   : > { %v1469_v3 = vsub.f32 1.0, %v1468_v32 }
 0xd45   : > { %vm1477_vm15 = vcmp.eq.f32.partialorder %v1476_v6, 8.507059e+37 }
 0xd46   : > { %v1470_v43 = vmul.f32 %v2806_v63, %v1469_v3 }
 0xd48   : > { %v1471_v22 = vadd.f32 %v2806_v63, %v1470_v43 }
 0xd4a   : > { %v1475_v53 = vsel %vm1474_vm14, %v2806_v63, %v1471_v22 }
 0xd4b   : > { %v1480_v61 = vsel %vm1477_vm15, %v1479_v28, %v1475_v53 }
 0xdb5   : > { %v1487_v18 = vpop.permute.xlu1 %1486 }
 0xdb6   : > { %v3890_v26 = vadd.f32 %v1487_v18, %v1483_v15 }
 0xdb8   : > { %2807 = vtanh.f32 %v3890_v26 }
 0xdbe   : > { %v2808_v54 = vpop.eup %2807 }
 0xdbf   : > { %v1491_v51 = vmul.f32 %v2808_v54, %v1480_v61 }
 0xdc1   : > { %1493 = vrot.lane.b32.xlu2 %v1491_v51, %s2954_s9 }
 0xe1b   : > { %v3894_v3 = vpop.permute.xlu2 %1493 }
 0xe1c   : > { %2640 = vmatmul.msk.f32.vlgmr.msra.gmra.mxu2 %vm500_vm11, %v3894_v3  ;;  %2641 = vmatmul.msk.f32.vlgmr.msrb.gmra.mxu3 %vm500_vm11, %v3894_v3 }
 0xe1d   : > { %1695 = vmatpush.msra.mxu2 %v3586_v2  ;;  %1715 = vmatpush.msrb.mxu3 %v3591_v7 }
 0xe1f   : > { %1696 = vmatpush.msra.mxu2 %v3606_v10  ;;  %1716 = vmatpush.msrb.mxu3 %v3611_v0 }
 0xe21   : > { %1697 = vmatpush.msra.mxu2 %v3616_v40  ;;  %1717 = vmatpush.msrb.mxu3 %v3623_v8 }
 0xe23   : > { %1698 = vmatpush.msra.mxu2 %v3628_v35  ;;  %1718 = vmatpush.msrb.mxu3 %v3633_v14 }
 0xe25   : > { %1699 = vmatpush.msra.mxu2 %v3642_v57  ;;  %1719 = vmatpush.msrb.mxu3 %v3647_v47 }
 0xe27   : > { %1700 = vmatpush.msra.mxu2 %v3666_v56  ;;  %1720 = vmatpush.msrb.mxu3 %v3671_v20 }
 0xe29   : > { %1701 = vmatpush.msra.mxu2 %v3676_v37  ;;  %1721 = vmatpush.msrb.mxu3 %v3683_v44 }
 0xe2b   : > { %1702 = vmatpush.msra.mxu2 %v3688_v45  ;;  %1722 = vmatpush.msrb.mxu3 %v3693_v31 }
 0xe9f   : > { %v1514_v43 = vpop.f32.mrf.mxu2  ;;  %v1534_v38 = vpop.f32.mrf.mxu3 }
 0xea0   : > { %v1537_v60 = vadd.f32 %v1514_v43, %v1388_v55  ;;  %v1538_v32 = vadd.f32 %v1534_v38, %v1389_v41 }
 0xea2   : > { %v2642_v39 = vmul.f32 -1.442695, %v1537_v60  ;;  %v2643_v43 = vmul.f32 -1.442695, %v1538_v32 }
 0xea4   : > { %2809 = vpow2.f32 %v2642_v39 }
 0xeaa   : > { %v2810_v29 = vpop.eup %2809 }
 0xeab   : > { %v1545_v21 = vadd.f32 1.0, %v2810_v29 }
 0xead   : > { %2811 = vrcp.f32 %v1545_v21  ;;  %v1558_v22 = vand.u32 2147483648, %v1545_v21  ;;  %v1556_v55 = vand.u32 2147483647, %v1545_v21  ;;  %vm1552_vm4 = vweird.f32 %v1545_v21 }
 0xeae   : > { %2813 = vtanh.f32 %v1538_v32 }
 0xeaf   : > { %v1559_v53 = vor.u32 1.1754944e-38, %v1558_v22  ;;  %vm1557_vm6 = vcmp.eq.f32.partialorder %v1556_v55, 8.507059e+37  ;;  %2815 = vpow2.f32 %v2643_v43 }
 0xeb3   : > { %v2812_v63 = vpop.eup %2811 }
 0xeb4   : > { %v1548_v15 = vmul.f32 %v2812_v63, %v1545_v21  ;;  %vm1553_vm3 = vweird.f32 %v2812_v63  ;;  %v2814_v54 = vpop.eup %2813 }
 0xeb5   : > { %vm1554_vm5 = vmor %vm1552_vm4, %vm1553_vm3  ;;  %v2816_v41 = vpop.eup %2815 }
 0xeb6   : > { %v1549_v18 = vsub.f32 1.0, %v1548_v15  ;;  %v1546_v60 = vadd.f32 1.0, %v2816_v41 }
 0xeb8   : > { %v1550_v33 = vmul.f32 %v2812_v63, %v1549_v18  ;;  %2817 = vrcp.f32 %v1546_v60  ;;  %vm1567_vm8 = vweird.f32 %v1546_v60  ;;  %v1571_v32 = vand.u32 2147483647, %v1546_v60 }
 0xeba   : > { %v1551_v6 = vadd.f32 %v2812_v63, %v1550_v33  ;;  %v1573_v33 = vand.u32 2147483648, %v1546_v60  ;;  %vm1572_vm10 = vcmp.eq.f32.partialorder %v1571_v32, 8.507059e+37 }
 0xebc   : > { %v1555_v28 = vsel %vm1554_vm5, %v2812_v63, %v1551_v6  ;;  %v1574_v6 = vor.u32 1.1754944e-38, %v1573_v33 }
 0xebd   : > { %v1560_v61 = vsel %vm1557_vm6, %v1559_v53, %v1555_v28 }
 0xebe   : > { %v1579_v51 = vmul.f32 %v2814_v54, %v1560_v61  ;;  %v2818_v39 = vpop.eup %2817  ;;  %v1578_v21 = vmul.f32 %v1560_v61, %v3890_v26 }
 0xebf   : > { %v1563_v29 = vmul.f32 %v2818_v39, %v1546_v60  ;;  %vm1568_vm7 = vweird.f32 %v2818_v39 }
 0xec0   : > { %1581 = vrot.lane.b32.xlu0 %v1579_v51, %s2954_s9  ;;  %vm1569_vm9 = vmor %vm1567_vm8, %vm1568_vm7 }
 0xec1   : > { %v1564_v38 = vsub.f32 1.0, %v1563_v29 }
 0xec3   : > { %v1565_v15 = vmul.f32 %v2818_v39, %v1564_v38 }
 0xec5   : > { %v1566_v63 = vadd.f32 %v2818_v39, %v1565_v15 }
 0xec7   : > { %v1570_v55 = vsel %vm1569_vm9, %v2818_v39, %v1566_v63 }
 0xec8   : > { %v1575_v28 = vsel %vm1572_vm10, %v1574_v6, %v1570_v55 }
 0xf32   : > { %v1582_v18 = vpop.permute.xlu0 %1581 }
 0xf33   : > { %v3928_v22 = vadd.f32 %v1582_v18, %v1578_v21 }
 0xf35   : > { %2819 = vtanh.f32 %v3928_v22 }
 0xf3b   : > { %v2820_v53 = vpop.eup %2819 }
 0xf3c   : > { %v1586_v54 = vmul.f32 %v2820_v53, %v1575_v28 }
 0xf3e   : > { %1588 = vrot.lane.b32.xlu1 %v1586_v54, %s2954_s9 }
 0xfb0   : > { %v3932_v26 = vpop.permute.xlu1 %1588 }
 0xfb1   : > { %2644 = vmatmul.msk.f32.vlgmr.msrb.gmra.mxu2 %vm500_vm11, %v3932_v26  ;;  %2645 = vmatmul.msk.f32.vlgmr.msra.gmra.mxu3 %vm500_vm11, %v3932_v26 }
 0xfb2   : > { %1885 = vmatpush.msrb.mxu2 %v3586_v2  ;;  %1905 = vmatpush.msra.mxu3 %v3591_v7 }
 0xfb4   : > { %1886 = vmatpush.msrb.mxu2 %v3606_v10  ;;  %1906 = vmatpush.msra.mxu3 %v3611_v0 }
 0xfb6   : > { %1887 = vmatpush.msrb.mxu2 %v3616_v40  ;;  %1907 = vmatpush.msra.mxu3 %v3623_v8 }
 0xfb8   : > { %1888 = vmatpush.msrb.mxu2 %v3628_v35  ;;  %1908 = vmatpush.msra.mxu3 %v3633_v14 }
 0xfba   : > { %1889 = vmatpush.msrb.mxu2 %v3642_v57  ;;  %1909 = vmatpush.msra.mxu3 %v3647_v47 }
 0xfbc   : > { %1890 = vmatpush.msrb.mxu2 %v3666_v56  ;;  %1910 = vmatpush.msra.mxu3 %v3671_v20 }
 0xfbe   : > { %1891 = vmatpush.msrb.mxu2 %v3676_v37  ;;  %1911 = vmatpush.msra.mxu3 %v3683_v44 }
 0xfc0   : > { %1892 = vmatpush.msrb.mxu2 %v3688_v45  ;;  %1912 = vmatpush.msra.mxu3 %v3693_v31 }
0x1034   : > { %v1609_v61 = vpop.f32.mrf.mxu2  ;;  %v1629_v39 = vpop.f32.mrf.mxu3 }
0x1035   : > { %v1632_v51 = vadd.f32 %v1609_v61, %v1390_v13  ;;  %v1633_v38 = vadd.f32 %v1629_v39, %v1391_v19 }
0x1037   : > { %v2646_v43 = vmul.f32 -1.442695, %v1632_v51  ;;  %v2647_v54 = vmul.f32 -1.442695, %v1633_v38 }
0x1039   : > { %2821 = vpow2.f32 %v2646_v43 }
0x103f   : > { %v2822_v41 = vpop.eup %2821 }
0x1040   : > { %v1640_v60 = vadd.f32 1.0, %v2822_v41 }
0x1042   : > { %2823 = vrcp.f32 %v1640_v60  ;;  %v1653_v18 = vand.u32 2147483648, %v1640_v60  ;;  %v1651_v13 = vand.u32 2147483647, %v1640_v60  ;;  %vm1647_vm13 = vweird.f32 %v1640_v60 }
0x1043   : > { %2825 = vtanh.f32 %v1633_v38 }
0x1044   : > { %v1654_v32 = vor.u32 1.1754944e-38, %v1653_v18  ;;  %vm1652_vm15 = vcmp.eq.f32.partialorder %v1651_v13, 8.507059e+37  ;;  %2827 = vpow2.f32 %v2647_v54 }
0x1048   : > { %v2824_v29 = vpop.eup %2823 }
0x1049   : > { %v1643_v15 = vmul.f32 %v2824_v29, %v1640_v60  ;;  %vm1648_vm12 = vweird.f32 %v2824_v29  ;;  %v2826_v6 = vpop.eup %2825 }
0x104a   : > { %vm1649_vm14 = vmor %vm1647_vm13, %vm1648_vm12  ;;  %v2828_v19 = vpop.eup %2827 }
0x104b   : > { %v1644_v21 = vsub.f32 1.0, %v1643_v15  ;;  %v1641_v61 = vadd.f32 1.0, %v2828_v19 }
0x104d   : > { %v1645_v63 = vmul.f32 %v2824_v29, %v1644_v21  ;;  %2829 = vrcp.f32 %v1641_v61  ;;  %v1668_v18 = vand.u32 2147483648, %v1641_v61  ;;  %vm1662_vm4 = vweird.f32 %v1641_v61 }
0x104e   : > { %v1666_v38 = vand.u32 2147483647, %v1641_v61 }
0x104f   : > { %v1646_v33 = vadd.f32 %v2824_v29, %v1645_v63  ;;  %v1669_v13 = vor.u32 1.1754944e-38, %v1668_v18 }
0x1050   : > { %vm1667_vm6 = vcmp.eq.f32.partialorder %v1666_v38, 8.507059e+37 }
0x1051   : > { %v1650_v55 = vsel %vm1649_vm14, %v2824_v29, %v1646_v33 }
0x1052   : > { %v1655_v53 = vsel %vm1652_vm15, %v1654_v32, %v1650_v55 }
0x1053   : > { %v1674_v28 = vmul.f32 %v2826_v6, %v1655_v53  ;;  %v2830_v51 = vpop.eup %2829  ;;  %v1673_v60 = vmul.f32 %v1655_v53, %v3928_v22 }
0x1054   : > { %v1658_v43 = vmul.f32 %v2830_v51, %v1641_v61  ;;  %vm1663_vm3 = vweird.f32 %v2830_v51 }
0x1055   : > { %1676 = vrot.lane.b32.xlu2 %v1674_v28, %s2954_s9  ;;  %vm1664_vm5 = vmor %vm1662_vm4, %vm1663_vm3 }
0x1056   : > { %v1659_v41 = vsub.f32 1.0, %v1658_v43 }
0x1058   : > { %v1660_v39 = vmul.f32 %v2830_v51, %v1659_v41 }
0x105a   : > { %v1661_v29 = vadd.f32 %v2830_v51, %v1660_v39 }
0x105c   : > { %v1665_v63 = vsel %vm1664_vm5, %v2830_v51, %v1661_v29 }
0x105d   : > { %v1670_v32 = vsel %vm1667_vm6, %v1669_v13, %v1665_v63 }
0x10af   : > { %v1677_v15 = vpop.permute.xlu2 %1676 }
0x10b0   : > { %v3966_v21 = vadd.f32 %v1677_v15, %v1673_v60 }
0x10b2   : > { %2831 = vtanh.f32 %v3966_v21 }
0x10b8   : > { %v2832_v33 = vpop.eup %2831 }
0x10b9   : > { %v1681_v55 = vmul.f32 %v2832_v33, %v1670_v32 }
0x10bb   : > { %1683 = vrot.lane.b32.xlu0 %v1681_v55, %s2954_s9 }
0x112d   : > { %v3970_v22 = vpop.permute.xlu0 %1683 }
0x112e   : > { %2648 = vmatmul.msk.f32.vlgmr.msra.gmra.mxu2 %vm500_vm11, %v3970_v22  ;;  %2649 = vmatmul.msk.f32.vlgmr.msrb.gmra.mxu3 %vm500_vm11, %v3970_v22 }
0x112f   : > { %2075 = vmatpush.msra.mxu2 %v3586_v2  ;;  %2095 = vmatpush.msrb.mxu3 %v3591_v7 }
0x1131   : > { %2076 = vmatpush.msra.mxu2 %v3606_v10  ;;  %2096 = vmatpush.msrb.mxu3 %v3611_v0 }
0x1133   : > { %2077 = vmatpush.msra.mxu2 %v3616_v40  ;;  %2097 = vmatpush.msrb.mxu3 %v3623_v8 }
0x1135   : > { %2078 = vmatpush.msra.mxu2 %v3628_v35  ;;  %2098 = vmatpush.msrb.mxu3 %v3633_v14 }
0x1137   : > { %2079 = vmatpush.msra.mxu2 %v3642_v57  ;;  %2099 = vmatpush.msrb.mxu3 %v3647_v47 }
0x1139   : > { %2080 = vmatpush.msra.mxu2 %v3666_v56  ;;  %2100 = vmatpush.msrb.mxu3 %v3671_v20 }
0x113b   : > { %2081 = vmatpush.msra.mxu2 %v3676_v37  ;;  %2101 = vmatpush.msrb.mxu3 %v3683_v44 }
0x113d   : > { %2082 = vmatpush.msra.mxu2 %v3688_v45  ;;  %2102 = vmatpush.msrb.mxu3 %v3693_v31 }
0x11b1   : > { %v1704_v2 = vpop.f32.mrf.mxu2  ;;  %v1724_v8 = vpop.f32.mrf.mxu3 }
0x11b2   : > { %v1727_v7 = vadd.f32 %v1704_v2, %v1392_v4  ;;  %v1728_v14 = vadd.f32 %v1724_v8, %v1393_v11 }
0x11b4   : > { %v2650_v10 = vmul.f32 -1.442695, %v1727_v7  ;;  %v2651_v28 = vmul.f32 -1.442695, %v1728_v14 }
0x11b6   : > { %2833 = vpow2.f32 %v2650_v10 }
0x11bc   : > { %v2834_v0 = vpop.eup %2833 }
0x11bd   : > { %v1735_v40 = vadd.f32 1.0, %v2834_v0 }
0x11bf   : > { %2835 = vrcp.f32 %v1735_v40  ;;  %v1748_v56 = vand.u32 2147483648, %v1735_v40  ;;  %v1746_v37 = vand.u32 2147483647, %v1735_v40  ;;  %vm1742_vm8 = vweird.f32 %v1735_v40 }
0x11c0   : > { %2837 = vtanh.f32 %v1728_v14 }
0x11c1   : > { %v1749_v45 = vor.u32 1.1754944e-38, %v1748_v56  ;;  %vm1747_vm10 = vcmp.eq.f32.partialorder %v1746_v37, 8.507059e+37  ;;  %2839 = vpow2.f32 %v2651_v28 }
0x11c5   : > { %v2836_v35 = vpop.eup %2835 }
0x11c6   : > { %v1738_v57 = vmul.f32 %v2836_v35, %v1735_v40  ;;  %vm1743_vm7 = vweird.f32 %v2836_v35  ;;  %v2838_v4 = vpop.eup %2837 }
0x11c7   : > { %vm1744_vm9 = vmor %vm1742_vm8, %vm1743_vm7  ;;  %v2840_v11 = vpop.eup %2839 }
0x11c8   : > { %v1739_v47 = vsub.f32 1.0, %v1738_v57  ;;  %v1736_v54 = vadd.f32 1.0, %v2840_v11 }
0x11ca   : > { %v1740_v20 = vmul.f32 %v2836_v35, %v1739_v47  ;;  %2841 = vrcp.f32 %v1736_v54  ;;  %v1763_v29 = vand.u32 2147483648, %v1736_v54  ;;  %vm1757_vm13 = vweird.f32 %v1736_v54 }
0x11cb   : > { %v1761_v18 = vand.u32 2147483647, %v1736_v54 }
0x11cc   : > { %v1741_v44 = vadd.f32 %v2836_v35, %v1740_v20  ;;  %v1764_v63 = vor.u32 1.1754944e-38, %v1763_v29 }
0x11cd   : > { %vm1762_vm15 = vcmp.eq.f32.partialorder %v1761_v18, 8.507059e+37 }
0x11ce   : > { %v1745_v31 = vsel %vm1744_vm9, %v2836_v35, %v1741_v44 }
0x11cf   : > { %v1750_v6 = vsel %vm1747_vm10, %v1749_v45, %v1745_v31 }
0x11d0   : > { %v1769_v53 = vmul.f32 %v2838_v4, %v1750_v6  ;;  %v2842_v19 = vpop.eup %2841  ;;  %v1768_v41 = vmul.f32 %v1750_v6, %v3966_v21 }
0x11d1   : > { %v1753_v61 = vmul.f32 %v2842_v19, %v1736_v54  ;;  %vm1758_vm12 = vweird.f32 %v2842_v19 }
0x11d2   : > { %1771 = vrot.lane.b32.xlu1 %v1769_v53, %s2954_s9  ;;  %vm1759_vm14 = vmor %vm1757_vm13, %vm1758_vm12 }
0x11d3   : > { %v1754_v51 = vsub.f32 1.0, %v1753_v61 }
0x11d5   : > { %v1755_v43 = vmul.f32 %v2842_v19, %v1754_v51 }
0x11d7   : > { %v1756_v15 = vadd.f32 %v2842_v19, %v1755_v43 }
0x11d9   : > { %v1760_v38 = vsel %vm1759_vm14, %v2842_v19, %v1756_v15 }
0x11da   : > { %v1765_v33 = vsel %vm1762_vm15, %v1764_v63, %v1760_v38 }
0x1244   : > { %v1772_v39 = vpop.permute.xlu1 %1771 }
0x1245   : > { %v1774_v60 = vadd.f32 %v1772_v39, %v1768_v41 }
0x1247   : > { %2843 = vtanh.f32 %v1774_v60 }
0x124d   : > { %v2844_v13 = vpop.eup %2843 }
0x124e   : > { %v1776_v32 = vmul.f32 %v2844_v13, %v1765_v33 }
0x1250   : > { %1778 = vrot.lane.b32.xlu2 %v1776_v32, %s2954_s9 }
0x12aa   : > { %v4005_v55 = vpop.permute.xlu2 %1778 }
0x12ab   : > { %2652 = vmatmul.msk.f32.vlgmr.msra.gmra.mxu0 %vm500_vm11, %v4005_v55  ;;  %2653 = vmatmul.msk.f32.vlgmr.msra.gmra.mxu1 %vm500_vm11, %v4005_v55 }
0x1328   : > { %v1799_v21 = vpop.f32.mrf.mxu0  ;;  %v1819_v40 = vpop.f32.mrf.mxu1 }
0x1329   : > { %v1822_v2 = vadd.f32 %v1799_v21, %v1394_v25  ;;  %v1823_v35 = vadd.f32 %v1819_v40, %v1395_v27 }
0x132b   : > { %v2654_v7 = vmul.f32 -1.442695, %v1822_v2  ;;  %v2655_v34 = vmul.f32 -1.442695, %v1823_v35  ;;  %v4390_v2 = vsel %vm3272_vm2, %v3827_v58, %v3799_v17 }
0x132d   : > { %2845 = vpow2.f32 %v2654_v7 }
0x1333   : > { %v2846_v10 = vpop.eup %2845 }
0x1334   : > { %v1830_v0 = vadd.f32 1.0, %v2846_v10 }
0x1336   : > { %2847 = vrcp.f32 %v1830_v0  ;;  %v1843_v47 = vand.u32 2147483648, %v1830_v0  ;;  %v1841_v49 = vand.u32 2147483647, %v1830_v0  ;;  %vm1837_vm4 = vweird.f32 %v1830_v0 }
0x1337   : > { %2849 = vtanh.f32 %v1823_v35 }
0x1338   : > { %v1844_v25 = vor.u32 1.1754944e-38, %v1843_v47  ;;  %vm1842_vm6 = vcmp.eq.f32.partialorder %v1841_v49, 8.507059e+37  ;;  %2851 = vpow2.f32 %v2655_v34 }
0x133c   : > { %v2848_v8 = vpop.eup %2847 }
0x133d   : > { %v1833_v14 = vmul.f32 %v2848_v8, %v1830_v0  ;;  %vm1838_vm3 = vweird.f32 %v2848_v8  ;;  %v2850_v37 = vpop.eup %2849 }
0x133e   : > { %vm1839_vm5 = vmor %vm1837_vm4, %vm1838_vm3  ;;  %v2852_v24 = vpop.eup %2851 }
0x133f   : > { %v1834_v57 = vsub.f32 1.0, %v1833_v14  ;;  %v1831_v27 = vadd.f32 1.0, %v2852_v24 }
0x1341   : > { %v1835_v56 = vmul.f32 %v2848_v8, %v1834_v57  ;;  %2853 = vrcp.f32 %v1831_v27  ;;  %v1858_v61 = vand.u32 2147483648, %v1831_v27  ;;  %vm1852_vm8 = vweird.f32 %v1831_v27 }
0x1342   : > { %v1856_v51 = vand.u32 2147483647, %v1831_v27 }
0x1343   : > { %v1836_v23 = vadd.f32 %v2848_v8, %v1835_v56  ;;  %v1859_v41 = vor.u32 1.1754944e-38, %v1858_v61 }
0x1344   : > { %vm1857_vm10 = vcmp.eq.f32.partialorder %v1856_v51, 8.507059e+37 }
0x1345   : > { %v1840_v20 = vsel %vm1839_vm5, %v2848_v8, %v1836_v23 }
0x1346   : > { %v1845_v44 = vsel %vm1842_vm6, %v1844_v25, %v1840_v20 }
0x1347   : > { %v1864_v45 = vmul.f32 %v2850_v37, %v1845_v44  ;;  %v2854_v31 = vpop.eup %2853  ;;  %v1863_v28 = vmul.f32 %v1845_v44, %v1774_v60 }
0x1348   : > { %v1848_v4 = vmul.f32 %v2854_v31, %v1831_v27  ;;  %vm1853_vm7 = vweird.f32 %v2854_v31 }
0x1349   : > { %1866 = vrot.lane.b32.xlu0 %v1864_v45, %s2954_s9  ;;  %vm1854_vm9 = vmor %vm1852_vm8, %vm1853_vm7 }
0x134a   : > { %v1849_v6 = vsub.f32 1.0, %v1848_v4 }
0x134c   : > { %v1850_v53 = vmul.f32 %v2854_v31, %v1849_v6 }
0x134e   : > { %v1851_v19 = vadd.f32 %v2854_v31, %v1850_v53 }
0x1350   : > { %v1855_v43 = vsel %vm1854_vm9, %v2854_v31, %v1851_v19  ;;  %v4391_v19 = vsel %vm3245_vm1, %v3845_v59, %v3793_v48 }
0x1351   : > { %v1860_v15 = vsel %vm1857_vm10, %v1859_v41, %v1855_v43 }
0x13bb   : > { %v1867_v11 = vpop.permute.xlu0 %1866 }
0x13bc   : > { %v1869_v54 = vadd.f32 %v1867_v11, %v1863_v28 }
0x13be   : > { %2855 = vtanh.f32 %v1869_v54 }
0x13c4   : > { %v2856_v39 = vpop.eup %2855 }
0x13c5   : > { %v1871_v29 = vmul.f32 %v2856_v39, %v1860_v15 }
0x13c7   : > { %1873 = vrot.lane.b32.xlu1 %v1871_v29, %s2954_s9  ;;  %v4392_v29 = vsel %vm3272_vm2, %v3847_v9, %v3795_v62 }
0x1439   : > { %v4023_v18 = vpop.permute.xlu1 %1873 }
0x143a   : > { %2656 = vmatmul.msk.f32.vlgmr.msrb.gmra.mxu2 %vm500_vm11, %v4023_v18  ;;  %2657 = vmatmul.msk.f32.vlgmr.msra.gmra.mxu3 %vm500_vm11, %v4023_v18 }
0x14bd   : > { %v1894_v60 = vpop.f32.mrf.mxu2  ;;  %v1914_v32 = vpop.f32.mrf.mxu3 }
0x14be   : > { %v1917_v38 = vadd.f32 %v1894_v60, %v1396_v1  ;;  %v1918_v7 = vadd.f32 %v1914_v32, %v4390_v2 }
0x14c0   : > { %v2658_v63 = vmul.f32 -1.442695, %v1917_v38  ;;  %v2659_v17 = vmul.f32 -1.442695, %v1918_v7 }
0x14c2   : > { %2857 = vpow2.f32 %v2658_v63 }
0x14c8   : > { %v2858_v13 = vpop.eup %2857 }
0x14c9   : > { %v1925_v33 = vadd.f32 1.0, %v2858_v13 }
0x14cb   : > { %2859 = vrcp.f32 %v1925_v33  ;;  %v1938_v40 = vand.u32 2147483648, %v1925_v33  ;;  %v1936_v16 = vand.u32 2147483647, %v1925_v33  ;;  %vm1932_vm13 = vweird.f32 %v1925_v33 }
0x14cc   : > { %2861 = vtanh.f32 %v1918_v7 }
0x14cd   : > { %v1939_v1 = vor.u32 1.1754944e-38, %v1938_v40  ;;  %vm1937_vm15 = vcmp.eq.f32.partialorder %v1936_v16, 8.507059e+37  ;;  %2863 = vpow2.f32 %v2659_v17 }
0x14d1   : > { %v2860_v21 = vpop.eup %2859 }
0x14d2   : > { %v1928_v10 = vmul.f32 %v2860_v21, %v1925_v33  ;;  %vm1933_vm12 = vweird.f32 %v2860_v21  ;;  %v2862_v14 = vpop.eup %2861 }
0x14d3   : > { %vm1934_vm14 = vmor %vm1932_vm13, %vm1933_vm12  ;;  %v2864_v58 = vpop.eup %2863 }
0x14d4   : > { %v1929_v0 = vsub.f32 1.0, %v1928_v10  ;;  %v1926_v56 = vadd.f32 1.0, %v2864_v58 }
0x14d6   : > { %v1930_v8 = vmul.f32 %v2860_v21, %v1929_v0  ;;  %2865 = vrcp.f32 %v1926_v56  ;;  %v1953_v24 = vand.u32 2147483648, %v1926_v56  ;;  %vm1947_vm4 = vweird.f32 %v1926_v56 }
0x14d7   : > { %v1951_v27 = vand.u32 2147483647, %v1926_v56 }
0x14d8   : > { %v1931_v36 = vadd.f32 %v2860_v21, %v1930_v8  ;;  %v1954_v4 = vor.u32 1.1754944e-38, %v1953_v24 }
0x14d9   : > { %vm1952_vm6 = vcmp.eq.f32.partialorder %v1951_v27, 8.507059e+37 }
0x14da   : > { %v1935_v35 = vsel %vm1934_vm14, %v2860_v21, %v1931_v36 }
0x14db   : > { %v1940_v57 = vsel %vm1937_vm15, %v1939_v1, %v1935_v35 }
0x14dc   : > { %v1959_v47 = vmul.f32 %v2862_v14, %v1940_v57  ;;  %v2866_v49 = vpop.eup %2865  ;;  %v1958_v37 = vmul.f32 %v1940_v57, %v1869_v54 }
0x14dd   : > { %v1943_v23 = vmul.f32 %v2866_v49, %v1926_v56  ;;  %vm1948_vm3 = vweird.f32 %v2866_v49 }
0x14de   : > { %1961 = vrot.lane.b32.xlu2 %v1959_v47, %s2954_s9  ;;  %vm1949_vm5 = vmor %vm1947_vm4, %vm1948_vm3  ;;  %vm2185_vm3 = vcmask 261120  }
0x14df   : > { %v1944_v25 = vsub.f32 1.0, %v1943_v23 }
0x14e1   : > { %v1945_v20 = vmul.f32 %v2866_v49, %v1944_v25 }
0x14e3   : > { %v1946_v34 = vadd.f32 %v2866_v49, %v1945_v20  ;;  %v362_v20 = vld [vmem:[%s4378_s2 + $0x1c0] sm:$0xff] }
0x14e5   : > { %v1950_v31 = vsel %vm1949_vm5, %v2866_v49, %v1946_v34 }
0x14e6   : > { %v1955_v53 = vsel %vm1952_vm6, %v1954_v4, %v1950_v31 }
0x1538   : > { %v1962_v44 = vpop.permute.xlu2 %1961 }
0x1539   : > { %v1964_v45 = vadd.f32 %v1962_v44, %v1958_v37  ;;  %v4065_v37 = vperm.slane %v362_v20, 0  ;;  %v4071_v44 = vsel %vm3245_vm1, %v4005_v55, %v4023_v18 }
0x153b   : > { %2867 = vtanh.f32 %v1964_v45 }
0x1541   : > { %v2868_v6 = vpop.eup %2867 }
0x1542   : > { %v1966_v28 = vmul.f32 %v2868_v6, %v1955_v53 }
0x1544   : > { %1968 = vrot.lane.b32.xlu0 %v1966_v28, %s2954_s9 }
0x15b6   : > { %v4041_v11 = vpop.permute.xlu0 %1968 }
0x15b7   : > { %2660 = vmatmul.msk.f32.vlgmr.msrb.gmra.mxu0 %vm500_vm11, %v4041_v11  ;;  %2661 = vmatmul.msk.f32.vlgmr.msrb.gmra.mxu1 %vm500_vm11, %v4041_v11  ;;  %v4102_v28 = vsel %vm3245_vm1, %v4041_v11, %v3970_v22 }
0x1634   : > { %v1989_v54 = vpop.f32.mrf.mxu0  ;;  %v2009_v39 = vpop.f32.mrf.mxu1 }
0x1635   : > { %v2012_v61 = vadd.f32 %v1989_v54, %v4391_v19  ;;  %v2013_v60 = vadd.f32 %v2009_v39, %v4392_v29 }
0x1637   : > { %v2662_v51 = vmul.f32 -1.442695, %v2012_v61  ;;  %v2663_v62 = vmul.f32 -1.442695, %v2013_v60  ;;  %v4393_v61 = vsel %vm3245_vm1, %v3869_v50, %v3865_v46 }
0x1639   : > { %2869 = vpow2.f32 %v2662_v51 }
0x163f   : > { %v2870_v43 = vpop.eup %2869 }
0x1640   : > { %v2020_v41 = vadd.f32 1.0, %v2870_v43 }
0x1642   : > { %2871 = vrcp.f32 %v2020_v41  ;;  %v2033_v13 = vand.u32 2147483648, %v2020_v41  ;;  %v2031_v48 = vand.u32 2147483647, %v2020_v41  ;;  %vm2027_vm8 = vweird.f32 %v2020_v41 }
0x1643   : > { %2873 = vtanh.f32 %v2013_v60  ;;  %v4394_v60 = vsel %vm3272_vm2, %v3871_v12, %v3867_v30  ;;  %v4126_v30 = vsel %vm3245_vm1, %v4023_v18, %v4005_v55 }
0x1644   : > { %v2034_v32 = vor.u32 1.1754944e-38, %v2033_v13  ;;  %vm2032_vm10 = vcmp.eq.f32.partialorder %v2031_v48, 8.507059e+37  ;;  %2875 = vpow2.f32 %v2663_v62  ;;  %v2181_v12 = vmul.f32 %v4065_v37, %v4126_v30 }
0x1648   : > { %v2872_v15 = vpop.eup %2871 }
0x1649   : > { %v2023_v38 = vmul.f32 %v2872_v15, %v2020_v41  ;;  %vm2028_vm7 = vweird.f32 %v2872_v15  ;;  %v2874_v2 = vpop.eup %2873 }
0x164a   : > { %vm2029_vm9 = vmor %vm2027_vm8, %vm2028_vm7  ;;  %v2876_v9 = vpop.eup %2875 }
0x164b   : > { %v2024_v63 = vsub.f32 1.0, %v2023_v38  ;;  %v2021_v0 = vadd.f32 1.0, %v2876_v9 }
0x164d   : > { %v2025_v33 = vmul.f32 %v2872_v15, %v2024_v63  ;;  %2877 = vrcp.f32 %v2021_v0  ;;  %v2048_v47 = vand.u32 2147483648, %v2021_v0  ;;  %vm2042_vm13 = vweird.f32 %v2021_v0 }
0x164e   : > { %v2046_v17 = vand.u32 2147483647, %v2021_v0 }
0x164f   : > { %v2026_v59 = vadd.f32 %v2872_v15, %v2025_v33  ;;  %v2049_v56 = vor.u32 1.1754944e-38, %v2048_v47 }
0x1650   : > { %vm2047_vm15 = vcmp.eq.f32.partialorder %v2046_v17, 8.507059e+37 }
0x1651   : > { %v2030_v21 = vsel %vm2029_vm9, %v2872_v15, %v2026_v59 }
0x1652   : > { %v2035_v7 = vsel %vm2032_vm10, %v2034_v32, %v2030_v21 }
0x1653   : > { %v2054_v10 = vmul.f32 %v2874_v2, %v2035_v7  ;;  %v2878_v40 = vpop.eup %2877  ;;  %v2053_v1 = vmul.f32 %v2035_v7, %v1964_v45  ;;  %v2180_v45 = vmul.f32 %v4065_v37, %v4071_v44  ;;  %v4135_v7 = vsel %vm3245_vm1, %v3970_v22, %v4041_v11 }
0x1654   : > { %v2038_v8 = vmul.f32 %v2878_v40, %v2021_v0  ;;  %vm2043_vm12 = vweird.f32 %v2878_v40 }
0x1655   : > { %2056 = vrot.lane.b32.xlu1 %v2054_v10, %s2954_s9  ;;  %vm2044_vm14 = vmor %vm2042_vm13, %vm2043_vm12  ;;  %v2195_v53 = vsel %vm2185_vm3, %v2180_v45, 0.0  ;;  %v2179_v10 = vmul.f32 %v4065_v37, %v4135_v7 }
0x1656   : > { %v2039_v16 = vsub.f32 1.0, %v2038_v8 }
0x1657   : > { %v2192_v62 = vsel %vm2185_vm3, %v2179_v10, 0.0 }
0x1658   : > { %v2040_v36 = vmul.f32 %v2878_v40, %v2039_v16 }
0x165a   : > { %v2041_v57 = vadd.f32 %v2878_v40, %v2040_v36 }
0x165c   : > { %v2045_v58 = vsel %vm2044_vm14, %v2878_v40, %v2041_v57 }
0x165d   : > { %v2050_v23 = vsel %vm2047_vm15, %v2049_v56, %v2045_v58 }
0x16c7   : > { %v2057_v35 = vpop.permute.xlu1 %2056 }
0x16c8   : > { %v4058_v14 = vadd.f32 %v2057_v35, %v2053_v1 }
0x16ca   : > { %2879 = vtanh.f32 %v4058_v14 }
0x16d0   : > { %v2880_v49 = vpop.eup %2879 }
0x16d1   : > { %v2061_v25 = vmul.f32 %v2880_v49, %v2050_v23 }
0x16d3   : > { %2063 = vrot.lane.b32.xlu2 %v2061_v25, %s2954_s9 }
0x16db   : > { %2224 = vrot.lane.b32.xlu2 %v2180_v45, %s2955_s26 }
0x172d   : > { %v2064_v34 = vpop.permute.xlu2 %2063 }
0x172e   : > { %2664 = vmatmul.msk.f32.vlgmr.msra.gmra.mxu2 %vm500_vm11, %v2064_v34  ;;  %2665 = vmatmul.msk.f32.vlgmr.msrb.gmra.mxu3 %vm500_vm11, %v2064_v34  ;;  %v4081_v24 = vsel %vm3245_vm1, %v2064_v34, %v3932_v26  ;;  %v4092_v31 = vsel %vm3245_vm1, %v3932_v26, %v2064_v34  ;;  %v4106_v26 = vmul.f32 %v4065_v37, %v4102_v28 }
0x172f   : > { %v4085_v27 = vmul.f32 %v4065_v37, %v4081_v24  ;;  %v2178_v4 = vmul.f32 %v4065_v37, %v4092_v31 }
0x1730   : > { %v2201_v54 = vsel %vm2185_vm3, %v4106_v26, 0.0 }
0x1731   : > { %2230 = vrot.lane.b32.xlu2 %v4085_v27, %s2955_s26  ;;  %v2189_v6 = vsel %vm2185_vm3, %v2178_v4, 0.0 }
0x175a   : > { %2190 = vadd.xlane.f32.xlu2 %v2189_v6 }
0x1762   : > { %2196 = vadd.xlane.f32.xlu2 %v2195_v53 }
0x176a   : > { %2202 = vadd.xlane.f32.xlu2 %v2201_v54  ;;  %v2225_v54 = vpop.permute.xlu2 %2224 }
0x17b1   : > { %v2084_v19 = vpop.f32.mrf.mxu2  ;;  %v2104_v15 = vpop.f32.mrf.mxu3 }
0x17b2   : > { %v2107_v51 = vadd.f32 %v2084_v19, %v4393_v61  ;;  %v2108_v38 = vadd.f32 %v2104_v15, %v4394_v60  ;;  %v2204_v19 = vsel %vm2185_vm3, %v4085_v27, 0.0 }
0x17b4   : > { %v2666_v43 = vmul.f32 -1.442695, %v2107_v51  ;;  %v2667_v9 = vmul.f32 -1.442695, %v2108_v38 }
0x17b6   : > { %2881 = vpow2.f32 %v2666_v43  ;;  %v2231_v43 = vpop.permute.xlu2 %2230 }
0x17b7   : > { %v2260_v27 = vsel %vm2185_vm3, %v2231_v43, 0.0  ;;  %v2407_v43 = vld [vmem:[%s4379_s3 + $0x70] sm:$0xff] }
0x17bc   : > { %v2882_v41 = vpop.eup %2881 }
0x17bd   : > { %v2115_v39 = vadd.f32 1.0, %v2882_v41 }
0x17bf   : > { %2883 = vrcp.f32 %v2115_v39  ;;  %v2128_v33 = vand.u32 2147483648, %v2115_v39  ;;  %v2126_v46 = vand.u32 2147483647, %v2115_v39  ;;  %vm2122_vm5 = vweird.f32 %v2115_v39 }
0x17c0   : > { %2885 = vtanh.f32 %v2108_v38 }
0x17c1   : > { %v2129_v59 = vor.u32 1.1754944e-38, %v2128_v33  ;;  %vm2127_vm7 = vcmp.eq.f32.partialorder %v2126_v46, 8.507059e+37  ;;  %2887 = vpow2.f32 %v2667_v9  ;;  %v2417_v46 = vld [vmem:[%s271_s30] sm:$0xff] }
0x17c5   : > { %v2884_v29 = vpop.eup %2883 }
0x17c6   : > { %v2118_v63 = vmul.f32 %v2884_v29, %v2115_v39  ;;  %vm2123_vm4 = vweird.f32 %v2884_v29  ;;  %v2886_v21 = vpop.eup %2885 }
0x17c7   : > { %vm2124_vm6 = vmor %vm2122_vm5, %vm2123_vm4  ;;  %v2888_v55 = vpop.eup %2887 }
0x17c8   : > { %v2119_v13 = vsub.f32 1.0, %v2118_v63  ;;  %v2116_v18 = vadd.f32 1.0, %v2888_v55 }
0x17ca   : > { %v2120_v48 = vmul.f32 %v2884_v29, %v2119_v13  ;;  %2889 = vrcp.f32 %v2116_v18  ;;  %v2143_v35 = vand.u32 2147483648, %v2116_v18  ;;  %vm2137_vm8 = vweird.f32 %v2116_v18 }
0x17cb   : > { %v2141_v57 = vand.u32 2147483647, %v2116_v18 }
0x17cc   : > { %v2121_v50 = vadd.f32 %v2884_v29, %v2120_v48  ;;  %v2144_v17 = vor.u32 1.1754944e-38, %v2143_v35 }
0x17cd   : > { %vm2142_vm10 = vcmp.eq.f32.partialorder %v2141_v57, 8.507059e+37  ;;  %v2191_v15 = vpop.xlane.xlu2 %2190 }
0x17ce   : > { %v2125_v32 = vsel %vm2124_vm6, %v2884_v29, %v2121_v50 }
0x17cf   : > { %v2130_v2 = vsel %vm2127_vm7, %v2129_v59, %v2125_v32 }
0x17d0   : > { %v2149_v5 = vmul.f32 %v2886_v21, %v2130_v2  ;;  %v2890_v0 = vpop.eup %2889  ;;  %v2148_v36 = vmul.f32 %v2130_v2, %v4058_v14  ;;  %v2198_v14 = vsel %vm2185_vm3, %v2181_v12, 0.0 }
0x17d1   : > { %v2133_v40 = vmul.f32 %v2890_v0, %v2116_v18  ;;  %vm2138_vm2 = vweird.f32 %v2890_v0 }
0x17d2   : > { %2151 = vrot.lane.b32.xlu0 %v2149_v5, %s2954_s9  ;;  %vm2139_vm9 = vmor %vm2137_vm8, %vm2138_vm2 }
0x17d3   : > { %v2134_v8 = vsub.f32 1.0, %v2133_v40 }
0x17d5   : > { %v2135_v16 = vmul.f32 %v2890_v0, %v2134_v8  ;;  %v2197_v29 = vpop.xlane.xlu2 %2196 }
0x17d7   : > { %v2136_v11 = vadd.f32 %v2890_v0, %v2135_v16 }
0x17d9   : > { %v2140_v47 = vsel %vm2139_vm9, %v2890_v0, %v2136_v11 }
0x17da   : > { %2220 = vrot.lane.b32.xlu0 %v2178_v4, %s2955_s26  ;;  %v2145_v56 = vsel %vm2142_vm10, %v2144_v17, %v2140_v47 }
0x17dd   : > { %v4171_v60 = vpop.xlane.xlu2 %2202 }
0x17e2   : > { %2226 = vrot.lane.b32.xlu0 %v2181_v12, %s2955_s26 }
0x180c   : > { %2193 = vadd.xlane.f32.xlu0 %v2192_v62  ;;  %v2267_v62 = vmax.f32 %v2191_v15, %v4171_v60 }
0x1844   : > { %v2152_v1 = vpop.permute.xlu0 %2151 }
0x1845   : > { %v2154_v22 = vadd.f32 %v2152_v1, %v2148_v36 }
0x1847   : > { %2891 = vtanh.f32 %v2154_v22 }
0x184c   : > { %v2221_v61 = vpop.permute.xlu0 %2220 }
0x184d   : > { %v2892_v58 = vpop.eup %2891  ;;  %v2245_v51 = vsel %vm2185_vm3, %v2221_v61, 0.0 }
0x184e   : > { %v2156_v49 = vmul.f32 %v2892_v58, %v2145_v56 }
0x1850   : > { %2159 = vrot.lane.b32.xlu1 %v2156_v49, %s2954_s9 }
0x1854   : > { %v2227_v41 = vpop.permute.xlu0 %2226 }
0x1855   : > { %v2254_v39 = vsel %vm2185_vm3, %v2227_v41, 0.0 }
0x1858   : > { %2222 = vrot.lane.b32.xlu1 %v2179_v10, %s2955_s26 }
0x1860   : > { %2228 = vrot.lane.b32.xlu1 %v4106_v26, %s2955_s26 }
0x187f   : > { %v2194_v13 = vpop.xlane.xlu0 %2193 }
0x188a   : > { %2199 = vadd.xlane.f32.xlu1 %v2198_v14 }
0x18c2   : > { %v2160_v23 = vpop.permute.xlu1 %2159 }
0x18c3   : > { %v4149_v25 = vsel %vm3245_vm1, %v3894_v3, %v2160_v23  ;;  %v4154_v20 = vsel %vm3245_vm1, %v2160_v23, %v3894_v3  ;;  %vm305_vm1 = vcmp.lt.s32.totalorder %v3232_v42, 32 }
0x18c4   : > { %v2177_v45 = vmul.f32 %v4065_v37, %v4149_v25  ;;  %v2184_v34 = vmul.f32 %v4065_v37, %v4154_v20  ;;  %v2251_v37 = vsel %vm2185_vm3, %v2225_v54, 0.0 }
0x18c6   : > { %2232 = vrot.lane.b32.xlu0 %v2184_v34, %s2955_s26  ;;  %2218 = vrot.lane.b32.xlu2 %v2177_v45, %s2955_s26  ;;  %v2186_v53 = vsel %vm2185_vm3, %v2177_v45, 0.0  ;;  %v2207_v52 = vsel %vm2185_vm3, %v2184_v34, 0.0 }
0x18ca   : > { %v2223_v4 = vpop.permute.xlu1 %2222 }
0x18cb   : > { %v2248_v6 = vsel %vm2185_vm3, %v2223_v4, 0.0 }
0x18cc   : > { %2249 = vadd.xlane.f32.xlu1 %v2248_v6 }
0x18d2   : > { %v2229_v3 = vpop.permute.xlu1 %2228 }
0x18d3   : > { %v2257_v26 = vsel %vm2185_vm3, %v2229_v3, 0.0 }
0x18d4   : > { %2187 = vadd.xlane.f32.xlu1 %v2186_v53 }
0x18dc   : > { %2208 = vadd.xlane.f32.xlu1 %v2207_v52 }
0x18e4   : > { %2258 = vadd.xlane.f32.xlu1 %v2257_v26 }
0x18ef   : > { %2252 = vadd.xlane.f32.xlu2 %v2251_v37 }
0x18f0   : > { %2205 = vadd.xlane.f32.xlu0 %v2204_v19  ;;  %v2408_v19 = vld [vmem:[%s4379_s3 + $0x78] sm:$0xff] }
0x18f1   : > { %2423 = vmatpush.msra.mxu0 %v2408_v19 }
0x18f3   : > { %2424 = vmatpush.msra.mxu0 %v2407_v43 }
0x18f8   : > { %2246 = vadd.xlane.f32.xlu0 %v2245_v51 }
0x18fd   : > { %2419 = vrot.lane.b32.xlu1 %v2417_v46, %s2954_s9  ;;  %v2200_v50 = vpop.xlane.xlu1 %2199 }
0x1900   : > { %2255 = vadd.xlane.f32.xlu0 %v2254_v39 }
0x1920   : > { %v2219_v38 = vpop.permute.xlu2 %2218 }
0x1921   : > { %v2242_v63 = vsel %vm2185_vm3, %v2219_v38, 0.0 }
0x1922   : > { %2243 = vadd.xlane.f32.xlu2 %v2242_v63  ;;  %v2406_v63 = vld [vmem:[%s4379_s3 + $0x68] sm:$0xff] }
0x1923   : > { %2425 = vmatpush.msra.mxu0 %v2406_v63 }
0x192a   : > { %2261 = vadd.xlane.f32.xlu2 %v2260_v27 }
0x1938   : > { %v2233_v33 = vpop.permute.xlu0 %2232 }
0x1939   : > { %v2263_v48 = vsel %vm2185_vm3, %v2233_v33, 0.0 }
0x193a   : > { %2264 = vadd.xlane.f32.xlu0 %v2263_v48 }
0x193f   : > { %v4189_v59 = vpop.xlane.xlu1 %2249 }
0x1947   : > { %v2188_v32 = vpop.xlane.xlu1 %2187 }
0x1948   : > { %v2266_v12 = vmax.f32 %v2188_v32, %v2200_v50 }
0x194a   : > { %v2270_v55 = vmax.f32 %v2266_v12, %v2267_v62 }
0x194f   : > { %v4193_v2 = vpop.xlane.xlu1 %2208 }
0x1950   : > { %v2269_v10 = vmax.f32 %v2197_v29, %v4193_v2 }
0x1957   : > { %v2259_v45 = vpop.xlane.xlu1 %2258 }
0x1962   : > { %v4198_v18 = vpop.xlane.xlu2 %2252 }
0x1963   : > { %v4191_v21 = vpop.xlane.xlu0 %2205 }
0x1964   : > { %v2268_v5 = vmax.f32 %v2194_v13, %v4191_v21 }
0x1966   : > { %v2271_v9 = vmax.f32 %v2268_v5, %v2269_v10  ;;  %v2403_v10 = vld [vmem:[%s4379_s3 + $0x50] sm:$0xff] }
0x1968   : > { %v4200_v0 = vmax.f32 %v2270_v55, %v2271_v9 }
0x196a   : > { %v2273_v8 = vsub.f32 %v2188_v32, %v4200_v0  ;;  %v2274_v16 = vsub.f32 %v2191_v15, %v4200_v0  ;;  %v2275_v11 = vsub.f32 %v2194_v13, %v4200_v0  ;;  %v2276_v57 = vsub.f32 %v2197_v29, %v4200_v0  ;;  %v2405_v13 = vld [vmem:[%s4379_s3 + $0x60] sm:$0xff] }
0x196b   : > { %v2247_v40 = vpop.xlane.xlu0 %2246  ;;  %v2277_v49 = vsub.f32 %v2200_v50, %v4200_v0  ;;  %v2278_v52 = vsub.f32 %v4171_v60, %v4200_v0  ;;  %v2279_v41 = vsub.f32 %v4191_v21, %v4200_v0  ;;  %v2404_v50 = vld [vmem:[%s4379_s3 + $0x58] sm:$0xff]  ;;  %2426 = vmatpush.msra.mxu0 %v2405_v13  ;;  %v2280_v5 = vsub.f32 %v4193_v2, %v4200_v0  ;;  %v2411_v13 = vld [vmem:[%s4379_s3 + $0x90] sm:$0xff] }
0x196c   : > { %v2281_v36 = vmul.f32 1.442695, %v2273_v8  ;;  %v2283_v22 = vmul.f32 1.442695, %v2274_v16  ;;  %v2285_v47 = vmul.f32 1.442695, %v2275_v11  ;;  %v2314_v4 = vmax.f32 %v2247_v40, %v2259_v45 }
0x196d   : > { %v2287_v14 = vmul.f32 1.442695, %v2276_v57  ;;  %v2289_v26 = vmul.f32 1.442695, %v2277_v49  ;;  %v2291_v39 = vmul.f32 1.442695, %v2278_v52  ;;  %2427 = vmatpush.msra.mxu0 %v2404_v50 }
0x196e   : > { %2893 = vpow2.f32 %v2281_v36  ;;  %v2293_v12 = vmul.f32 1.442695, %v2279_v41  ;;  %v2295_v8 = vmul.f32 1.442695, %v2280_v5  ;;  %v2401_v16 = vld [vmem:[%s4379_s3 + $0x40] sm:$0xff]  ;;  %v2410_v50 = vld [vmem:[%s4379_s3 + $0x88] sm:$0xff] }
0x196f   : > { %2895 = vpow2.f32 %v2283_v22  ;;  %2428 = vmatpush.msra.mxu0 %v2403_v10 }
0x1970   : > { %2897 = vpow2.f32 %v2285_v47 }
0x1971   : > { %2899 = vpow2.f32 %v2287_v14  ;;  %v2399_v14 = vld [vmem:[%s4379_s3 + $0x30] sm:$0xff] }
0x1972   : > { %2901 = vpow2.f32 %v2289_v26  ;;  %v2397_v26 = vld [vmem:[%s4379_s3 + $0x20] sm:$0xff] }
0x1973   : > { %v2256_v35 = vpop.xlane.xlu0 %2255  ;;  %2903 = vpow2.f32 %v2291_v39 }
0x1974   : > { %v4206_v17 = vpop.eup %2893 }
0x1975   : > { %v4210_v56 = vpop.eup %2895 }
0x1976   : > { %v2297_v3 = vadd.f32 %v4210_v56, %v4206_v17  ;;  %v4226_v61 = vpop.eup %2897 }
0x1977   : > { %v4242_v33 = vpop.eup %2899 }
0x1978   : > { %v2298_v15 = vadd.f32 %v4226_v61, %v2297_v3  ;;  %v4253_v55 = vpop.eup %2901 }
0x1979   : > { %v4263_v36 = vpop.eup %2903 }
0x1995   : > { %v2244_v1 = vpop.xlane.xlu2 %2243 }
0x1996   : > { %v2313_v23 = vmax.f32 %v2244_v1, %v2256_v35 }
0x1998   : > { %v2317_v54 = vmax.f32 %v2313_v23, %v2314_v4 }
0x199d   : > { %v4208_v58 = vpop.xlane.xlu2 %2261 }
0x199e   : > { %v2315_v6 = vmax.f32 %v4189_v59, %v4208_v58 }
0x19ad   : > { %v4213_v34 = vpop.xlane.xlu0 %2264 }
0x19ae   : > { %v2316_v53 = vmax.f32 %v4198_v18, %v4213_v34 }
0x19b0   : > { %v2318_v37 = vmax.f32 %v2315_v6, %v2316_v53  ;;  %v2398_v6 = vld [vmem:[%s4379_s3 + $0x28] sm:$0xff] }
0x19b2   : > { %v2319_v51 = vmax.f32 %v2317_v54, %v2318_v37 }
0x19b4   : > { %v2320_v29 = vsub.f32 %v2244_v1, %v2319_v51  ;;  %v2321_v60 = vsub.f32 %v2247_v40, %v2319_v51  ;;  %v2322_v38 = vsub.f32 %v4189_v59, %v2319_v51  ;;  %v2323_v27 = vsub.f32 %v4198_v18, %v2319_v51  ;;  %v2402_v18 = vld [vmem:[%s4379_s3 + $0x48] sm:$0xff] }
0x19b5   : > { %v2299_v59 = vadd.f32 %v4242_v33, %v2298_v15  ;;  %v2324_v32 = vsub.f32 %v2256_v35, %v2319_v51  ;;  %v2325_v62 = vsub.f32 %v2259_v45, %v2319_v51  ;;  %v2326_v2 = vsub.f32 %v4208_v58, %v2319_v51  ;;  %2429 = vmatpush.msra.mxu0 %v2402_v18  ;;  %v2400_v35 = vld [vmem:[%s4379_s3 + $0x38] sm:$0xff]  ;;  %v2395_v15 = vld [vmem:[%s4379_s3 + $0x10] sm:$0xff] }
0x19b6   : > { %v2328_v48 = vmul.f32 1.442695, %v2320_v29  ;;  %v2330_v46 = vmul.f32 1.442695, %v2321_v60  ;;  %v2332_v21 = vmul.f32 1.442695, %v2322_v38  ;;  %v2327_v1 = vsub.f32 %v4213_v34, %v2319_v51 }
0x19b7   : > { %v2334_v9 = vmul.f32 1.442695, %v2323_v27  ;;  %v2300_v40 = vadd.f32 %v4253_v55, %v2299_v59  ;;  %v2336_v0 = vmul.f32 1.442695, %v2324_v32  ;;  %v2338_v22 = vmul.f32 1.442695, %v2325_v62  ;;  %2430 = vmatpush.msra.mxu0 %v2401_v16 }
0x19b8   : > { %2905 = vpow2.f32 %v2328_v48  ;;  %v2340_v58 = vmul.f32 1.442695, %v2326_v2  ;;  %v2342_v45 = vmul.f32 1.442695, %v2327_v1  ;;  %v2396_v51 = vld [vmem:[%s4379_s3 + $0x18] sm:$0xff]  ;;  %v2394_v38 = vld [vmem:[%s4379_s3 + $0x8] sm:$0xff] }
0x19b9   : > { %2907 = vpow2.f32 %v2330_v46  ;;  %v2301_v47 = vadd.f32 %v4263_v36, %v2300_v40  ;;  %2431 = vmatpush.msra.mxu0 %v2400_v35  ;;  %v2412_v27 = vld [vmem:[%s4379_s3 + $0x98] sm:$0xff]  ;;  %v2393_v46 = vld [vmem:[%s4379_s3] sm:$0xff] }
0x19ba   : > { %2909 = vpow2.f32 %v2332_v21  ;;  %2460 = vmatpush.msra.mxu1 %v2412_v27 }
0x19bb   : > { %2911 = vpow2.f32 %v2293_v12  ;;  %2432 = vmatpush.msra.mxu0 %v2399_v14 }
0x19bc   : > { %2913 = vpow2.f32 %v2334_v9  ;;  %2461 = vmatpush.msra.mxu1 %v2411_v13 }
0x19bd   : > { %2915 = vpow2.f32 %v2336_v0  ;;  %2433 = vmatpush.msra.mxu0 %v2398_v6 }
0x19be   : > { %v2906_v11 = vpop.eup %2905  ;;  %2917 = vpow2.f32 %v2295_v8  ;;  %2462 = vmatpush.msra.mxu1 %v2410_v50 }
0x19bf   : > { %v2908_v57 = vpop.eup %2907  ;;  %2919 = vpow2.f32 %v2338_v22  ;;  %2434 = vmatpush.msra.mxu0 %v2397_v26 }
0x19c0   : > { %v2344_v49 = vadd.f32 %v2908_v57, %v2906_v11  ;;  %v2910_v23 = vpop.eup %2909  ;;  %2921 = vpow2.f32 %v2340_v58 }
0x19c1   : > { %v4273_v34 = vpop.eup %2911  ;;  %2923 = vpow2.f32 %v2342_v45  ;;  %2435 = vmatpush.msra.mxu0 %v2396_v51 }
0x19c2   : > { %v2345_v4 = vadd.f32 %v2910_v23, %v2344_v49  ;;  %v2914_v53 = vpop.eup %2913  ;;  %v2302_v52 = vadd.f32 %v4273_v34, %v2301_v47 }
0x19c3   : > { %v2916_v54 = vpop.eup %2915  ;;  %2436 = vmatpush.msra.mxu0 %v2395_v15 }
0x19c4   : > { %v2346_v3 = vadd.f32 %v2914_v53, %v2345_v4  ;;  %v2918_v37 = vpop.eup %2917 }
0x19c5   : > { %v2920_v43 = vpop.eup %2919  ;;  %v2303_v41 = vadd.f32 %v2918_v37, %v2302_v52  ;;  %2437 = vmatpush.msra.mxu0 %v2394_v38 }
0x19c6   : > { %v2347_v19 = vadd.f32 %v2916_v54, %v2346_v3  ;;  %v2922_v29 = vpop.eup %2921 }
0x19c7   : > { %v2924_v63 = vpop.eup %2923  ;;  %2925 = vrcp.f32 %v2303_v41  ;;  %2438 = vmatpush.msra.mxu0 %v2393_v46 }
0x19c8   : > { %v2348_v39 = vadd.f32 %v2920_v43, %v2347_v19 }
0x19ca   : > { %v2349_v60 = vadd.f32 %v2922_v29, %v2348_v39 }
0x19cc   : > { %v2350_v48 = vadd.f32 %v2924_v63, %v2349_v60  ;;  %v2413_v60 = vld [vmem:[%s4379_s3 + $0xa0] sm:$0xff] }
0x19cd   : > { %v2926_v59 = vpop.eup %2925  ;;  %v2444_v38 = vperm.slane %v2413_v60, 0 }
0x19ce   : > { %2927 = vrcp.f32 %v2350_v48  ;;  %v2305_v21 = vmul.f32 %v2926_v59, %v4206_v17  ;;  %v2306_v5 = vmul.f32 %v2926_v59, %v4210_v56  ;;  %v2307_v12 = vmul.f32 %v2926_v59, %v4226_v61  ;;  %v2416_v48 = vld [vmem:[%s4379_s3 + $0xb8] sm:$0xff] }
0x19cf   : > { %v2308_v18 = vmul.f32 %v2926_v59, %v4242_v33  ;;  %v2309_v56 = vmul.f32 %v2926_v59, %v4253_v55  ;;  %v2311_v49 = vmul.f32 %v2926_v59, %v4273_v34  ;;  %v2469_v46 = vperm.slane %v2416_v48, 0 }
0x19d4   : > { %v2928_v32 = vpop.eup %2927 }
0x19d5   : > { %v2352_v10 = vmul.f32 %v2928_v32, %v2906_v11  ;;  %v2353_v62 = vmul.f32 %v2928_v32, %v2908_v57  ;;  %v2354_v9 = vmul.f32 %v2928_v32, %v2910_v23  ;;  %v2355_v40 = vmul.f32 %v2928_v32, %v2914_v53 }
0x19d6   : > { %v2356_v2 = vmul.f32 %v2928_v32, %v2916_v54  ;;  %v2357_v16 = vmul.f32 %v2928_v32, %v2920_v43  ;;  %v2310_v11 = vmul.f32 %v2926_v59, %v4263_v36  ;;  %v2358_v35 = vmul.f32 %v2928_v32, %v2922_v29  ;;  %v2414_v29 = vld [vmem:[%s4379_s3 + $0xa8] sm:$0xff] }
0x19d7   : > { %v2362_v0 = vsel %vm305_vm1, %v2305_v21, %v2352_v10  ;;  %v2363_v8 = vsel %vm305_vm1, %v2306_v5, %v2353_v62  ;;  %v2364_v17 = vsel %vm305_vm1, %v2307_v12, %v2354_v9  ;;  %v2365_v61 = vsel %vm305_vm1, %v2308_v18, %v2355_v40 }
0x19d8   : > { %v2370_v1 = vmul.f32 %v2362_v0, %v4149_v25  ;;  %v2371_v33 = vmul.f32 %v2363_v8, %v4092_v31  ;;  %v2372_v22 = vmul.f32 %v2364_v17, %v4135_v7  ;;  %v2366_v57 = vsel %vm305_vm1, %v2309_v56, %v2356_v2 }
0x19d9   : > { %v2373_v47 = vmul.f32 %v2365_v61, %v4071_v44  ;;  %v2359_v14 = vmul.f32 %v2928_v32, %v2924_v63  ;;  %v2367_v31 = vsel %vm305_vm1, %v2310_v11, %v2357_v16  ;;  %v2374_v7 = vmul.f32 %v2366_v57, %v4126_v30 }
0x19da   : > { %v2378_v55 = vsel %vm500_vm11, %v2370_v1, 0.0  ;;  %v2379_v58 = vsel %vm500_vm11, %v2371_v33, 0.0  ;;  %v2381_v36 = vsel %vm500_vm11, %v2372_v22, 0.0  ;;  %v2312_v23 = vmul.f32 %v2926_v59, %v2918_v37 }
0x19db   : > { %v2380_v25 = vadd.f32 %v2379_v58, %v2378_v55  ;;  %v2368_v45 = vsel %vm305_vm1, %v2311_v49, %v2358_v35  ;;  %v2375_v4 = vmul.f32 %v2367_v31, %v4102_v28  ;;  %v2383_v6 = vsel %vm500_vm11, %v2373_v47, 0.0  ;;  %v2420_v28 = vpop.permute.xlu1 %2419 }
0x19dc   : > { %v2369_v34 = vsel %vm305_vm1, %v2312_v23, %v2359_v14  ;;  %v2376_v52 = vmul.f32 %v2368_v45, %v4081_v24  ;;  %v2385_v3 = vsel %vm500_vm11, %v2374_v7, 0.0  ;;  %v2409_v24 = vld [vmem:[%s4379_s3 + $0x80] sm:$0xff] }
0x19dd   : > { %v2382_v44 = vadd.f32 %v2381_v36, %v2380_v25  ;;  %v2377_v26 = vmul.f32 %v2369_v34, %v4154_v20  ;;  %v2387_v54 = vsel %vm500_vm11, %v2375_v4, 0.0  ;;  %2463 = vmatpush.msra.mxu1 %v2409_v24  ;;  %v2415_v20 = vld [vmem:[%s4379_s3 + $0xb0] sm:$0xff] }
0x19de   : > { %v2389_v19 = vsel %vm500_vm11, %v2376_v52, 0.0 }
0x19df   : > { %v2384_v53 = vadd.f32 %v2383_v6, %v2382_v44  ;;  %v2391_v43 = vsel %vm500_vm11, %v2377_v26, 0.0  ;;  %2487 = vmatpush.msrb.mxu1 %v2415_v20 }
0x19e1   : > { %v2386_v30 = vadd.f32 %v2385_v3, %v2384_v53  ;;  %2488 = vmatpush.msrb.mxu1 %v2414_v29 }
0x19e3   : > { %v2388_v37 = vadd.f32 %v2387_v54, %v2386_v30 }
0x19e5   : > { %v2390_v51 = vadd.f32 %v2389_v19, %v2388_v37 }
0x19e7   : > { %v2392_v41 = vadd.f32 %v2391_v43, %v2390_v51 }
0x19e9   : > { %v2422_v42 = vsel %vm500_vm11, %v2392_v41, %v2420_v28  ;;  %vm2493_vm11 = vcmask 23552  }
0x19ea   : > { %2439 = vmatmul.f32.vlgmr.msra.gmra.mxu0 %v2422_v42 }
0x1a67   : > { %v2440_v39 = vpop.f32.mrf.mxu0 }
0x1a68   : > { %v2443_v15 = vmax.f32 %v2440_v39, 0.0 }
0x1a6a   : > { %2668 = vmatmul.msk.f32.vlgmr.msra.gmra.mxu1 %vm2185_vm3, %v2443_v15 }
0x1ae7   : > { %v2465_v63 = vpop.f32.mrf.mxu1 }
0x1ae8   : > { %v2466_v27 = vadd.f32 %v2465_v63, %v2444_v38 }
0x1aea   : > { %v2468_v13 = vmax.f32 %v2466_v27, 0.0 }
0x1aec   : > { %2669 = vmatmul.msk.f32.vlgmr.msrb.gmra.mxu1 %vm373_vm0, %v2468_v13 }
0x1b69   : > { %v2490_v50 = vpop.f32.mrf.mxu1 }
0x1b6a   : > { %v2491_v59 = vadd.f32 %v2490_v50, %v2469_v46 }
0x1b6c   : > { %2494 = vst.msk [vmem:[%s275_s11] sm:$0xff] %vm2493_vm11, %v2491_v59 }
0x1b6d PF: > { %p11_p9 = scmp.ge.s32.totalorder %s2998_s19, 4   ;;  %s4395_s15 = smov %s2947_s16 }
0x1b6e   : > { %s4396_s16 = smov %s3007_s22  ;;  %s4397_s17 = smov %s2998_s19 }
0x1b6f   :  { %13 = sbr.rel (!%p11_p9) target bundleno = 2 (0x2), region = 112 }

</bundles_post_ra>
